<compile_context>
chip_gen: v6e
topology: v6e:2x2x1
jax: 0.10.0
libtpu: 0.0.40
codegen_flags: <defaults>
</compile_context>

<pallas_src>
import jax
import jax.numpy as jnp
from jax.experimental import pallas as pl
from jax.experimental.pallas import tpu as pltpu

NUM_CLASSES = 10
IN_FEATURES = 100 * 100 * 3          # 30000
H1, H2 = 128, 64

K_PAD = 30208                         # 236 * 128, minimal lane multiple >= 30000
assert K_PAD % 128 == 0 and K_PAD >= IN_FEATURES


def _select_config():
    """Pick kernel structure / tile sizes per TPU generation (host-side, static)."""
    try:
        kind = jax.devices()[0].device_kind.lower()
    except Exception:  # pragma: no cover - conservative fallback
        kind = ""
    if "v7" in kind:
        # Dual TensorCore: split K across cores, one K step per core.
        return {"mode": "split", "ncores": 2, "tk": K_PAD // 2}      # 15104
    if "v6" in kind:
        # Single TC, 32 MiB scoped VMEM: big tile, fused epilogue.
        return {"mode": "fused", "ncores": 1, "tk": 15104}           # 2 K steps
    # v5e (16 MiB scoped VMEM default) and anything else: conservative tile.
    return {"mode": "fused", "ncores": 1, "tk": 7552}                # 4 K steps


_CFG = _select_config()
MODE = _CFG["mode"]                   # "fused" (1 TC) or "split" (2 TC)
NCORES = _CFG["ncores"]
TK = _CFG["tk"]
KSTEPS = (K_PAD // NCORES) // TK      # K-reduction steps per core
assert (K_PAD // NCORES) % TK == 0 and TK % 128 == 0


# ---------------------------------------------------------------------------
# Fused single-core kernel: K-reduction of x @ W1 with the bias/ReLU/layer-2/
# layer-3 epilogue folded into the last K step (no partials, no 2nd launch).
# ---------------------------------------------------------------------------
def mlp_fused_kernel(x_ref, w1_ref, b1_ref, w2_ref, b2_ref, w3_ref, b3_ref,
                     o_ref, acc_ref):
    k = pl.program_id(0)

    @pl.when(k == 0)
    def _():
        acc_ref[...] = jnp.zeros_like(acc_ref)

    # One MXU matmul + accumulate per step; the next W1 tile DMA overlaps.
    acc_ref[...] += jnp.dot(x_ref[...], w1_ref[...],
                            preferred_element_type=jnp.float32)

    @pl.when(k == pl.num_programs(0) - 1)
    def _():
        h1 = jnp.maximum(acc_ref[...] + b1_ref[...], 0.0)
        h2 = jnp.maximum(
            jnp.dot(h1, w2_ref[...], preferred_element_type=jnp.float32)
            + b2_ref[...], 0.0)
        o_ref[...] = (jnp.dot(h2, w3_ref[...],
                              preferred_element_type=jnp.float32)
                      + b3_ref[...]).astype(o_ref.dtype)


# ---------------------------------------------------------------------------
# Split-K kernels (dual-TensorCore v7x path)
# ---------------------------------------------------------------------------
def l1_partial_kernel(x_ref, w1_ref, o_ref):
    # Accumulate directly into the VMEM-resident output block (no scratch).
    k = pl.program_id(1)
    part = jnp.dot(x_ref[...], w1_ref[...], preferred_element_type=jnp.float32)

    @pl.when(k == 0)
    def _():
        o_ref[0] = part

    @pl.when(k > 0)
    def _():
        o_ref[0] += part


def mlp_epilogue_kernel(p_ref, b1_ref, w2_ref, b2_ref, w3_ref, b3_ref, o_ref):
    h1 = jnp.maximum(jnp.sum(p_ref[...], axis=0) + b1_ref[...], 0.0)
    h2 = jnp.maximum(
        jnp.dot(h1, w2_ref[...], preferred_element_type=jnp.float32)
        + b2_ref[...], 0.0)
    o_ref[...] = (jnp.dot(h2, w3_ref[...], preferred_element_type=jnp.float32)
                  + b3_ref[...]).astype(o_ref.dtype)


# ---------------------------------------------------------------------------
# One-time param packing (do NOT call per forward step).
# Keeps the pad region of W1 zero so the K padding is mathematically inert.
# NOTE: K_PAD is the single source of truth for both this pad and the per-call
# x pad in mlp_forward; keep them derived from the same constant.
# ---------------------------------------------------------------------------
def prepare_params(w1, b1, w2, b2, w3, b3):
    w1_p = jnp.zeros((K_PAD, H1), jnp.float32).at[:IN_FEATURES, :].set(
        w1.astype(jnp.float32))
    return (w1_p,
            b1.reshape(1, H1).astype(jnp.float32),
            w2.astype(jnp.float32),
            b2.reshape(1, H2).astype(jnp.float32),
            w3.astype(jnp.float32),
            b3.reshape(1, -1).astype(jnp.float32))


@jax.jit
def mlp_forward(x_nchw, w1_p, b1, w2, b2, w3, b3):
    B = x_nchw.shape[0]
    nc = w3.shape[1]

    # nn.Flatten on NCHW input; only x's K dim needs padding (tiny, zeros).
    x = x_nchw.reshape(B, -1).astype(jnp.float32)              # (B, 30000)
    x_p = jnp.pad(x, ((0, 0), (0, K_PAD - IN_FEATURES)))       # (B, K_PAD)

    if MODE == "fused":
        # -------- single fused kernel: split-K reduction + fused epilogue ----
        cost = pl.CostEstimate(
            flops=2 * B * K_PAD * H1 + 2 * B * H1 * H2 + 2 * B * H2 * nc,
            transcendentals=0,
            bytes_accessed=4 * (K_PAD * H1 + B * K_PAD + H1 * H2 + H2 * nc
                                + H1 + H2 + nc + B * nc))
        return pl.pallas_call(
            mlp_fused_kernel,
            out_shape=jax.ShapeDtypeStruct((B, nc), jnp.float32),
            grid_spec=pltpu.PrefetchScalarGridSpec(
                num_scalar_prefetch=0,
                grid=(KSTEPS,),
                in_specs=[
                    pl.BlockSpec((B, TK), lambda k: (0, k)),      # x
                    pl.BlockSpec((TK, H1), lambda k: (k, 0)),     # W1
                    pl.BlockSpec((1, H1), lambda k: (0, 0)),      # b1
                    pl.BlockSpec((H1, H2), lambda k: (0, 0)),     # W2
                    pl.BlockSpec((1, H2), lambda k: (0, 0)),      # b2
                    pl.BlockSpec((H2, nc), lambda k: (0, 0)),     # W3
                    pl.BlockSpec((1, nc), lambda k: (0, 0)),      # b3
                ],
                out_specs=pl.BlockSpec((B, nc), lambda k: (0, 0)),
                scratch_shapes=[pltpu.VMEM((B, H1), jnp.float32)],
            ),
            compiler_params=pltpu.CompilerParams(
                dimension_semantics=("arbitrary",)),
            cost_estimate=cost,
        )(x_p, w1_p, b1, w2, b2, w3, b3)

    # -------- split-K path (v7x, 2 TensorCores) ------------------------------
    # TODO(synk): if xprof shows one TC idle, switch the leading axis to
    # pltpu.CORE_PARALLEL (or restructure with pl.core_map).
    cost1 = pl.CostEstimate(
        flops=2 * B * K_PAD * H1,
        transcendentals=0,
        bytes_accessed=4 * (K_PAD * H1 + B * K_PAD + NCORES * B * H1))
    partial = pl.pallas_call(
        l1_partial_kernel,
        out_shape=jax.ShapeDtypeStruct((NCORES, B, H1), jnp.float32),
        grid_spec=pltpu.PrefetchScalarGridSpec(
            num_scalar_prefetch=0,
            grid=(NCORES, KSTEPS),
            in_specs=[
                pl.BlockSpec((B, TK), lambda c, k: (0, c * KSTEPS + k)),   # x
                pl.BlockSpec((TK, H1), lambda c, k: (c * KSTEPS + k, 0)),  # W1
            ],
            out_specs=pl.BlockSpec((1, B, H1), lambda c, k: (c, 0, 0)),
        ),
        compiler_params=pltpu.CompilerParams(
            dimension_semantics=("parallel", "arbitrary"),
            vmem_limit_bytes=40 << 20),
        cost_estimate=cost1,
    )(x_p, w1_p)

    return pl.pallas_call(
        mlp_epilogue_kernel,
        out_shape=jax.ShapeDtypeStruct((B, nc), jnp.float32),
        grid_spec=pltpu.PrefetchScalarGridSpec(
            num_scalar_prefetch=0,
            grid=(1,),
            in_specs=[
                pl.BlockSpec((NCORES, B, H1), lambda i: (0, 0, 0)),  # partials
                pl.BlockSpec((1, H1), lambda i: (0, 0)),             # b1
                pl.BlockSpec((H1, H2), lambda i: (0, 0)),            # W2
                pl.BlockSpec((1, H2), lambda i: (0, 0)),             # b2
                pl.BlockSpec((H2, nc), lambda i: (0, 0)),            # W3
                pl.BlockSpec((1, nc), lambda i: (0, 0)),             # b3
            ],
            out_specs=pl.BlockSpec((B, nc), lambda i: (0, 0)),
        ),
    )(partial, b1, w2, b2, w3, b3)


def init_params(key, num_classes=NUM_CLASSES):
    """Deterministic init mimicking nn.Linear default: U(-1/sqrt(fan_in), ...)."""
    ks = jax.random.split(key, 6)

    def lin(kw, kb, fan_in, fan_out):
        bound = 1.0 / jnp.sqrt(float(fan_in))
        w = jax.random.uniform(kw, (fan_in, fan_out), jnp.float32, -bound, bound)
        b = jax.random.uniform(kb, (fan_out,), jnp.float32, -bound, bound)
        return w, b

    w1, b1 = lin(ks[0], ks[1], IN_FEATURES, H1)
    w2, b2 = lin(ks[2], ks[3], H1, H2)
    w3, b3 = lin(ks[4], ks[5], H2, num_classes)
    return w1, b1, w2, b2, w3, b3


if __name__ == "__main__":
    key = jax.random.PRNGKey(0)
    kx, kp = jax.random.split(key)

    # The module hardcodes 100x100x3 inputs; use a small batch.
    x = jax.random.normal(kx, (2, 3, 100, 100), jnp.float32)
    params = init_params(kp, NUM_CLASSES)

    packed = prepare_params(*params)          # one-time W1 pad / bias packing
    packed = jax.block_until_ready(packed)

    out = mlp_forward(x, *packed)
    jax.block_until_ready(out)

    # Pure-JAX reference check.
    w1, b1, w2, b2, w3, b3 = params
    xf = x.reshape(2, -1)
    ref = jnp.maximum(xf @ w1 + b1, 0.0)
    ref = jnp.maximum(ref @ w2 + b2, 0.0)
    ref = ref @ w3 + b3
    assert out.shape == (2, NUM_CLASSES)
    assert jnp.allclose(out, ref, atol=1e-4, rtol=1e-4)

    print("KERNEL_OK")
</pallas_src>

<mosaic_0001>
module attributes {stable_mosaic.version = 11 : i64} {
  func.func @mlp_fused_kernel(%arg0: i32, %arg1: memref<2x7552xf32, #tpu.memory_space<vmem>>, %arg2: memref<7552x128xf32, #tpu.memory_space<vmem>>, %arg3: memref<1x128xf32, #tpu.memory_space<vmem>>, %arg4: memref<128x64xf32, #tpu.memory_space<vmem>>, %arg5: memref<1x64xf32, #tpu.memory_space<vmem>>, %arg6: memref<64x10xf32, #tpu.memory_space<vmem>>, %arg7: memref<1x10xf32, #tpu.memory_space<vmem>>, %arg8: memref<2x10xf32, #tpu.memory_space<vmem>>, %arg9: memref<2x128xf32, #tpu.memory_space<vmem>>) attributes {dimension_semantics = [#tpu.dimension_semantics<arbitrary>], iteration_bounds = array<i64: 4>, scalar_prefetch = 0 : i64, scratch_operands = 1 : i64, tpu.core_type = #tpu.core_type<tc>, window_params = [{transform_indices = @transform_0, window_bounds = array<i64: 2, 7552>}, {transform_indices = @transform_1, window_bounds = array<i64: 7552, 128>}, {pipeline_mode = #tpu.pipeline_mode<synchronous>, transform_indices = @transform_2, window_bounds = array<i64: 1, 128>}, {pipeline_mode = #tpu.pipeline_mode<synchronous>, transform_indices = @transform_3, window_bounds = array<i64: 128, 64>}, {pipeline_mode = #tpu.pipeline_mode<synchronous>, transform_indices = @transform_4, window_bounds = array<i64: 1, 64>}, {pipeline_mode = #tpu.pipeline_mode<synchronous>, transform_indices = @transform_5, window_bounds = array<i64: 64, 10>}, {pipeline_mode = #tpu.pipeline_mode<synchronous>, transform_indices = @transform_6, window_bounds = array<i64: 1, 10>}, {pipeline_mode = #tpu.pipeline_mode<synchronous>, transform_indices = @transform_7, window_bounds = array<i64: 2, 10>}]} {
    %c0_i32 = arith.constant 0 : i32
    %0 = arith.cmpi eq, %arg0, %c0_i32 : i32
    %1 = arith.extui %0 : i1 to i32
    %c0_i32_0 = arith.constant 0 : i32
    %2 = arith.cmpi ne, %1, %c0_i32_0 : i32
    scf.if %2 {
      %cst_9 = arith.constant 0.000000e+00 : f32
      %12 = vector.broadcast %cst_9 : f32 to vector<2x128xf32>
      %c0_10 = arith.constant 0 : index
      %c0_11 = arith.constant 0 : index
      %13 = vector.load %arg9[%c0_10, %c0_11] : memref<2x128xf32, #tpu.memory_space<vmem>>, vector<2x128xf32>
      tpu.vector_store %arg9[%c0_10, %c0_11], %12 {strides = array<i32>} : memref<2x128xf32, #tpu.memory_space<vmem>>, vector<2x128xf32>,
    } else {
    }
    %c0 = arith.constant 0 : index
    %c0_1 = arith.constant 0 : index
    %3 = vector.load %arg9[%c0, %c0_1] : memref<2x128xf32, #tpu.memory_space<vmem>>, vector<2x128xf32>
    %c0_2 = arith.constant 0 : index
    %c0_3 = arith.constant 0 : index
    %4 = vector.load %arg1[%c0_2, %c0_3] : memref<2x7552xf32, #tpu.memory_space<vmem>>, vector<2x7552xf32>
    %c0_4 = arith.constant 0 : index
    %c0_5 = arith.constant 0 : index
    %5 = vector.load %arg2[%c0_4, %c0_5] : memref<7552x128xf32, #tpu.memory_space<vmem>>, vector<7552x128xf32>
    %cst = arith.constant dense<0.000000e+00> : vector<2x128xf32>
    %6 = tpu.matmul %4, %5, %cst {dimension_numbers = #tpu.dot_dimension_numbers<[1], [0], [0], [1], [0, 0, 1, 1], [], []>} : vector<2x7552xf32>, vector<7552x128xf32>, vector<2x128xf32> -> vector<2x128xf32>
    %7 = arith.addf %3, %6 : vector<2x128xf32>
    %c0_6 = arith.constant 0 : index
    %c0_7 = arith.constant 0 : index
    %8 = vector.load %arg9[%c0_6, %c0_7] : memref<2x128xf32, #tpu.memory_space<vmem>>, vector<2x128xf32>
    tpu.vector_store %arg9[%c0_6, %c0_7], %7 {strides = array<i32>} : memref<2x128xf32, #tpu.memory_space<vmem>>, vector<2x128xf32>,
    %c3_i32 = arith.constant 3 : i32
    %9 = arith.cmpi eq, %arg0, %c3_i32 : i32
    %10 = arith.extui %9 : i1 to i32
    %c0_i32_8 = arith.constant 0 : i32
    %11 = arith.cmpi ne, %10, %c0_i32_8 : i32
    scf.if %11 {
      %c0_9 = arith.constant 0 : index
      %c0_10 = arith.constant 0 : index
      %12 = vector.load %arg9[%c0_9, %c0_10] : memref<2x128xf32, #tpu.memory_space<vmem>>, vector<2x128xf32>
      %c0_11 = arith.constant 0 : index
      %c0_12 = arith.constant 0 : index
      %13 = vector.load %arg3[%c0_11, %c0_12] : memref<1x128xf32, #tpu.memory_space<vmem>>, vector<1x128xf32>
      %14 = vector.broadcast %13 : vector<1x128xf32> to vector<2x128xf32>
      %15 = arith.addf %12, %14 : vector<2x128xf32>
      %cst_13 = arith.constant 0.000000e+00 : f32
      %16 = vector.broadcast %cst_13 : f32 to vector<2x128xf32>
      %17 = arith.maximumf %15, %16 : vector<2x128xf32>
      %c0_14 = arith.constant 0 : index
      %c0_15 = arith.constant 0 : index
      %18 = vector.load %arg4[%c0_14, %c0_15] : memref<128x64xf32, #tpu.memory_space<vmem>>, vector<128x64xf32>
      %cst_16 = arith.constant dense<0.000000e+00> : vector<2x64xf32>
      %19 = tpu.matmul %17, %18, %cst_16 {dimension_numbers = #tpu.dot_dimension_numbers<[1], [0], [0], [1], [0, 0, 1, 1], [], []>} : vector<2x128xf32>, vector<128x64xf32>, vector<2x64xf32> -> vector<2x64xf32>
      %c0_17 = arith.constant 0 : index
      %c0_18 = arith.constant 0 : index
      %20 = vector.load %arg5[%c0_17, %c0_18] : memref<1x64xf32, #tpu.memory_space<vmem>>, vector<1x64xf32>
      %21 = vector.broadcast %20 : vector<1x64xf32> to vector<2x64xf32>
      %22 = arith.addf %19, %21 : vector<2x64xf32>
      %cst_19 = arith.constant 0.000000e+00 : f32
      %23 = vector.broadcast %cst_19 : f32 to vector<2x64xf32>
      %24 = arith.maximumf %22, %23 : vector<2x64xf32>
      %c0_20 = arith.constant 0 : index
      %c0_21 = arith.constant 0 : index
      %25 = vector.load %arg6[%c0_20, %c0_21] : memref<64x10xf32, #tpu.memory_space<vmem>>, vector<64x10xf32>
      %cst_22 = arith.constant dense<0.000000e+00> : vector<2x10xf32>
      %26 = tpu.matmul %24, %25, %cst_22 {dimension_numbers = #tpu.dot_dimension_numbers<[1], [0], [0], [1], [0, 0, 1, 1], [], []>} : vector<2x64xf32>, vector<64x10xf32>, vector<2x10xf32> -> vector<2x10xf32>
      %c0_23 = arith.constant 0 : index
      %c0_24 = arith.constant 0 : index
      %27 = vector.load %arg7[%c0_23, %c0_24] : memref<1x10xf32, #tpu.memory_space<vmem>>, vector<1x10xf32>
      %28 = vector.broadcast %27 : vector<1x10xf32> to vector<2x10xf32>
      %29 = arith.addf %26, %28 : vector<2x10xf32>
      %c0_25 = arith.constant 0 : index
      %c0_26 = arith.constant 0 : index
      %30 = vector.load %arg8[%c0_25, %c0_26] : memref<2x10xf32, #tpu.memory_space<vmem>>, vector<2x10xf32>
      tpu.vector_store %arg8[%c0_25, %c0_26], %29 {strides = array<i32>} : memref<2x10xf32, #tpu.memory_space<vmem>>, vector<2x10xf32>,
    } else {
    }
    return
  }
  func.func @transform_0(%arg0: i32) -> (i32, i32) {
    %c0_i32 = arith.constant 0 : i32
    %c0_i32_0 = arith.constant 0 : i32
    return %c0_i32, %arg0 : i32, i32
  }
  func.func @transform_1(%arg0: i32) -> (i32, i32) {
    %c0_i32 = arith.constant 0 : i32
    %c0_i32_0 = arith.constant 0 : i32
    return %arg0, %c0_i32 : i32, i32
  }
  func.func @transform_2(%arg0: i32) -> (i32, i32) {
    %c0_i32 = arith.constant 0 : i32
    %c0_i32_0 = arith.constant 0 : i32
    %c0_i32_1 = arith.constant 0 : i32
    return %c0_i32, %c0_i32_0 : i32, i32
  }
  func.func @transform_3(%arg0: i32) -> (i32, i32) {
    %c0_i32 = arith.constant 0 : i32
    %c0_i32_0 = arith.constant 0 : i32
    %c0_i32_1 = arith.constant 0 : i32
    return %c0_i32, %c0_i32_0 : i32, i32
  }
  func.func @transform_4(%arg0: i32) -> (i32, i32) {
    %c0_i32 = arith.constant 0 : i32
    %c0_i32_0 = arith.constant 0 : i32
    %c0_i32_1 = arith.constant 0 : i32
    return %c0_i32, %c0_i32_0 : i32, i32
  }
  func.func @transform_5(%arg0: i32) -> (i32, i32) {
    %c0_i32 = arith.constant 0 : i32
    %c0_i32_0 = arith.constant 0 : i32
    %c0_i32_1 = arith.constant 0 : i32
    return %c0_i32, %c0_i32_0 : i32, i32
  }
  func.func @transform_6(%arg0: i32) -> (i32, i32) {
    %c0_i32 = arith.constant 0 : i32
    %c0_i32_0 = arith.constant 0 : i32
    %c0_i32_1 = arith.constant 0 : i32
    return %c0_i32, %c0_i32_0 : i32, i32
  }
  func.func @transform_7(%arg0: i32) -> (i32, i32) {
    %c0_i32 = arith.constant 0 : i32
    %c0_i32_0 = arith.constant 0 : i32
    %c0_i32_1 = arith.constant 0 : i32
    return %c0_i32, %c0_i32_0 : i32, i32
  }
}

</mosaic_0001>

<bundles_post_ra>
// kernel: mlp_forward.1
= control target key start
LH: loop header
LB: loop body
LE: loop exit
PB: predicated region body
PF: predicated region fallthrough
CT: control target
= control target key end

     0   :  { %12 = vsyncpa [#allocation4], 0  ;;  %s6823_s0 = inlined_call_operand.vmem [shape: f32[2,30208], index: 0, kind: input, shape index: {}]   ;;  %s6824_s1 = inlined_call_operand.hbm [shape: f32[30208,128], index: 1, kind: input, shape index: {}]   ;;  %s6825_s2 = inlined_call_operand.hbm [shape: f32[1,128], index: 2, kind: input, shape index: {}]   ;;  %s6826_s3 = inlined_call_operand.vmem [shape: f32[128,64], index: 3, kind: input, shape index: {}]   ;;  %s6827_s4 = inlined_call_operand.hbm [shape: f32[1,64], index: 4, kind: input, shape index: {}]   ;;  %s6828_s5 = inlined_call_operand.vmem [shape: f32[64,10], index: 5, kind: input, shape index: {}]   ;;  %s6829_s6 = inlined_call_operand.hbm [shape: f32[1,10], index: 6, kind: input, shape index: {}]   ;;  %s6830_s7 = inlined_call_operand.hbm [shape: f32[2,10], index: 7, kind: output, shape index: {}]  }
   0x1   :  { %14 = vsyncpa [#allocation4 + $0x1], 0 }
   0x2   :  { %15 = vsyncpa [#allocation7], 0 }
   0x3   :  { %16 = vsyncpa [#allocation10], 0 }
   0x4   :  { %17 = vsyncpa [#allocation5], 0  ;;  %s5541_s24 = smov 0   ;;  %s5543_s25 = smov 0  }
   0x5   :  { %s5545_s26 = smov 0   ;;  %s5547_s27 = smov 0  }
   0x6 LB: > { %s5560_s28 = sadd.s32 4294967295, %s5486_s27   ;;  %p69_p0 = scmp.ne.s32.totalorder %s5478_s25, %s5474_s24  ;;  %s5486_s27 = sphi %s5547_s27, %s6848_s27   ;;  %s5482_s26 = sphi %s5545_s26, %s6847_s26   ;;  %s5478_s25 = sphi %s5543_s25, %s6846_s25   ;;  %s5474_s24 = sphi %s5541_s24, %s6845_s24  }
   0x7   : > { %p6831_p1 = scmp.eq.s32.totalorder %s5560_s28, 0  ;;  %p4039_p2 = scmp.ge.s32.totalorder %s5486_s27, 1 }
   0x8   : > { %p206_p3 = scmp.lt.s32.totalorder %s5486_s27, 5  ;;  %s5488_s8 = smov [#allocation6]  }
   0x9   : > { %p5569_p5 = por %p6831_p1, %p69_p0  ;;  %s219_s9 = sshll.u32 %s5488_s8, 4  ;;  %s220_s9 = int_to_ptr.vmem [resolvable:$true] %s219_s9 }
   0xa   : > { %p5573_p6 = pnand %p4039_p2, %p206_p3  ;;  %s5489_s10 = smov [#allocation8]  }
   0xb   : > { %s6834_s29 = scalar_select %p5569_p5, 1, 0 }
   0xc   : > { %s6835_s30 = scalar_select %p5573_p6, 1, 0 }
   0xd   : > { %p5228_p7 = pneg %p5573_p6  ;;  %s233_s11 = sshll.u32 %s5489_s10, 4  ;;  %s234_s11 = int_to_ptr.vmem [resolvable:$true] %s233_s11 }
   0xe   : > { %s5490_s13 = smov [#allocation9]   ;;  %s5321_s15 = scalar_lea.vmem %s220_s9, 16 }
   0xf   : > { %p5581_p8 = pnand %p5228_p7, %p6831_p1  ;;  %s247_s14 = sshll.u32 %s5490_s13, 4  ;;  %s5585_s14 = int_to_ptr.vmem [resolvable:$true] %s247_s14 }
  0x10   : > { %p5322_p10 = scmp.ne.s32.totalorder %s220_s9, %s5321_s15  ;;  %s5328_s16 = scalar_lea.vmem %s220_s9, 32 }
  0x11   : > { %p5312_p9 = pneg %p5581_p8  ;;  %p5329_p13 = scmp.lt.s32.totalorder %s220_s9, %s220_s9 }
  0x12   : > { %p5330_p0 = scmp.lt.s32.totalorder %s5328_s16, %s5321_s15 }
  0x13   : > { %p5324_p11 = pnand %p5322_p10, %p5312_p9 }
  0x14   : > { %p5331_p2 = por %p5330_p0, %p5329_p13 }
  0x15   : > { %p5325_p12 = pneg %p5324_p11 }
  0x17   : > { %p5332_p3 = pnand %p5331_p2, %p5325_p12 }
  0x19   : > { %5335 = shalt.err (!%p5332_p3)
}
  0x1a   : > { %5231 = dma.hbm_to_vmem [thread:$0]  (!%p5581_p8), %s6825_s2, 16, %s220_s9, [#allocation7]  }
  0x1b   : > { %s5347_s19 = scalar_lea.vmem %s234_s11, 16  ;;  %s5354_s20 = scalar_lea.vmem %s234_s11, 32 }
  0x1c   : > { %p5348_p7 = scmp.ne.s32.totalorder %s234_s11, %s5347_s19  ;;  %p5355_p11 = scmp.lt.s32.totalorder %s234_s11, %s234_s11 }
  0x1d   : > { %p5356_p1 = scmp.lt.s32.totalorder %s5354_s20, %s5347_s19 }
  0x1e   : > { %p5350_p4 = pnand %p5348_p7, %p5312_p9 }
  0x1f   : > { %p5357_p5 = por %p5356_p1, %p5355_p11 }
  0x20   : > { %p5351_p10 = pneg %p5350_p4 }
  0x22   : > { %p5358_p13 = pnand %p5357_p5, %p5351_p10 }
  0x24   : > { %5361 = shalt.err (!%p5358_p13)
}
  0x25   : > { %5234 = dma.hbm_to_vmem [thread:$0]  (!%p5581_p8), %s6827_s4, 16, %s234_s11, [#allocation7]  }
  0x26   : > { %s5373_s23 = scalar_lea.vmem %s5585_s14, 16  ;;  %s5380_s24 = scalar_lea.vmem %s5585_s14, 32 }
  0x27   : > { %p5374_p12 = scmp.ne.s32.totalorder %s5585_s14, %s5373_s23  ;;  %p5381_p1 = scmp.lt.s32.totalorder %s5585_s14, %s5585_s14 }
  0x28   : > { %p5382_p5 = scmp.lt.s32.totalorder %s5380_s24, %s5373_s23 }
  0x29   : > { %p5376_p4 = pnand %p5374_p12, %p5312_p9 }
  0x2a   : > { %p5383_p2 = por %p5382_p5, %p5381_p1 }
  0x2b   : > { %p5377_p0 = pneg %p5376_p4 }
  0x2d   : > { %p5384_p3 = pnand %p5383_p2, %p5377_p0 }
  0x2f   : > { %5387 = shalt.err (!%p5384_p3)
}
  0x30   : > { %5237 = dma.hbm_to_vmem [thread:$0]  (!%p5581_p8), %s6829_s6, 16, %s5585_s14, [#allocation10]  }
  0x31   : > { %s5620_s10 = sadd.s32 1, %s5486_s27   ;;  %s56_s12 = sadd.s32 1, %s5482_s26 }
  0x32   : > { %s53_s11 = ssub.s32 %s5486_s27, %s5620_s10  ;;  %p63_p7 = scmp.ne.s32.totalorder %s5482_s26, %s5478_s25 }
  0x33   : > { %p54_p9 = scmp.eq.s32.totalorder %s53_s11, 0  ;;  %p64_p10 = scmp.eq.s32.totalorder %s5486_s27, 0 }
  0x34   : > { %p5245_p11 = scmp.lt.s32.totalorder %s5486_s27, 4  ;;  %s267_s15 = sand.u32 1, %s5482_s26  }
  0x35   : > { %s5630_s13 = scalar_select %p54_p9, %s5482_s26, %s56_s12  }
  0x36   : > { %p65_p13 = por %p64_p10, %p63_p7  ;;  %s5208_s16 = smul.u32 7552, %s267_s15 }
  0x37   : > { %s4060_s17 = smul.u32 120832, %s5486_s27  ;;  %s5645_s23 = scalar_lea.sflag [#allocation4], %s267_s15 }
  0x38   : > { %p5634_p12 = pnand %p5245_p11, %p65_p13  ;;  %s271_s21 = scalar_lea.vmem [#allocation3], %s5208_s16 }
  0x39   : > { %s5641_s20 = scalar_lea.hbm %s6824_s1, %s4060_s17  ;;  %s278_s22 = sshll.u32 %s271_s21, 4  ;;  %s5643_s22 = int_to_ptr.vmem [resolvable:$true] %s278_s22 }
  0x3a   : > { %s5388_s27 = scalar_lea.hbm %s5641_s20, 120832  ;;  %p5390_p4 = pneg %p5634_p12 }
  0x3b   : > { %p5389_p8 = scmp.ne.s32.totalorder %s5641_s20, %s5388_s27  ;;  %s5393_s9 = scalar_lea.hbm %s6824_s1, 483328 }
  0x3c   : > { %p5394_p5 = scmp.lt.s32.totalorder %s5641_s20, %s6824_s1  ;;  %p5395_p2 = scmp.lt.s32.totalorder %s5393_s9, %s5388_s27 }
  0x3d   : > { %p5391_p0 = pnand %p5390_p4, %p5389_p8 }
  0x3e   : > { %p5396_p3 = por %p5395_p2, %p5394_p5 }
  0x3f   : > { %p5392_p1 = pneg %p5391_p0 }
  0x41   : > { %p5397_p9 = pnand %p5396_p3, %p5392_p1 }
  0x43   : > { %5400 = shalt.err (!%p5397_p9)
}
  0x44   : > { %s5401_s15 = scalar_lea.vmem %s5643_s22, 120832  ;;  %s5491_s16 = smov [#allocation3]  }
  0x45   : > { %p5402_p7 = scmp.ne.s32.totalorder %s5643_s22, %s5401_s15  ;;  %s5406_s17 = sshll.u32 %s5491_s16, 4  ;;  %s5407_s17 = int_to_ptr.vmem [resolvable:$false] %s5406_s17 }
  0x46   : > { %s5408_s14 = scalar_lea.vmem %s5407_s17, 241664  ;;  %p5409_p13 = scmp.lt.s32.totalorder %s5643_s22, %s5407_s17 }
  0x47   : > { %p5404_p10 = pnand %p5402_p7, %p5390_p4  ;;  %p5410_p8 = scmp.lt.s32.totalorder %s5408_s14, %s5401_s15 }
  0x49   : > { %p5405_p11 = pneg %p5404_p10  ;;  %p5411_p0 = por %p5410_p8, %p5409_p13 }
  0x4b   : > { %p5412_p6 = pnand %p5411_p0, %p5405_p11 }
  0x4d   : > { %5415 = shalt.err (!%p5412_p6)
}
  0x4e   : > { %s5492_s19 = smov 128   ;;  %s5493_s21 = smov 8  }
  0x4f   : > { %5241 = dma.hbm_to_vmem [thread:$0]  (!%p5634_p12), %s5641_s20, 120832, %s5643_s22, %s5645_s23, %s5492_s19, %s5492_s19, %s5493_s21  }
  0x50   : > { %p6838_p4 = scmp.ne.s32.totalorder %s6835_s30, 0 }
  0x51   : > { %s292_s27 = sand.u32 (!%p6838_p4), 1, %s5478_s25   ;;  %p6839_p1 = scmp.ne.s32.totalorder (!%p6838_p4), %s6834_s29, 0 }
  0x52   : > { %290 = sbr.rel (%p6838_p4) target bundleno = 1257 (0x4e9), region = 48  ;;  %s293_s8 = scalar_lea.sflag (!%p6838_p4), [#allocation4], %s292_s27 }
  0x53   : > { %s5209_s24 = smul.u32 (!%p6838_p4), 7552, %s292_s27 }
  0x55   : > { %s5669_s9 = scalar_lea.vmem (!%p6838_p4), [#allocation3], %s5209_s24 }
  0x57   : > { %5457 = dma.done.wait (%p6839_p1), %s293_s8, 120832  }
  0x58   : > { %5459 = vsyncadd (%p6839_p1), %s293_s8, 4294846464  ;;  %p6840_p6 = scmp.eq.s32.totalorder %s5560_s28, 0 }
  0x5a   : > { %5461 = dma.done.wait (%p6840_p6), [#allocation7], 32   ;;  %p6841_p12 = pmov %p6840_p6 }
  0x5b   : > { %p6842_p5 = pmov %p6840_p6 }
  0x5c   : > { %5463 = vsyncadd (%p6841_p12), [#allocation7], 4294967264 }
  0x5d   : > { %5465 = dma.done.wait (%p6842_p5), [#allocation10], 16   ;;  %p6843_p2 = pmov %p6842_p5 }
  0x5e   : > { %s339_s30 = smul.u32 59, %s5560_s28  ;;  %p6844_p9 = scmp.ne.s32.totalorder %s5560_s28, 0 }
  0x5f   : > { %5467 = vsyncadd (%p6843_p2), [#allocation10], 4294967280 }
  0x60   : > { %p340_p3 = scmp.lt.s32.totalorder %s339_s30, 235  ;;  %349 = sbr.rel (%p6844_p9) target bundleno = 103 (0x67), region = 68 }
  0x62   : > { %s6850_s30 = smov (!%p340_p3, %s339_s30), 235 }
  0x63   : > { %s4049_s18 = sshll.u32 %s6850_s30, 1 }
  0x64   : > { %s5687_s22 = scalar_lea.vmem %s6823_s0, %s4049_s18 }
  0x65   : > { %v5494_v0 = vmov 0.0  }
  0x66   : > { %350 = vst [vmem:[#allocation2] sm:$0x3] %v5494_v0 }
  0x67 PF: > { %v398_v1 = vld [vmem:[%s5669_s9 + $0xf8] sm:$0xff]  ;;  %v397_v5 = vld [vmem:[%s5669_s9 + $0xf0] sm:$0xff]  ;;  %v396_v9 = vld [vmem:[%s5669_s9 + $0xe8] sm:$0xff]  ;;  %v5495_v31 = vmov 1983009808   ;;  %v1330_v33 = vlaneseq  ;;  %vm5497_vm0 = vmmov 0  }
  0x68   : > { %v430_v2 = vld [vmem:[%s5669_s9 + $0x1f8] sm:$0xff]  ;;  %4061 = vmatprep.subr.mxu0 %v398_v1  ;;  %v429_v6 = vld [vmem:[%s5669_s9 + $0x1f0] sm:$0xff]  ;;  %v428_v10 = vld [vmem:[%s5669_s9 + $0x1e8] sm:$0xff]  ;;  %v1328_v32 = vunpack.c.l.s4 %v5495_v31  ;;  %p4051_p7 = scmp.ne.s32.totalorder %s5560_s28, 3 }
  0x69   : > { %v382_v3 = vld [vmem:[%s5669_s9 + $0x78] sm:$0xff]  ;;  %4096 = vmatprep.subr.mxu1 %v430_v2  ;;  %v381_v7 = vld [vmem:[%s5669_s9 + $0x70] sm:$0xff]  ;;  %v380_v11 = vld [vmem:[%s5669_s9 + $0x68] sm:$0xff]  ;;  %v1331_v43 = vshrl.u32 %v1330_v33, 7 }
  0x6a   : > { %v414_v4 = vld [vmem:[%s5669_s9 + $0x178] sm:$0xff]  ;;  %4062 = vmatpush3.msra.mxu0 %v382_v3  ;;  %v413_v8 = vld [vmem:[%s5669_s9 + $0x170] sm:$0xff]  ;;  %v412_v12 = vld [vmem:[%s5669_s9 + $0x168] sm:$0xff]  ;;  %v1329_v42 = vunpack.c.0.s8 %v1328_v32 }
  0x6b   : > { %4097 = vmatpush3.msra.mxu1 %v414_v4  ;;  %4063 = vmatprep.subr.mxu0 %v397_v5  ;;  %v395_v13 = vld [vmem:[%s5669_s9 + $0xe0] sm:$0xff]  ;;  %v394_v17 = vld [vmem:[%s5669_s9 + $0xd8] sm:$0xff]  ;;  %v393_v21 = vld [vmem:[%s5669_s9 + $0xd0] sm:$0xff] }
  0x6c   : > { %4098 = vmatprep.subr.mxu1 %v429_v6  ;;  %4064 = vmatpush3.msra.mxu0 %v381_v7  ;;  %v427_v14 = vld [vmem:[%s5669_s9 + $0x1e0] sm:$0xff]  ;;  %v426_v18 = vld [vmem:[%s5669_s9 + $0x1d8] sm:$0xff]  ;;  %v425_v22 = vld [vmem:[%s5669_s9 + $0x1d0] sm:$0xff]  ;;  %v5737_v52 = vsub.s32 %v1329_v42, %v1331_v43 }
  0x6d   : > { %4099 = vmatpush3.msra.mxu1 %v413_v8  ;;  %4065 = vmatprep.subr.mxu0 %v396_v9  ;;  %v379_v15 = vld [vmem:[%s5669_s9 + $0x60] sm:$0xff]  ;;  %v378_v19 = vld [vmem:[%s5669_s9 + $0x58] sm:$0xff]  ;;  %v377_v23 = vld [vmem:[%s5669_s9 + $0x50] sm:$0xff] }
  0x6e   : > { %4100 = vmatprep.subr.mxu1 %v428_v10  ;;  %v411_v16 = vld [vmem:[%s5669_s9 + $0x160] sm:$0xff]  ;;  %4066 = vmatpush3.msra.mxu0 %v380_v11  ;;  %v410_v20 = vld [vmem:[%s5669_s9 + $0x158] sm:$0xff]  ;;  %v409_v24 = vld [vmem:[%s5669_s9 + $0x150] sm:$0xff] }
  0x6f   : > { %4101 = vmatpush3.msra.mxu1 %v412_v12  ;;  %4067 = vmatprep.subr.mxu0 %v395_v13  ;;  %v392_v25 = vld [vmem:[%s5669_s9 + $0xc8] sm:$0xff]  ;;  %v391_v29 = vld [vmem:[%s5669_s9 + $0xc0] sm:$0xff]  ;;  %v390_v36 = vld [vmem:[%s5669_s9 + $0xb8] sm:$0xff] }
  0x70   : > { %4102 = vmatprep.subr.mxu1 %v427_v14  ;;  %4068 = vmatpush3.msra.mxu0 %v379_v15  ;;  %v424_v26 = vld [vmem:[%s5669_s9 + $0x1c8] sm:$0xff]  ;;  %v423_v30 = vld [vmem:[%s5669_s9 + $0x1c0] sm:$0xff]  ;;  %v422_v37 = vld [vmem:[%s5669_s9 + $0x1b8] sm:$0xff] }
  0x71   : > { %4103 = vmatpush3.msra.mxu1 %v411_v16  ;;  %4069 = vmatprep.subr.mxu0 %v394_v17  ;;  %v376_v27 = vld [vmem:[%s5669_s9 + $0x48] sm:$0xff]  ;;  %v375_v34 = vld [vmem:[%s5669_s9 + $0x40] sm:$0xff]  ;;  %v374_v38 = vld [vmem:[%s5669_s9 + $0x38] sm:$0xff] }
  0x72   : > { %4104 = vmatprep.subr.mxu1 %v426_v18  ;;  %4070 = vmatpush3.msra.mxu0 %v378_v19  ;;  %v408_v28 = vld [vmem:[%s5669_s9 + $0x148] sm:$0xff]  ;;  %v407_v35 = vld [vmem:[%s5669_s9 + $0x140] sm:$0xff]  ;;  %v406_v39 = vld [vmem:[%s5669_s9 + $0x138] sm:$0xff] }
  0x73   : > { %4105 = vmatpush3.msra.mxu1 %v410_v20  ;;  %4071 = vmatprep.subr.mxu0 %v393_v21  ;;  %v389_v40 = vld [vmem:[%s5669_s9 + $0xb0] sm:$0xff]  ;;  %v388_v46 = vld [vmem:[%s5669_s9 + $0xa8] sm:$0xff]  ;;  %v387_v50 = vld [vmem:[%s5669_s9 + $0xa0] sm:$0xff] }
  0x74   : > { %4106 = vmatprep.subr.mxu1 %v425_v22  ;;  %4072 = vmatpush3.msra.mxu0 %v377_v23  ;;  %v421_v41 = vld [vmem:[%s5669_s9 + $0x1b0] sm:$0xff]  ;;  %v420_v47 = vld [vmem:[%s5669_s9 + $0x1a8] sm:$0xff]  ;;  %v419_v51 = vld [vmem:[%s5669_s9 + $0x1a0] sm:$0xff] }
  0x75   : > { %4107 = vmatpush3.msra.mxu1 %v409_v24  ;;  %4073 = vmatprep.subr.mxu0 %v392_v25  ;;  %v373_v44 = vld [vmem:[%s5669_s9 + $0x30] sm:$0xff]  ;;  %v372_v48 = vld [vmem:[%s5669_s9 + $0x28] sm:$0xff]  ;;  %v371_v53 = vld [vmem:[%s5669_s9 + $0x20] sm:$0xff] }
  0x76   : > { %4108 = vmatprep.subr.mxu1 %v424_v26  ;;  %4074 = vmatpush3.msra.mxu0 %v376_v27  ;;  %v405_v45 = vld [vmem:[%s5669_s9 + $0x130] sm:$0xff]  ;;  %v404_v49 = vld [vmem:[%s5669_s9 + $0x128] sm:$0xff]  ;;  %v403_v54 = vld [vmem:[%s5669_s9 + $0x120] sm:$0xff] }
  0x77   : > { %4109 = vmatpush3.msra.mxu1 %v408_v28  ;;  %4075 = vmatprep.subr.mxu0 %v391_v29  ;;  %v352_v55 = vld [vmem:[%s5687_s22] sm:$0xff]  ;;  %v385_v61 = vld [vmem:[%s5669_s9 + $0x90] sm:$0xff]  ;;  %v384_v3 = vld [vmem:[%s5669_s9 + $0x88] sm:$0xff] }
  0x78   : > { %4110 = vmatprep.subr.mxu1 %v423_v30  ;;  %4076 = vmatpush3.msra.mxu0 %v375_v34  ;;  %v386_v56 = vld [vmem:[%s5669_s9 + $0x98] sm:$0xff]  ;;  %v1326_v58 = vcombine.high %v352_v55, %v352_v55  ;;  %v417_v62 = vld [vmem:[%s5669_s9 + $0x190] sm:$0xff]  ;;  %v1333_v63 = vrot.slane %v352_v55, %v5737_v52  ;;  %v416_v4 = vld [vmem:[%s5669_s9 + $0x188] sm:$0xff] }
  0x79   : > { %4111 = vmatpush3.msra.mxu1 %v407_v35  ;;  %4077 = vmatprep.subr.mxu0 %v390_v36  ;;  %v418_v57 = vld [vmem:[%s5669_s9 + $0x198] sm:$0xff]  ;;  %v369_v0 = vld [vmem:[%s5669_s9 + $0x10] sm:$0xff]  ;;  %v368_v5 = vld [vmem:[%s5669_s9 + $0x8] sm:$0xff] }
  0x7a   : > { %4112 = vmatprep.subr.mxu1 %v422_v37  ;;  %4078 = vmatpush3.msra.mxu0 %v374_v38  ;;  %v370_v59 = vld [vmem:[%s5669_s9 + $0x18] sm:$0xff]  ;;  %v401_v1 = vld [vmem:[%s5669_s9 + $0x110] sm:$0xff]  ;;  %v1340_v2 = vrot.slane %v1326_v58, %v5737_v52  ;;  %v400_v6 = vld [vmem:[%s5669_s9 + $0x108] sm:$0xff]  ;;  %v1341_v9 = vcombine.high %v1333_v63, %v1333_v63 }
  0x7b   : > { %4113 = vmatpush3.msra.mxu1 %v406_v39  ;;  %4079 = vmatprep.subr.mxu0 %v389_v40  ;;  %v402_v60 = vld [vmem:[%s5669_s9 + $0x118] sm:$0xff]  ;;  %v383_v7 = vld [vmem:[%s5669_s9 + $0x80] sm:$0xff]  ;;  %v461_v17 = vld [vmem:[%s5669_s9 + $0x2f0] sm:$0xff] }
  0x7c   : > { %4114 = vmatprep.subr.mxu1 %v421_v41  ;;  %4080 = vmatpush3.msra.mxu0 %v373_v44  ;;  %v415_v8 = vld [vmem:[%s5669_s9 + $0x180] sm:$0xff]  ;;  %v1342_v11 = vcombine.high %v1340_v2, %v1340_v2  ;;  %v462_v13 = vld [vmem:[%s5669_s9 + $0x2f8] sm:$0xff]  ;;  %v493_v18 = vld [vmem:[%s5669_s9 + $0x3f0] sm:$0xff] }
  0x7d   : > { %4115 = vmatpush3.msra.mxu1 %v405_v45  ;;  %4081 = vmatprep.subr.mxu0 %v388_v46  ;;  %v367_v10 = vld [vmem:[%s5669_s9] sm:$0xff]  ;;  %v494_v14 = vld [vmem:[%s5669_s9 + $0x3f8] sm:$0xff]  ;;  %v445_v19 = vld [vmem:[%s5669_s9 + $0x270] sm:$0xff] }
  0x7e   : > { %4116 = vmatprep.subr.mxu1 %v420_v47  ;;  %4082 = vmatpush3.msra.mxu0 %v372_v48  ;;  %v399_v12 = vld [vmem:[%s5669_s9 + $0x100] sm:$0xff]  ;;  %v446_v15 = vld [vmem:[%s5669_s9 + $0x278] sm:$0xff]  ;;  %v477_v20 = vld [vmem:[%s5669_s9 + $0x370] sm:$0xff] }
  0x7f   : > { %4117 = vmatpush3.msra.mxu1 %v404_v49  ;;  %4083 = vmatprep.subr.mxu0 %v387_v50  ;;  %v478_v16 = vld [vmem:[%s5669_s9 + $0x378] sm:$0xff]  ;;  %v460_v21 = vld [vmem:[%s5669_s9 + $0x2e8] sm:$0xff]  ;;  %v459_v25 = vld [vmem:[%s5669_s9 + $0x2e0] sm:$0xff] }
  0x80   : > { %4118 = vmatprep.subr.mxu1 %v419_v51  ;;  %4084 = vmatpush3.msra.mxu0 %v371_v53  ;;  %v492_v22 = vld [vmem:[%s5669_s9 + $0x3e8] sm:$0xff]  ;;  %v491_v26 = vld [vmem:[%s5669_s9 + $0x3e0] sm:$0xff]  ;;  %v458_v29 = vld [vmem:[%s5669_s9 + $0x2d8] sm:$0xff] }
  0x81   : > { %4119 = vmatpush3.msra.mxu1 %v403_v54  ;;  %4085 = vmatprep.subr.mxu0 %v386_v56  ;;  %v444_v23 = vld [vmem:[%s5669_s9 + $0x268] sm:$0xff]  ;;  %v443_v27 = vld [vmem:[%s5669_s9 + $0x260] sm:$0xff]  ;;  %v490_v30 = vld [vmem:[%s5669_s9 + $0x3d8] sm:$0xff] }
  0x82   : > { %4120 = vmatprep.subr.mxu1 %v418_v57  ;;  %4086 = vmatpush3.msra.mxu0 %v370_v59  ;;  %v476_v24 = vld [vmem:[%s5669_s9 + $0x368] sm:$0xff]  ;;  %v475_v28 = vld [vmem:[%s5669_s9 + $0x360] sm:$0xff]  ;;  %v442_v31 = vld [vmem:[%s5669_s9 + $0x258] sm:$0xff] }
  0x83   : > { %4121 = vmatpush3.msra.mxu1 %v402_v60  ;;  %4087 = vmatprep.subr.mxu0 %v385_v61  ;;  %v474_v32 = vld [vmem:[%s5669_s9 + $0x358] sm:$0xff]  ;;  %v457_v33 = vld [vmem:[%s5669_s9 + $0x2d0] sm:$0xff]  ;;  %v456_v37 = vld [vmem:[%s5669_s9 + $0x2c8] sm:$0xff] }
  0x84   : > { %4122 = vmatprep.subr.mxu1 %v417_v62  ;;  %4088 = vmatpush3.msra.mxu0 %v369_v0  ;;  %v489_v34 = vld [vmem:[%s5669_s9 + $0x3d0] sm:$0xff]  ;;  %v488_v38 = vld [vmem:[%s5669_s9 + $0x3c8] sm:$0xff]  ;;  %v455_v41 = vld [vmem:[%s5669_s9 + $0x2c0] sm:$0xff] }
  0x85   : > { %4123 = vmatpush3.msra.mxu1 %v401_v1  ;;  %4089 = vmatprep.subr.mxu0 %v384_v3  ;;  %v441_v35 = vld [vmem:[%s5669_s9 + $0x250] sm:$0xff]  ;;  %v440_v39 = vld [vmem:[%s5669_s9 + $0x248] sm:$0xff]  ;;  %v487_v42 = vld [vmem:[%s5669_s9 + $0x3c0] sm:$0xff] }
  0x86   : > { %4124 = vmatprep.subr.mxu1 %v416_v4  ;;  %4090 = vmatpush3.msra.mxu0 %v368_v5  ;;  %v473_v36 = vld [vmem:[%s5669_s9 + $0x350] sm:$0xff]  ;;  %v472_v40 = vld [vmem:[%s5669_s9 + $0x348] sm:$0xff]  ;;  %v439_v43 = vld [vmem:[%s5669_s9 + $0x240] sm:$0xff] }
  0x87   : > { %4125 = vmatpush3.msra.mxu1 %v400_v6  ;;  %4091 = vmatprep.subr.mxu0 %v383_v7  ;;  %v471_v44 = vld [vmem:[%s5669_s9 + $0x340] sm:$0xff]  ;;  %v454_v45 = vld [vmem:[%s5669_s9 + $0x2b8] sm:$0xff]  ;;  %v453_v49 = vld [vmem:[%s5669_s9 + $0x2b0] sm:$0xff] }
  0x88   : > { %4126 = vmatprep.subr.mxu1 %v415_v8  ;;  %4092 = vmatpush3.msra.mxu0 %v367_v10  ;;  %v486_v46 = vld [vmem:[%s5669_s9 + $0x3b8] sm:$0xff]  ;;  %v485_v50 = vld [vmem:[%s5669_s9 + $0x3b0] sm:$0xff]  ;;  %v452_v54 = vld [vmem:[%s5669_s9 + $0x2a8] sm:$0xff] }
  0x89   : > { %1703 = vmatprep.mubr.f32.mxu0 %v1341_v9  ;;  %4127 = vmatpush3.msra.mxu1 %v399_v12  ;;  %v438_v47 = vld [vmem:[%s5669_s9 + $0x238] sm:$0xff]  ;;  %v437_v51 = vld [vmem:[%s5669_s9 + $0x230] sm:$0xff]  ;;  %v484_v55 = vld [vmem:[%s5669_s9 + $0x3a8] sm:$0xff] }
  0x8a   : > { %1773 = vmatprep.mubr.f32.mxu1 %v1342_v11  ;;  %1704 = vmatmul.mubr.f32.vlgmr.msra.gmra.mxu0 %v1333_v63  ;;  %v470_v48 = vld [vmem:[%s5669_s9 + $0x338] sm:$0xff]  ;;  %v469_v53 = vld [vmem:[%s5669_s9 + $0x330] sm:$0xff]  ;;  %v436_v56 = vld [vmem:[%s5669_s9 + $0x228] sm:$0xff] }
  0x8b   : > { %1774 = vmatmul.mubr.f32.vlgmr.msra.gmra.mxu1 %v1340_v2  ;;  %4131 = vmatprep.subr.mxu0 %v462_v13  ;;  %v468_v57 = vld [vmem:[%s5669_s9 + $0x328] sm:$0xff]  ;;  %v451_v59 = vld [vmem:[%s5669_s9 + $0x2a0] sm:$0xff]  ;;  %v450_v63 = vld [vmem:[%s5669_s9 + $0x298] sm:$0xff] }
  0x8c   : > { %4166 = vmatprep.subr.mxu1 %v494_v14  ;;  %4132 = vmatpush3.msra.mxu0 %v446_v15  ;;  %v353_v58 = vld [vmem:[%s5687_s22 + $0x8] sm:$0xff]  ;;  %v482_v0 = vld [vmem:[%s5669_s9 + $0x398] sm:$0xff]  ;;  %v449_v5 = vld [vmem:[%s5669_s9 + $0x290] sm:$0xff] }
  0x8d   : > { %4167 = vmatpush3.msra.mxu1 %v478_v16  ;;  %4133 = vmatprep.subr.mxu0 %v461_v17  ;;  %v483_v60 = vld [vmem:[%s5669_s9 + $0x3a0] sm:$0xff]  ;;  %v1350_v1 = vrot.slane %v353_v58, %v5737_v52  ;;  %v1343_v2 = vcombine.high %v353_v58, %v353_v58  ;;  %v434_v3 = vld [vmem:[%s5669_s9 + $0x218] sm:$0xff]  ;;  %v481_v6 = vld [vmem:[%s5669_s9 + $0x390] sm:$0xff] }
  0x8e   : > { %4168 = vmatprep.subr.mxu1 %v493_v18  ;;  %4134 = vmatpush3.msra.mxu0 %v445_v19  ;;  %v435_v61 = vld [vmem:[%s5669_s9 + $0x220] sm:$0xff]  ;;  %v466_v4 = vld [vmem:[%s5669_s9 + $0x318] sm:$0xff]  ;;  %v433_v7 = vld [vmem:[%s5669_s9 + $0x210] sm:$0xff] }
  0x8f   : > { %4169 = vmatpush3.msra.mxu1 %v477_v20  ;;  %4135 = vmatprep.subr.mxu0 %v460_v21  ;;  %v467_v62 = vld [vmem:[%s5669_s9 + $0x320] sm:$0xff]  ;;  %v465_v8 = vld [vmem:[%s5669_s9 + $0x310] sm:$0xff]  ;;  %v448_v9 = vld [vmem:[%s5669_s9 + $0x288] sm:$0xff]  ;;  %v1358_v11 = vcombine.high %v1350_v1, %v1350_v1  ;;  %v1357_v12 = vrot.slane %v1343_v2, %v5737_v52 }
  0x90   : > { %4170 = vmatprep.subr.mxu1 %v492_v22  ;;  %4136 = vmatpush3.msra.mxu0 %v444_v23  ;;  %v480_v10 = vld [vmem:[%s5669_s9 + $0x388] sm:$0xff]  ;;  %v447_v14 = vld [vmem:[%s5669_s9 + $0x280] sm:$0xff]  ;;  %v526_v18 = vld [vmem:[%s5669_s9 + $0x4f8] sm:$0xff] }
  0x91   : > { %4171 = vmatpush3.msra.mxu1 %v476_v24  ;;  %4137 = vmatprep.subr.mxu0 %v459_v25  ;;  %v432_v13 = vld [vmem:[%s5669_s9 + $0x208] sm:$0xff]  ;;  %v431_v16 = vld [vmem:[%s5669_s9 + $0x200] sm:$0xff]  ;;  %v1359_v19 = vcombine.high %v1357_v12, %v1357_v12  ;;  %v510_v21 = vld [vmem:[%s5669_s9 + $0x478] sm:$0xff] }
  0x92   : > { %4172 = vmatprep.subr.mxu1 %v491_v26  ;;  %4138 = vmatpush3.msra.mxu0 %v443_v27  ;;  %v464_v15 = vld [vmem:[%s5669_s9 + $0x308] sm:$0xff]  ;;  %v479_v17 = vld [vmem:[%s5669_s9 + $0x380] sm:$0xff]  ;;  %v525_v22 = vld [vmem:[%s5669_s9 + $0x4f0] sm:$0xff] }
  0x93   : > { %4173 = vmatpush3.msra.mxu1 %v475_v28  ;;  %4139 = vmatprep.subr.mxu0 %v458_v29  ;;  %v463_v20 = vld [vmem:[%s5669_s9 + $0x300] sm:$0xff]  ;;  %v558_v23 = vld [vmem:[%s5669_s9 + $0x5f8] sm:$0xff]  ;;  %v509_v24 = vld [vmem:[%s5669_s9 + $0x470] sm:$0xff] }
  0x94   : > { %4174 = vmatprep.subr.mxu1 %v490_v30  ;;  %4140 = vmatpush3.msra.mxu0 %v442_v31  ;;  %v542_v25 = vld [vmem:[%s5669_s9 + $0x578] sm:$0xff]  ;;  %v524_v26 = vld [vmem:[%s5669_s9 + $0x4e8] sm:$0xff]  ;;  %v557_v27 = vld [vmem:[%s5669_s9 + $0x5f0] sm:$0xff] }
  0x95   : > { %4175 = vmatpush3.msra.mxu1 %v474_v32  ;;  %4141 = vmatprep.subr.mxu0 %v457_v33  ;;  %v508_v28 = vld [vmem:[%s5669_s9 + $0x468] sm:$0xff]  ;;  %v541_v29 = vld [vmem:[%s5669_s9 + $0x570] sm:$0xff]  ;;  %v523_v30 = vld [vmem:[%s5669_s9 + $0x4e0] sm:$0xff] }
  0x96   : > { %4176 = vmatprep.subr.mxu1 %v489_v34  ;;  %4142 = vmatpush3.msra.mxu0 %v441_v35  ;;  %v556_v31 = vld [vmem:[%s5669_s9 + $0x5e8] sm:$0xff]  ;;  %v507_v32 = vld [vmem:[%s5669_s9 + $0x460] sm:$0xff]  ;;  %v522_v34 = vld [vmem:[%s5669_s9 + $0x4d8] sm:$0xff] }
  0x97   : > { %4177 = vmatpush3.msra.mxu1 %v473_v36  ;;  %4143 = vmatprep.subr.mxu0 %v456_v37  ;;  %v540_v33 = vld [vmem:[%s5669_s9 + $0x568] sm:$0xff]  ;;  %v555_v35 = vld [vmem:[%s5669_s9 + $0x5e0] sm:$0xff]  ;;  %v506_v36 = vld [vmem:[%s5669_s9 + $0x458] sm:$0xff] }
  0x98   : > { %4178 = vmatprep.subr.mxu1 %v488_v38  ;;  %4144 = vmatpush3.msra.mxu0 %v440_v39  ;;  %v539_v37 = vld [vmem:[%s5669_s9 + $0x560] sm:$0xff]  ;;  %v521_v38 = vld [vmem:[%s5669_s9 + $0x4d0] sm:$0xff]  ;;  %v554_v39 = vld [vmem:[%s5669_s9 + $0x5d8] sm:$0xff] }
  0x99   : > { %4179 = vmatpush3.msra.mxu1 %v472_v40  ;;  %4145 = vmatprep.subr.mxu0 %v455_v41  ;;  %v505_v40 = vld [vmem:[%s5669_s9 + $0x450] sm:$0xff]  ;;  %v538_v41 = vld [vmem:[%s5669_s9 + $0x558] sm:$0xff]  ;;  %v499_v2 = vld [vmem:[%s5669_s9 + $0x420] sm:$0xff] }
  0x9a   : > { %4180 = vmatprep.subr.mxu1 %v487_v42  ;;  %4146 = vmatpush3.msra.mxu0 %v439_v43  ;;  %v520_v42 = vld [vmem:[%s5669_s9 + $0x4c8] sm:$0xff]  ;;  %v553_v43 = vld [vmem:[%s5669_s9 + $0x5d0] sm:$0xff]  ;;  %v534_v58 = vld [vmem:[%s5669_s9 + $0x538] sm:$0xff] }
  0x9b   : > { %4181 = vmatpush3.msra.mxu1 %v471_v44  ;;  %4147 = vmatprep.subr.mxu0 %v454_v45  ;;  %v504_v44 = vld [vmem:[%s5669_s9 + $0x448] sm:$0xff]  ;;  %v537_v45 = vld [vmem:[%s5669_s9 + $0x550] sm:$0xff] }
  0x9c   : > { %4182 = vmatprep.subr.mxu1 %v486_v46  ;;  %4148 = vmatpush3.msra.mxu0 %v438_v47  ;;  %v519_v46 = vld [vmem:[%s5669_s9 + $0x4c0] sm:$0xff]  ;;  %v552_v47 = vld [vmem:[%s5669_s9 + $0x5c8] sm:$0xff] }
  0x9d   : > { %4183 = vmatpush3.msra.mxu1 %v470_v48  ;;  %4149 = vmatprep.subr.mxu0 %v453_v49  ;;  %v503_v48 = vld [vmem:[%s5669_s9 + $0x440] sm:$0xff]  ;;  %v536_v49 = vld [vmem:[%s5669_s9 + $0x548] sm:$0xff] }
  0x9e   : > { %4184 = vmatprep.subr.mxu1 %v485_v50  ;;  %4150 = vmatpush3.msra.mxu0 %v437_v51  ;;  %v518_v50 = vld [vmem:[%s5669_s9 + $0x4b8] sm:$0xff]  ;;  %v551_v51 = vld [vmem:[%s5669_s9 + $0x5c0] sm:$0xff] }
  0x9f   : > { %4185 = vmatpush3.msra.mxu1 %v469_v53  ;;  %4151 = vmatprep.subr.mxu0 %v452_v54  ;;  %v502_v53 = vld [vmem:[%s5669_s9 + $0x438] sm:$0xff]  ;;  %v535_v54 = vld [vmem:[%s5669_s9 + $0x540] sm:$0xff] }
  0xa0   : > { %4186 = vmatprep.subr.mxu1 %v484_v55  ;;  %4152 = vmatpush3.msra.mxu0 %v436_v56  ;;  %v517_v55 = vld [vmem:[%s5669_s9 + $0x4b0] sm:$0xff]  ;;  %v550_v56 = vld [vmem:[%s5669_s9 + $0x5b8] sm:$0xff] }
  0xa1   : > { %4187 = vmatpush3.msra.mxu1 %v468_v57  ;;  %4153 = vmatprep.subr.mxu0 %v451_v59  ;;  %v501_v57 = vld [vmem:[%s5669_s9 + $0x430] sm:$0xff]  ;;  %v516_v59 = vld [vmem:[%s5669_s9 + $0x4a8] sm:$0xff] }
  0xa2   : > { %4188 = vmatprep.subr.mxu1 %v483_v60  ;;  %4154 = vmatpush3.msra.mxu0 %v435_v61  ;;  %v549_v60 = vld [vmem:[%s5669_s9 + $0x5b0] sm:$0xff]  ;;  %v500_v61 = vld [vmem:[%s5669_s9 + $0x428] sm:$0xff] }
  0xa3   : > { %4189 = vmatpush3.msra.mxu1 %v467_v62  ;;  %4155 = vmatprep.subr.mxu0 %v450_v63  ;;  %v533_v62 = vld [vmem:[%s5669_s9 + $0x530] sm:$0xff]  ;;  %v515_v63 = vld [vmem:[%s5669_s9 + $0x4a0] sm:$0xff] }
  0xa4   : > { %4190 = vmatprep.subr.mxu1 %v482_v0  ;;  %4156 = vmatpush3.msra.mxu0 %v434_v3  ;;  %v548_v0 = vld [vmem:[%s5669_s9 + $0x5a8] sm:$0xff] }
  0xa5   : > { %4191 = vmatpush3.msra.mxu1 %v466_v4  ;;  %4157 = vmatprep.subr.mxu0 %v449_v5  ;;  %v532_v3 = vld [vmem:[%s5669_s9 + $0x528] sm:$0xff]  ;;  %v514_v4 = vld [vmem:[%s5669_s9 + $0x498] sm:$0xff]  ;;  %v547_v5 = vld [vmem:[%s5669_s9 + $0x5a0] sm:$0xff] }
  0xa6   : > { %4192 = vmatprep.subr.mxu1 %v481_v6  ;;  %4158 = vmatpush3.msra.mxu0 %v433_v7  ;;  %v498_v6 = vld [vmem:[%s5669_s9 + $0x418] sm:$0xff]  ;;  %v531_v7 = vld [vmem:[%s5669_s9 + $0x520] sm:$0xff] }
  0xa7   : > { %4193 = vmatpush3.msra.mxu1 %v465_v8  ;;  %4159 = vmatprep.subr.mxu0 %v448_v9  ;;  %v513_v9 = vld [vmem:[%s5669_s9 + $0x490] sm:$0xff] }
  0xa8   : > { %4194 = vmatprep.subr.mxu1 %v480_v10  ;;  %4160 = vmatpush3.msra.mxu0 %v432_v13  ;;  %v546_v10 = vld [vmem:[%s5669_s9 + $0x598] sm:$0xff] }
  0xa9   : > { %1843 = vmatprep.mubr.f32.mxu0 %v1358_v11  ;;  %4161 = vmatprep.subr.mxu0 %v447_v14  ;;  %v530_v13 = vld [vmem:[%s5669_s9 + $0x518] sm:$0xff]  ;;  %v512_v14 = vld [vmem:[%s5669_s9 + $0x488] sm:$0xff] }
  0xaa   : > { %4195 = vmatpush3.msra.mxu1 %v464_v15  ;;  %4162 = vmatpush3.msra.mxu0 %v431_v16  ;;  %v545_v15 = vld [vmem:[%s5669_s9 + $0x590] sm:$0xff]  ;;  %v496_v16 = vld [vmem:[%s5669_s9 + $0x408] sm:$0xff] }
  0xab   : > { %4196 = vmatprep.subr.mxu1 %v479_v17  ;;  %1844 = vmatmul.mubr.f32.vlgmr.msra.gmra.mxu0 %v1350_v1  ;;  %v354_v1 = vld [vmem:[%s5687_s22 + $0x10] sm:$0xff] }
  0xac   : > { %4201 = vmatprep.subr.mxu0 %v526_v18  ;;  %4197 = vmatpush3.msra.mxu1 %v463_v20  ;;  %v1360_v8 = vcombine.high %v354_v1, %v354_v1  ;;  %v1367_v11 = vrot.slane %v354_v1, %v5737_v52  ;;  %v529_v17 = vld [vmem:[%s5669_s9 + $0x510] sm:$0xff]  ;;  %v544_v20 = vld [vmem:[%s5669_s9 + $0x588] sm:$0xff]  ;;  %v598_v1 = vld [vmem:[%s5669_s9 + $0x738] sm:$0xff] }
  0xad   : > { %1913 = vmatprep.mubr.f32.mxu1 %v1359_v19  ;;  %4202 = vmatpush3.msra.mxu0 %v510_v21  ;;  %v511_v19 = vld [vmem:[%s5669_s9 + $0x480] sm:$0xff] }
  0xae   : > { %1914 = vmatmul.mubr.f32.vlgmr.msra.gmra.mxu1 %v1357_v12  ;;  %4203 = vmatprep.subr.mxu0 %v525_v22  ;;  %v497_v12 = vld [vmem:[%s5669_s9 + $0x410] sm:$0xff]  ;;  %v1374_v18 = vrot.slane %v1360_v8, %v5737_v52  ;;  %v1375_v21 = vcombine.high %v1367_v11, %v1367_v11  ;;  %v495_v22 = vld [vmem:[%s5669_s9 + $0x400] sm:$0xff] }
  0xaf   : > { %4236 = vmatprep.subr.mxu1 %v558_v23  ;;  %4204 = vmatpush3.msra.mxu0 %v509_v24  ;;  %v528_v23 = vld [vmem:[%s5669_s9 + $0x508] sm:$0xff]  ;;  %v543_v24 = vld [vmem:[%s5669_s9 + $0x580] sm:$0xff]  ;;  %v355_v8 = vld [vmem:[%s5687_s22 + $0x18] sm:$0xff] }
  0xb0   : > { %4237 = vmatpush3.msra.mxu1 %v542_v25  ;;  %4205 = vmatprep.subr.mxu0 %v524_v26  ;;  %v590_v25 = vld [vmem:[%s5669_s9 + $0x6f8] sm:$0xff]  ;;  %v1376_v26 = vcombine.high %v1374_v18, %v1374_v18 }
  0xb1   : > { %4238 = vmatprep.subr.mxu1 %v557_v27  ;;  %4206 = vmatpush3.msra.mxu0 %v508_v28  ;;  %v527_v27 = vld [vmem:[%s5669_s9 + $0x500] sm:$0xff]  ;;  %v574_v28 = vld [vmem:[%s5669_s9 + $0x678] sm:$0xff] }
  0xb2   : > { %4239 = vmatpush3.msra.mxu1 %v541_v29  ;;  %4207 = vmatprep.subr.mxu0 %v523_v30  ;;  %v589_v29 = vld [vmem:[%s5669_s9 + $0x6f0] sm:$0xff]  ;;  %v622_v30 = vld [vmem:[%s5669_s9 + $0x7f8] sm:$0xff] }
  0xb3   : > { %4240 = vmatprep.subr.mxu1 %v556_v31  ;;  %4208 = vmatpush3.msra.mxu0 %v507_v32  ;;  %v573_v31 = vld [vmem:[%s5669_s9 + $0x670] sm:$0xff]  ;;  %v606_v32 = vld [vmem:[%s5669_s9 + $0x778] sm:$0xff] }
  0xb4   : > { %4241 = vmatpush3.msra.mxu1 %v540_v33  ;;  %4209 = vmatprep.subr.mxu0 %v522_v34  ;;  %v588_v33 = vld [vmem:[%s5669_s9 + $0x6e8] sm:$0xff]  ;;  %v621_v34 = vld [vmem:[%s5669_s9 + $0x7f0] sm:$0xff] }
  0xb5   : > { %4242 = vmatprep.subr.mxu1 %v555_v35  ;;  %4210 = vmatpush3.msra.mxu0 %v506_v36  ;;  %v572_v35 = vld [vmem:[%s5669_s9 + $0x668] sm:$0xff]  ;;  %v605_v36 = vld [vmem:[%s5669_s9 + $0x770] sm:$0xff] }
  0xb6   : > { %4243 = vmatpush3.msra.mxu1 %v539_v37  ;;  %4211 = vmatprep.subr.mxu0 %v521_v38  ;;  %v587_v37 = vld [vmem:[%s5669_s9 + $0x6e0] sm:$0xff]  ;;  %v620_v38 = vld [vmem:[%s5669_s9 + $0x7e8] sm:$0xff] }
  0xb7   : > { %4244 = vmatprep.subr.mxu1 %v554_v39  ;;  %4212 = vmatpush3.msra.mxu0 %v505_v40  ;;  %v571_v39 = vld [vmem:[%s5669_s9 + $0x660] sm:$0xff]  ;;  %v604_v40 = vld [vmem:[%s5669_s9 + $0x768] sm:$0xff] }
  0xb8   : > { %4245 = vmatpush3.msra.mxu1 %v538_v41  ;;  %4213 = vmatprep.subr.mxu0 %v520_v42  ;;  %v586_v41 = vld [vmem:[%s5669_s9 + $0x6d8] sm:$0xff]  ;;  %v619_v42 = vld [vmem:[%s5669_s9 + $0x7e0] sm:$0xff] }
  0xb9   : > { %4246 = vmatprep.subr.mxu1 %v553_v43  ;;  %4214 = vmatpush3.msra.mxu0 %v504_v44  ;;  %v570_v43 = vld [vmem:[%s5669_s9 + $0x658] sm:$0xff]  ;;  %v603_v44 = vld [vmem:[%s5669_s9 + $0x760] sm:$0xff] }
  0xba   : > { %4247 = vmatpush3.msra.mxu1 %v537_v45  ;;  %4215 = vmatprep.subr.mxu0 %v519_v46  ;;  %v585_v45 = vld [vmem:[%s5669_s9 + $0x6d0] sm:$0xff]  ;;  %v618_v46 = vld [vmem:[%s5669_s9 + $0x7d8] sm:$0xff] }
  0xbb   : > { %4248 = vmatprep.subr.mxu1 %v552_v47  ;;  %4216 = vmatpush3.msra.mxu0 %v503_v48  ;;  %v569_v47 = vld [vmem:[%s5669_s9 + $0x650] sm:$0xff]  ;;  %v602_v48 = vld [vmem:[%s5669_s9 + $0x758] sm:$0xff] }
  0xbc   : > { %4249 = vmatpush3.msra.mxu1 %v536_v49  ;;  %4217 = vmatprep.subr.mxu0 %v518_v50  ;;  %v584_v49 = vld [vmem:[%s5669_s9 + $0x6c8] sm:$0xff]  ;;  %v617_v50 = vld [vmem:[%s5669_s9 + $0x7d0] sm:$0xff] }
  0xbd   : > { %4250 = vmatprep.subr.mxu1 %v551_v51  ;;  %4218 = vmatpush3.msra.mxu0 %v502_v53  ;;  %v568_v51 = vld [vmem:[%s5669_s9 + $0x648] sm:$0xff]  ;;  %v601_v53 = vld [vmem:[%s5669_s9 + $0x750] sm:$0xff] }
  0xbe   : > { %4251 = vmatpush3.msra.mxu1 %v535_v54  ;;  %4219 = vmatprep.subr.mxu0 %v517_v55  ;;  %v583_v54 = vld [vmem:[%s5669_s9 + $0x6c0] sm:$0xff]  ;;  %v616_v55 = vld [vmem:[%s5669_s9 + $0x7c8] sm:$0xff] }
  0xbf   : > { %4252 = vmatprep.subr.mxu1 %v550_v56  ;;  %4220 = vmatpush3.msra.mxu0 %v501_v57  ;;  %v567_v56 = vld [vmem:[%s5669_s9 + $0x640] sm:$0xff]  ;;  %v600_v57 = vld [vmem:[%s5669_s9 + $0x748] sm:$0xff] }
  0xc0   : > { %4253 = vmatpush3.msra.mxu1 %v534_v58  ;;  %4221 = vmatprep.subr.mxu0 %v516_v59  ;;  %v582_v58 = vld [vmem:[%s5669_s9 + $0x6b8] sm:$0xff]  ;;  %v615_v59 = vld [vmem:[%s5669_s9 + $0x7c0] sm:$0xff] }
  0xc1   : > { %4254 = vmatprep.subr.mxu1 %v549_v60  ;;  %4222 = vmatpush3.msra.mxu0 %v500_v61  ;;  %v566_v60 = vld [vmem:[%s5669_s9 + $0x638] sm:$0xff]  ;;  %v599_v61 = vld [vmem:[%s5669_s9 + $0x740] sm:$0xff] }
  0xc2   : > { %4255 = vmatpush3.msra.mxu1 %v533_v62  ;;  %4223 = vmatprep.subr.mxu0 %v515_v63  ;;  %v581_v62 = vld [vmem:[%s5669_s9 + $0x6b0] sm:$0xff]  ;;  %v614_v63 = vld [vmem:[%s5669_s9 + $0x7b8] sm:$0xff] }
  0xc3   : > { %4256 = vmatprep.subr.mxu1 %v548_v0  ;;  %4224 = vmatpush3.msra.mxu0 %v499_v2  ;;  %v565_v0 = vld [vmem:[%s5669_s9 + $0x630] sm:$0xff]  ;;  %v580_v2 = vld [vmem:[%s5669_s9 + $0x6a8] sm:$0xff] }
  0xc4   : > { %4257 = vmatpush3.msra.mxu1 %v532_v3  ;;  %4225 = vmatprep.subr.mxu0 %v514_v4  ;;  %v613_v3 = vld [vmem:[%s5669_s9 + $0x7b0] sm:$0xff]  ;;  %v564_v4 = vld [vmem:[%s5669_s9 + $0x628] sm:$0xff] }
  0xc5   : > { %4258 = vmatprep.subr.mxu1 %v547_v5  ;;  %4226 = vmatpush3.msra.mxu0 %v498_v6  ;;  %v597_v5 = vld [vmem:[%s5669_s9 + $0x730] sm:$0xff]  ;;  %v579_v6 = vld [vmem:[%s5669_s9 + $0x6a0] sm:$0xff] }
  0xc6   : > { %4259 = vmatpush3.msra.mxu1 %v531_v7  ;;  %4227 = vmatprep.subr.mxu0 %v513_v9  ;;  %v612_v7 = vld [vmem:[%s5669_s9 + $0x7a8] sm:$0xff]  ;;  %v563_v9 = vld [vmem:[%s5669_s9 + $0x620] sm:$0xff] }
  0xc7   : > { %4260 = vmatprep.subr.mxu1 %v546_v10  ;;  %4228 = vmatpush3.msra.mxu0 %v497_v12  ;;  %v596_v10 = vld [vmem:[%s5669_s9 + $0x728] sm:$0xff]  ;;  %v611_v12 = vld [vmem:[%s5669_s9 + $0x7a0] sm:$0xff] }
  0xc8   : > { %4261 = vmatpush3.msra.mxu1 %v530_v13  ;;  %4229 = vmatprep.subr.mxu0 %v512_v14  ;;  %v562_v13 = vld [vmem:[%s5669_s9 + $0x618] sm:$0xff]  ;;  %v595_v14 = vld [vmem:[%s5669_s9 + $0x720] sm:$0xff] }
  0xc9   : > { %4262 = vmatprep.subr.mxu1 %v545_v15  ;;  %4230 = vmatpush3.msra.mxu0 %v496_v16  ;;  %v1377_v15 = vcombine.high %v355_v8, %v355_v8  ;;  %v577_v16 = vld [vmem:[%s5669_s9 + $0x690] sm:$0xff] }
  0xca   : > { %4263 = vmatpush3.msra.mxu1 %v529_v17  ;;  %4231 = vmatprep.subr.mxu0 %v511_v19  ;;  %v610_v17 = vld [vmem:[%s5669_s9 + $0x798] sm:$0xff]  ;;  %v561_v19 = vld [vmem:[%s5669_s9 + $0x610] sm:$0xff] }
  0xcb   : > { %4264 = vmatprep.subr.mxu1 %v544_v20  ;;  %4232 = vmatpush3.msra.mxu0 %v495_v22  ;;  %v594_v20 = vld [vmem:[%s5669_s9 + $0x718] sm:$0xff]  ;;  %v609_v22 = vld [vmem:[%s5669_s9 + $0x790] sm:$0xff] }
  0xcc   : > { %1983 = vmatprep.mubr.f32.mxu0 %v1375_v21  ;;  %4265 = vmatpush3.msra.mxu1 %v528_v23  ;;  %v576_v21 = vld [vmem:[%s5669_s9 + $0x688] sm:$0xff] }
  0xcd   : > { %1984 = vmatmul.mubr.f32.vlgmr.msra.gmra.mxu0 %v1367_v11  ;;  %4266 = vmatprep.subr.mxu1 %v543_v24  ;;  %v578_v11 = vld [vmem:[%s5669_s9 + $0x698] sm:$0xff]  ;;  %v560_v23 = vld [vmem:[%s5669_s9 + $0x608] sm:$0xff]  ;;  %v593_v24 = vld [vmem:[%s5669_s9 + $0x710] sm:$0xff] }
  0xce   : > { %4271 = vmatprep.subr.mxu0 %v590_v25  ;;  %4267 = vmatpush3.msra.mxu1 %v527_v27  ;;  %v1391_v25 = vrot.slane %v1377_v15, %v5737_v52  ;;  %v608_v27 = vld [vmem:[%s5669_s9 + $0x788] sm:$0xff]  ;;  %v356_v15 = vld [vmem:[%s5687_s22 + $0x20] sm:$0xff] }
  0xcf   : > { %2053 = vmatprep.mubr.f32.mxu1 %v1376_v26  ;;  %4272 = vmatpush3.msra.mxu0 %v574_v28  ;;  %v575_v26 = vld [vmem:[%s5669_s9 + $0x680] sm:$0xff] }
  0xd0   : > { %2054 = vmatmul.mubr.f32.vlgmr.msra.gmra.mxu1 %v1374_v18  ;;  %4273 = vmatprep.subr.mxu0 %v589_v29  ;;  %v1384_v18 = vrot.slane %v355_v8, %v5737_v52  ;;  %v559_v29 = vld [vmem:[%s5669_s9 + $0x600] sm:$0xff]  ;;  %v662_v8 = vld [vmem:[%s5669_s9 + $0x938] sm:$0xff] }
  0xd1   : > { %4306 = vmatprep.subr.mxu1 %v622_v30  ;;  %4274 = vmatpush3.msra.mxu0 %v573_v31  ;;  %v592_v30 = vld [vmem:[%s5669_s9 + $0x708] sm:$0xff]  ;;  %v607_v31 = vld [vmem:[%s5669_s9 + $0x780] sm:$0xff] }
  0xd2   : > { %4307 = vmatpush3.msra.mxu1 %v606_v32  ;;  %4275 = vmatprep.subr.mxu0 %v588_v33  ;;  %v1392_v28 = vcombine.high %v1384_v18, %v1384_v18  ;;  %v654_v32 = vld [vmem:[%s5669_s9 + $0x8f8] sm:$0xff]  ;;  %v1393_v33 = vcombine.high %v1391_v25, %v1391_v25 }
  0xd3   : > { %4308 = vmatprep.subr.mxu1 %v621_v34  ;;  %4276 = vmatpush3.msra.mxu0 %v572_v35  ;;  %v591_v34 = vld [vmem:[%s5669_s9 + $0x700] sm:$0xff]  ;;  %v638_v35 = vld [vmem:[%s5669_s9 + $0x878] sm:$0xff] }
  0xd4   : > { %4309 = vmatpush3.msra.mxu1 %v605_v36  ;;  %4277 = vmatprep.subr.mxu0 %v587_v37  ;;  %v653_v36 = vld [vmem:[%s5669_s9 + $0x8f0] sm:$0xff]  ;;  %v686_v37 = vld [vmem:[%s5669_s9 + $0x9f8] sm:$0xff] }
  0xd5   : > { %4310 = vmatprep.subr.mxu1 %v620_v38  ;;  %4278 = vmatpush3.msra.mxu0 %v571_v39  ;;  %v637_v38 = vld [vmem:[%s5669_s9 + $0x870] sm:$0xff]  ;;  %v670_v39 = vld [vmem:[%s5669_s9 + $0x978] sm:$0xff] }
  0xd6   : > { %4311 = vmatpush3.msra.mxu1 %v604_v40  ;;  %4279 = vmatprep.subr.mxu0 %v586_v41  ;;  %v652_v40 = vld [vmem:[%s5669_s9 + $0x8e8] sm:$0xff]  ;;  %v685_v41 = vld [vmem:[%s5669_s9 + $0x9f0] sm:$0xff] }
  0xd7   : > { %4312 = vmatprep.subr.mxu1 %v619_v42  ;;  %4280 = vmatpush3.msra.mxu0 %v570_v43  ;;  %v636_v42 = vld [vmem:[%s5669_s9 + $0x868] sm:$0xff]  ;;  %v669_v43 = vld [vmem:[%s5669_s9 + $0x970] sm:$0xff] }
  0xd8   : > { %4313 = vmatpush3.msra.mxu1 %v603_v44  ;;  %4281 = vmatprep.subr.mxu0 %v585_v45  ;;  %v651_v44 = vld [vmem:[%s5669_s9 + $0x8e0] sm:$0xff]  ;;  %v684_v45 = vld [vmem:[%s5669_s9 + $0x9e8] sm:$0xff] }
  0xd9   : > { %4314 = vmatprep.subr.mxu1 %v618_v46  ;;  %4282 = vmatpush3.msra.mxu0 %v569_v47  ;;  %v635_v46 = vld [vmem:[%s5669_s9 + $0x860] sm:$0xff]  ;;  %v668_v47 = vld [vmem:[%s5669_s9 + $0x968] sm:$0xff] }
  0xda   : > { %4315 = vmatpush3.msra.mxu1 %v602_v48  ;;  %4283 = vmatprep.subr.mxu0 %v584_v49  ;;  %v650_v48 = vld [vmem:[%s5669_s9 + $0x8d8] sm:$0xff]  ;;  %v683_v49 = vld [vmem:[%s5669_s9 + $0x9e0] sm:$0xff] }
  0xdb   : > { %4316 = vmatprep.subr.mxu1 %v617_v50  ;;  %4284 = vmatpush3.msra.mxu0 %v568_v51  ;;  %v634_v50 = vld [vmem:[%s5669_s9 + $0x858] sm:$0xff]  ;;  %v667_v51 = vld [vmem:[%s5669_s9 + $0x960] sm:$0xff] }
  0xdc   : > { %4317 = vmatpush3.msra.mxu1 %v601_v53  ;;  %4285 = vmatprep.subr.mxu0 %v583_v54  ;;  %v649_v53 = vld [vmem:[%s5669_s9 + $0x8d0] sm:$0xff]  ;;  %v682_v54 = vld [vmem:[%s5669_s9 + $0x9d8] sm:$0xff] }
  0xdd   : > { %4318 = vmatprep.subr.mxu1 %v616_v55  ;;  %4286 = vmatpush3.msra.mxu0 %v567_v56  ;;  %v633_v55 = vld [vmem:[%s5669_s9 + $0x850] sm:$0xff]  ;;  %v666_v56 = vld [vmem:[%s5669_s9 + $0x958] sm:$0xff] }
  0xde   : > { %4319 = vmatpush3.msra.mxu1 %v600_v57  ;;  %4287 = vmatprep.subr.mxu0 %v582_v58  ;;  %v648_v57 = vld [vmem:[%s5669_s9 + $0x8c8] sm:$0xff]  ;;  %v681_v58 = vld [vmem:[%s5669_s9 + $0x9d0] sm:$0xff] }
  0xdf   : > { %4320 = vmatprep.subr.mxu1 %v615_v59  ;;  %4288 = vmatpush3.msra.mxu0 %v566_v60  ;;  %v632_v59 = vld [vmem:[%s5669_s9 + $0x848] sm:$0xff]  ;;  %v665_v60 = vld [vmem:[%s5669_s9 + $0x950] sm:$0xff] }
  0xe0   : > { %4321 = vmatpush3.msra.mxu1 %v599_v61  ;;  %4289 = vmatprep.subr.mxu0 %v581_v62  ;;  %v647_v61 = vld [vmem:[%s5669_s9 + $0x8c0] sm:$0xff]  ;;  %v680_v62 = vld [vmem:[%s5669_s9 + $0x9c8] sm:$0xff] }
  0xe1   : > { %4322 = vmatprep.subr.mxu1 %v614_v63  ;;  %4290 = vmatpush3.msra.mxu0 %v565_v0  ;;  %v631_v63 = vld [vmem:[%s5669_s9 + $0x840] sm:$0xff]  ;;  %v664_v0 = vld [vmem:[%s5669_s9 + $0x948] sm:$0xff] }
  0xe2   : > { %4323 = vmatpush3.msra.mxu1 %v598_v1  ;;  %4291 = vmatprep.subr.mxu0 %v580_v2  ;;  %v646_v1 = vld [vmem:[%s5669_s9 + $0x8b8] sm:$0xff]  ;;  %v679_v2 = vld [vmem:[%s5669_s9 + $0x9c0] sm:$0xff] }
  0xe3   : > { %4324 = vmatprep.subr.mxu1 %v613_v3  ;;  %4292 = vmatpush3.msra.mxu0 %v564_v4  ;;  %v630_v3 = vld [vmem:[%s5669_s9 + $0x838] sm:$0xff]  ;;  %v663_v4 = vld [vmem:[%s5669_s9 + $0x940] sm:$0xff] }
  0xe4   : > { %4325 = vmatpush3.msra.mxu1 %v597_v5  ;;  %4293 = vmatprep.subr.mxu0 %v579_v6  ;;  %v645_v5 = vld [vmem:[%s5669_s9 + $0x8b0] sm:$0xff]  ;;  %v678_v6 = vld [vmem:[%s5669_s9 + $0x9b8] sm:$0xff] }
  0xe5   : > { %4326 = vmatprep.subr.mxu1 %v612_v7  ;;  %4294 = vmatpush3.msra.mxu0 %v563_v9  ;;  %v629_v7 = vld [vmem:[%s5669_s9 + $0x830] sm:$0xff]  ;;  %v644_v9 = vld [vmem:[%s5669_s9 + $0x8a8] sm:$0xff] }
  0xe6   : > { %4327 = vmatpush3.msra.mxu1 %v596_v10  ;;  %4295 = vmatprep.subr.mxu0 %v578_v11  ;;  %v677_v10 = vld [vmem:[%s5669_s9 + $0x9b0] sm:$0xff]  ;;  %v628_v11 = vld [vmem:[%s5669_s9 + $0x828] sm:$0xff] }
  0xe7   : > { %4328 = vmatprep.subr.mxu1 %v611_v12  ;;  %4296 = vmatpush3.msra.mxu0 %v562_v13  ;;  %v661_v12 = vld [vmem:[%s5669_s9 + $0x930] sm:$0xff]  ;;  %v643_v13 = vld [vmem:[%s5669_s9 + $0x8a0] sm:$0xff] }
  0xe8   : > { %4329 = vmatpush3.msra.mxu1 %v595_v14  ;;  %4297 = vmatprep.subr.mxu0 %v577_v16  ;;  %v676_v14 = vld [vmem:[%s5669_s9 + $0x9a8] sm:$0xff]  ;;  %v627_v16 = vld [vmem:[%s5669_s9 + $0x820] sm:$0xff] }
  0xe9   : > { %4330 = vmatprep.subr.mxu1 %v610_v17  ;;  %4298 = vmatpush3.msra.mxu0 %v561_v19  ;;  %v660_v17 = vld [vmem:[%s5669_s9 + $0x928] sm:$0xff]  ;;  %v675_v19 = vld [vmem:[%s5669_s9 + $0x9a0] sm:$0xff] }
  0xea   : > { %4331 = vmatpush3.msra.mxu1 %v594_v20  ;;  %4299 = vmatprep.subr.mxu0 %v576_v21  ;;  %v626_v20 = vld [vmem:[%s5669_s9 + $0x818] sm:$0xff]  ;;  %v659_v21 = vld [vmem:[%s5669_s9 + $0x920] sm:$0xff] }
  0xeb   : > { %4332 = vmatprep.subr.mxu1 %v609_v22  ;;  %4300 = vmatpush3.msra.mxu0 %v560_v23  ;;  %v1394_v22 = vcombine.high %v356_v15, %v356_v15  ;;  %v641_v23 = vld [vmem:[%s5669_s9 + $0x890] sm:$0xff] }
  0xec   : > { %4333 = vmatpush3.msra.mxu1 %v593_v24  ;;  %4301 = vmatprep.subr.mxu0 %v575_v26  ;;  %v674_v24 = vld [vmem:[%s5669_s9 + $0x998] sm:$0xff]  ;;  %v625_v26 = vld [vmem:[%s5669_s9 + $0x810] sm:$0xff] }
  0xed   : > { %4334 = vmatprep.subr.mxu1 %v608_v27  ;;  %4302 = vmatpush3.msra.mxu0 %v559_v29  ;;  %v658_v27 = vld [vmem:[%s5669_s9 + $0x918] sm:$0xff]  ;;  %v673_v29 = vld [vmem:[%s5669_s9 + $0x990] sm:$0xff] }
  0xee   : > { %2123 = vmatprep.mubr.f32.mxu0 %v1392_v28  ;;  %4335 = vmatpush3.msra.mxu1 %v592_v30  ;;  %v640_v28 = vld [vmem:[%s5669_s9 + $0x888] sm:$0xff] }
  0xef   : > { %2124 = vmatmul.mubr.f32.vlgmr.msra.gmra.mxu0 %v1384_v18  ;;  %4336 = vmatprep.subr.mxu1 %v607_v31  ;;  %v642_v18 = vld [vmem:[%s5669_s9 + $0x898] sm:$0xff]  ;;  %v624_v30 = vld [vmem:[%s5669_s9 + $0x808] sm:$0xff]  ;;  %v657_v31 = vld [vmem:[%s5669_s9 + $0x910] sm:$0xff] }
  0xf0   : > { %4341 = vmatprep.subr.mxu0 %v654_v32  ;;  %4337 = vmatpush3.msra.mxu1 %v591_v34  ;;  %v1408_v32 = vrot.slane %v1394_v22, %v5737_v52  ;;  %v672_v34 = vld [vmem:[%s5669_s9 + $0x988] sm:$0xff] }
  0xf1   : > { %2193 = vmatprep.mubr.f32.mxu1 %v1393_v33  ;;  %4342 = vmatpush3.msra.mxu0 %v638_v35  ;;  %v639_v33 = vld [vmem:[%s5669_s9 + $0x880] sm:$0xff] }
  0xf2   : > { %2194 = vmatmul.mubr.f32.vlgmr.msra.gmra.mxu1 %v1391_v25  ;;  %4343 = vmatprep.subr.mxu0 %v653_v36  ;;  %v1401_v25 = vrot.slane %v356_v15, %v5737_v52  ;;  %v623_v36 = vld [vmem:[%s5669_s9 + $0x800] sm:$0xff]  ;;  %v726_v15 = vld [vmem:[%s5669_s9 + $0xb38] sm:$0xff] }
  0xf3   : > { %4376 = vmatprep.subr.mxu1 %v686_v37  ;;  %4344 = vmatpush3.msra.mxu0 %v637_v38  ;;  %v656_v37 = vld [vmem:[%s5669_s9 + $0x908] sm:$0xff]  ;;  %v671_v38 = vld [vmem:[%s5669_s9 + $0x980] sm:$0xff] }
  0xf4   : > { %4377 = vmatpush3.msra.mxu1 %v670_v39  ;;  %4345 = vmatprep.subr.mxu0 %v652_v40  ;;  %v1409_v35 = vcombine.high %v1401_v25, %v1401_v25  ;;  %v718_v39 = vld [vmem:[%s5669_s9 + $0xaf8] sm:$0xff]  ;;  %v1410_v40 = vcombine.high %v1408_v32, %v1408_v32  ;;  %v357_v22 = vld [vmem:[%s5687_s22 + $0x28] sm:$0xff] }
  0xf5   : > { %4378 = vmatprep.subr.mxu1 %v685_v41  ;;  %4346 = vmatpush3.msra.mxu0 %v636_v42  ;;  %v655_v41 = vld [vmem:[%s5669_s9 + $0x900] sm:$0xff]  ;;  %v702_v42 = vld [vmem:[%s5669_s9 + $0xa78] sm:$0xff] }
  0xf6   : > { %4379 = vmatpush3.msra.mxu1 %v669_v43  ;;  %4347 = vmatprep.subr.mxu0 %v651_v44  ;;  %v717_v43 = vld [vmem:[%s5669_s9 + $0xaf0] sm:$0xff]  ;;  %v750_v44 = vld [vmem:[%s5669_s9 + $0xbf8] sm:$0xff] }
  0xf7   : > { %4380 = vmatprep.subr.mxu1 %v684_v45  ;;  %4348 = vmatpush3.msra.mxu0 %v635_v46  ;;  %v701_v45 = vld [vmem:[%s5669_s9 + $0xa70] sm:$0xff]  ;;  %v734_v46 = vld [vmem:[%s5669_s9 + $0xb78] sm:$0xff] }
  0xf8   : > { %4381 = vmatpush3.msra.mxu1 %v668_v47  ;;  %4349 = vmatprep.subr.mxu0 %v650_v48  ;;  %v716_v47 = vld [vmem:[%s5669_s9 + $0xae8] sm:$0xff]  ;;  %v749_v48 = vld [vmem:[%s5669_s9 + $0xbf0] sm:$0xff] }
  0xf9   : > { %4382 = vmatprep.subr.mxu1 %v683_v49  ;;  %4350 = vmatpush3.msra.mxu0 %v634_v50  ;;  %v700_v49 = vld [vmem:[%s5669_s9 + $0xa68] sm:$0xff]  ;;  %v733_v50 = vld [vmem:[%s5669_s9 + $0xb70] sm:$0xff] }
  0xfa   : > { %4383 = vmatpush3.msra.mxu1 %v667_v51  ;;  %4351 = vmatprep.subr.mxu0 %v649_v53  ;;  %v715_v51 = vld [vmem:[%s5669_s9 + $0xae0] sm:$0xff]  ;;  %v748_v53 = vld [vmem:[%s5669_s9 + $0xbe8] sm:$0xff] }
  0xfb   : > { %4384 = vmatprep.subr.mxu1 %v682_v54  ;;  %4352 = vmatpush3.msra.mxu0 %v633_v55  ;;  %v699_v54 = vld [vmem:[%s5669_s9 + $0xa60] sm:$0xff]  ;;  %v732_v55 = vld [vmem:[%s5669_s9 + $0xb68] sm:$0xff] }
  0xfc   : > { %4385 = vmatpush3.msra.mxu1 %v666_v56  ;;  %4353 = vmatprep.subr.mxu0 %v648_v57  ;;  %v714_v56 = vld [vmem:[%s5669_s9 + $0xad8] sm:$0xff]  ;;  %v747_v57 = vld [vmem:[%s5669_s9 + $0xbe0] sm:$0xff] }
  0xfd   : > { %4386 = vmatprep.subr.mxu1 %v681_v58  ;;  %4354 = vmatpush3.msra.mxu0 %v632_v59  ;;  %v698_v58 = vld [vmem:[%s5669_s9 + $0xa58] sm:$0xff]  ;;  %v731_v59 = vld [vmem:[%s5669_s9 + $0xb60] sm:$0xff] }
  0xfe   : > { %4387 = vmatpush3.msra.mxu1 %v665_v60  ;;  %4355 = vmatprep.subr.mxu0 %v647_v61  ;;  %v713_v60 = vld [vmem:[%s5669_s9 + $0xad0] sm:$0xff]  ;;  %v746_v61 = vld [vmem:[%s5669_s9 + $0xbd8] sm:$0xff] }
  0xff   : > { %4388 = vmatprep.subr.mxu1 %v680_v62  ;;  %4356 = vmatpush3.msra.mxu0 %v631_v63  ;;  %v697_v62 = vld [vmem:[%s5669_s9 + $0xa50] sm:$0xff]  ;;  %v730_v63 = vld [vmem:[%s5669_s9 + $0xb58] sm:$0xff] }
 0x100   : > { %4389 = vmatpush3.msra.mxu1 %v664_v0  ;;  %4357 = vmatprep.subr.mxu0 %v646_v1  ;;  %v712_v0 = vld [vmem:[%s5669_s9 + $0xac8] sm:$0xff]  ;;  %v745_v1 = vld [vmem:[%s5669_s9 + $0xbd0] sm:$0xff] }
 0x101   : > { %4390 = vmatprep.subr.mxu1 %v679_v2  ;;  %4358 = vmatpush3.msra.mxu0 %v630_v3  ;;  %v696_v2 = vld [vmem:[%s5669_s9 + $0xa48] sm:$0xff]  ;;  %v729_v3 = vld [vmem:[%s5669_s9 + $0xb50] sm:$0xff] }
 0x102   : > { %4391 = vmatpush3.msra.mxu1 %v663_v4  ;;  %4359 = vmatprep.subr.mxu0 %v645_v5  ;;  %v711_v4 = vld [vmem:[%s5669_s9 + $0xac0] sm:$0xff]  ;;  %v744_v5 = vld [vmem:[%s5669_s9 + $0xbc8] sm:$0xff] }
 0x103   : > { %4392 = vmatprep.subr.mxu1 %v678_v6  ;;  %4360 = vmatpush3.msra.mxu0 %v629_v7  ;;  %v695_v6 = vld [vmem:[%s5669_s9 + $0xa40] sm:$0xff]  ;;  %v728_v7 = vld [vmem:[%s5669_s9 + $0xb48] sm:$0xff] }
 0x104   : > { %4393 = vmatpush3.msra.mxu1 %v662_v8  ;;  %4361 = vmatprep.subr.mxu0 %v644_v9  ;;  %v710_v8 = vld [vmem:[%s5669_s9 + $0xab8] sm:$0xff]  ;;  %v743_v9 = vld [vmem:[%s5669_s9 + $0xbc0] sm:$0xff] }
 0x105   : > { %4394 = vmatprep.subr.mxu1 %v677_v10  ;;  %4362 = vmatpush3.msra.mxu0 %v628_v11  ;;  %v694_v10 = vld [vmem:[%s5669_s9 + $0xa38] sm:$0xff]  ;;  %v727_v11 = vld [vmem:[%s5669_s9 + $0xb40] sm:$0xff] }
 0x106   : > { %4395 = vmatpush3.msra.mxu1 %v661_v12  ;;  %4363 = vmatprep.subr.mxu0 %v643_v13  ;;  %v709_v12 = vld [vmem:[%s5669_s9 + $0xab0] sm:$0xff]  ;;  %v742_v13 = vld [vmem:[%s5669_s9 + $0xbb8] sm:$0xff] }
 0x107   : > { %4396 = vmatprep.subr.mxu1 %v676_v14  ;;  %4364 = vmatpush3.msra.mxu0 %v627_v16  ;;  %v693_v14 = vld [vmem:[%s5669_s9 + $0xa30] sm:$0xff]  ;;  %v708_v16 = vld [vmem:[%s5669_s9 + $0xaa8] sm:$0xff] }
 0x108   : > { %4397 = vmatpush3.msra.mxu1 %v660_v17  ;;  %4365 = vmatprep.subr.mxu0 %v642_v18  ;;  %v741_v17 = vld [vmem:[%s5669_s9 + $0xbb0] sm:$0xff]  ;;  %v692_v18 = vld [vmem:[%s5669_s9 + $0xa28] sm:$0xff] }
 0x109   : > { %4398 = vmatprep.subr.mxu1 %v675_v19  ;;  %4366 = vmatpush3.msra.mxu0 %v626_v20  ;;  %v725_v19 = vld [vmem:[%s5669_s9 + $0xb30] sm:$0xff]  ;;  %v707_v20 = vld [vmem:[%s5669_s9 + $0xaa0] sm:$0xff] }
 0x10a   : > { %4399 = vmatpush3.msra.mxu1 %v659_v21  ;;  %4367 = vmatprep.subr.mxu0 %v641_v23  ;;  %v740_v21 = vld [vmem:[%s5669_s9 + $0xba8] sm:$0xff]  ;;  %v691_v23 = vld [vmem:[%s5669_s9 + $0xa20] sm:$0xff] }
 0x10b   : > { %4400 = vmatprep.subr.mxu1 %v674_v24  ;;  %4368 = vmatpush3.msra.mxu0 %v625_v26  ;;  %v724_v24 = vld [vmem:[%s5669_s9 + $0xb28] sm:$0xff]  ;;  %v739_v26 = vld [vmem:[%s5669_s9 + $0xba0] sm:$0xff] }
 0x10c   : > { %4401 = vmatpush3.msra.mxu1 %v658_v27  ;;  %4369 = vmatprep.subr.mxu0 %v640_v28  ;;  %v690_v27 = vld [vmem:[%s5669_s9 + $0xa18] sm:$0xff]  ;;  %v723_v28 = vld [vmem:[%s5669_s9 + $0xb20] sm:$0xff] }
 0x10d   : > { %4402 = vmatprep.subr.mxu1 %v673_v29  ;;  %4370 = vmatpush3.msra.mxu0 %v624_v30  ;;  %v1411_v29 = vcombine.high %v357_v22, %v357_v22  ;;  %v705_v30 = vld [vmem:[%s5669_s9 + $0xa90] sm:$0xff] }
 0x10e   : > { %4403 = vmatpush3.msra.mxu1 %v657_v31  ;;  %4371 = vmatprep.subr.mxu0 %v639_v33  ;;  %v738_v31 = vld [vmem:[%s5669_s9 + $0xb98] sm:$0xff]  ;;  %v689_v33 = vld [vmem:[%s5669_s9 + $0xa10] sm:$0xff] }
 0x10f   : > { %4404 = vmatprep.subr.mxu1 %v672_v34  ;;  %4372 = vmatpush3.msra.mxu0 %v623_v36  ;;  %v722_v34 = vld [vmem:[%s5669_s9 + $0xb18] sm:$0xff]  ;;  %v737_v36 = vld [vmem:[%s5669_s9 + $0xb90] sm:$0xff] }
 0x110   : > { %2263 = vmatprep.mubr.f32.mxu0 %v1409_v35  ;;  %4405 = vmatpush3.msra.mxu1 %v656_v37  ;;  %v704_v35 = vld [vmem:[%s5669_s9 + $0xa88] sm:$0xff] }
 0x111   : > { %2264 = vmatmul.mubr.f32.vlgmr.msra.gmra.mxu0 %v1401_v25  ;;  %4406 = vmatprep.subr.mxu1 %v671_v38  ;;  %v706_v25 = vld [vmem:[%s5669_s9 + $0xa98] sm:$0xff]  ;;  %v688_v37 = vld [vmem:[%s5669_s9 + $0xa08] sm:$0xff]  ;;  %v721_v38 = vld [vmem:[%s5669_s9 + $0xb10] sm:$0xff] }
 0x112   : > { %4411 = vmatprep.subr.mxu0 %v718_v39  ;;  %4407 = vmatpush3.msra.mxu1 %v655_v41  ;;  %v1425_v39 = vrot.slane %v1411_v29, %v5737_v52  ;;  %v736_v41 = vld [vmem:[%s5669_s9 + $0xb88] sm:$0xff] }
 0x113   : > { %2333 = vmatprep.mubr.f32.mxu1 %v1410_v40  ;;  %4412 = vmatpush3.msra.mxu0 %v702_v42  ;;  %v703_v40 = vld [vmem:[%s5669_s9 + $0xa80] sm:$0xff]  ;;  %v358_v29 = vld [vmem:[%s5687_s22 + $0x30] sm:$0xff] }
 0x114   : > { %2334 = vmatmul.mubr.f32.vlgmr.msra.gmra.mxu1 %v1408_v32  ;;  %4413 = vmatprep.subr.mxu0 %v717_v43  ;;  %v1418_v32 = vrot.slane %v357_v22, %v5737_v52  ;;  %v687_v43 = vld [vmem:[%s5669_s9 + $0xa00] sm:$0xff]  ;;  %v790_v22 = vld [vmem:[%s5669_s9 + $0xd38] sm:$0xff] }
 0x115   : > { %4446 = vmatprep.subr.mxu1 %v750_v44  ;;  %4414 = vmatpush3.msra.mxu0 %v701_v45  ;;  %v720_v44 = vld [vmem:[%s5669_s9 + $0xb08] sm:$0xff]  ;;  %v735_v45 = vld [vmem:[%s5669_s9 + $0xb80] sm:$0xff] }
 0x116   : > { %4447 = vmatpush3.msra.mxu1 %v734_v46  ;;  %4415 = vmatprep.subr.mxu0 %v716_v47  ;;  %v1426_v42 = vcombine.high %v1418_v32, %v1418_v32  ;;  %v782_v46 = vld [vmem:[%s5669_s9 + $0xcf8] sm:$0xff]  ;;  %v1427_v47 = vcombine.high %v1425_v39, %v1425_v39 }
 0x117   : > { %4448 = vmatprep.subr.mxu1 %v749_v48  ;;  %4416 = vmatpush3.msra.mxu0 %v700_v49  ;;  %v719_v48 = vld [vmem:[%s5669_s9 + $0xb00] sm:$0xff]  ;;  %v766_v49 = vld [vmem:[%s5669_s9 + $0xc78] sm:$0xff] }
 0x118   : > { %4449 = vmatpush3.msra.mxu1 %v733_v50  ;;  %4417 = vmatprep.subr.mxu0 %v715_v51  ;;  %v781_v50 = vld [vmem:[%s5669_s9 + $0xcf0] sm:$0xff]  ;;  %v814_v51 = vld [vmem:[%s5669_s9 + $0xdf8] sm:$0xff] }
 0x119   : > { %4450 = vmatprep.subr.mxu1 %v748_v53  ;;  %4418 = vmatpush3.msra.mxu0 %v699_v54  ;;  %v765_v53 = vld [vmem:[%s5669_s9 + $0xc70] sm:$0xff]  ;;  %v798_v54 = vld [vmem:[%s5669_s9 + $0xd78] sm:$0xff] }
 0x11a   : > { %4451 = vmatpush3.msra.mxu1 %v732_v55  ;;  %4419 = vmatprep.subr.mxu0 %v714_v56  ;;  %v780_v55 = vld [vmem:[%s5669_s9 + $0xce8] sm:$0xff]  ;;  %v813_v56 = vld [vmem:[%s5669_s9 + $0xdf0] sm:$0xff] }
 0x11b   : > { %4452 = vmatprep.subr.mxu1 %v747_v57  ;;  %4420 = vmatpush3.msra.mxu0 %v698_v58  ;;  %v764_v57 = vld [vmem:[%s5669_s9 + $0xc68] sm:$0xff]  ;;  %v797_v58 = vld [vmem:[%s5669_s9 + $0xd70] sm:$0xff] }
 0x11c   : > { %4453 = vmatpush3.msra.mxu1 %v731_v59  ;;  %4421 = vmatprep.subr.mxu0 %v713_v60  ;;  %v779_v59 = vld [vmem:[%s5669_s9 + $0xce0] sm:$0xff]  ;;  %v812_v60 = vld [vmem:[%s5669_s9 + $0xde8] sm:$0xff] }
 0x11d   : > { %4454 = vmatprep.subr.mxu1 %v746_v61  ;;  %4422 = vmatpush3.msra.mxu0 %v697_v62  ;;  %v763_v61 = vld [vmem:[%s5669_s9 + $0xc60] sm:$0xff]  ;;  %v796_v62 = vld [vmem:[%s5669_s9 + $0xd68] sm:$0xff] }
 0x11e   : > { %4455 = vmatpush3.msra.mxu1 %v730_v63  ;;  %4423 = vmatprep.subr.mxu0 %v712_v0  ;;  %v778_v63 = vld [vmem:[%s5669_s9 + $0xcd8] sm:$0xff]  ;;  %v811_v0 = vld [vmem:[%s5669_s9 + $0xde0] sm:$0xff] }
 0x11f   : > { %4456 = vmatprep.subr.mxu1 %v745_v1  ;;  %4424 = vmatpush3.msra.mxu0 %v696_v2  ;;  %v762_v1 = vld [vmem:[%s5669_s9 + $0xc58] sm:$0xff]  ;;  %v795_v2 = vld [vmem:[%s5669_s9 + $0xd60] sm:$0xff] }
 0x120   : > { %4457 = vmatpush3.msra.mxu1 %v729_v3  ;;  %4425 = vmatprep.subr.mxu0 %v711_v4  ;;  %v777_v3 = vld [vmem:[%s5669_s9 + $0xcd0] sm:$0xff]  ;;  %v810_v4 = vld [vmem:[%s5669_s9 + $0xdd8] sm:$0xff] }
 0x121   : > { %4458 = vmatprep.subr.mxu1 %v744_v5  ;;  %4426 = vmatpush3.msra.mxu0 %v695_v6  ;;  %v761_v5 = vld [vmem:[%s5669_s9 + $0xc50] sm:$0xff]  ;;  %v794_v6 = vld [vmem:[%s5669_s9 + $0xd58] sm:$0xff] }
 0x122   : > { %4459 = vmatpush3.msra.mxu1 %v728_v7  ;;  %4427 = vmatprep.subr.mxu0 %v710_v8  ;;  %v776_v7 = vld [vmem:[%s5669_s9 + $0xcc8] sm:$0xff]  ;;  %v809_v8 = vld [vmem:[%s5669_s9 + $0xdd0] sm:$0xff] }
 0x123   : > { %4460 = vmatprep.subr.mxu1 %v743_v9  ;;  %4428 = vmatpush3.msra.mxu0 %v694_v10  ;;  %v760_v9 = vld [vmem:[%s5669_s9 + $0xc48] sm:$0xff]  ;;  %v793_v10 = vld [vmem:[%s5669_s9 + $0xd50] sm:$0xff] }
 0x124   : > { %4461 = vmatpush3.msra.mxu1 %v727_v11  ;;  %4429 = vmatprep.subr.mxu0 %v709_v12  ;;  %v775_v11 = vld [vmem:[%s5669_s9 + $0xcc0] sm:$0xff]  ;;  %v808_v12 = vld [vmem:[%s5669_s9 + $0xdc8] sm:$0xff] }
 0x125   : > { %4462 = vmatprep.subr.mxu1 %v742_v13  ;;  %4430 = vmatpush3.msra.mxu0 %v693_v14  ;;  %v759_v13 = vld [vmem:[%s5669_s9 + $0xc40] sm:$0xff]  ;;  %v792_v14 = vld [vmem:[%s5669_s9 + $0xd48] sm:$0xff] }
 0x126   : > { %4463 = vmatpush3.msra.mxu1 %v726_v15  ;;  %4431 = vmatprep.subr.mxu0 %v708_v16  ;;  %v774_v15 = vld [vmem:[%s5669_s9 + $0xcb8] sm:$0xff]  ;;  %v807_v16 = vld [vmem:[%s5669_s9 + $0xdc0] sm:$0xff] }
 0x127   : > { %4464 = vmatprep.subr.mxu1 %v741_v17  ;;  %4432 = vmatpush3.msra.mxu0 %v692_v18  ;;  %v758_v17 = vld [vmem:[%s5669_s9 + $0xc38] sm:$0xff]  ;;  %v791_v18 = vld [vmem:[%s5669_s9 + $0xd40] sm:$0xff] }
 0x128   : > { %4465 = vmatpush3.msra.mxu1 %v725_v19  ;;  %4433 = vmatprep.subr.mxu0 %v707_v20  ;;  %v773_v19 = vld [vmem:[%s5669_s9 + $0xcb0] sm:$0xff]  ;;  %v806_v20 = vld [vmem:[%s5669_s9 + $0xdb8] sm:$0xff] }
 0x129   : > { %4466 = vmatprep.subr.mxu1 %v740_v21  ;;  %4434 = vmatpush3.msra.mxu0 %v691_v23  ;;  %v757_v21 = vld [vmem:[%s5669_s9 + $0xc30] sm:$0xff]  ;;  %v772_v23 = vld [vmem:[%s5669_s9 + $0xca8] sm:$0xff] }
 0x12a   : > { %4467 = vmatpush3.msra.mxu1 %v724_v24  ;;  %4435 = vmatprep.subr.mxu0 %v706_v25  ;;  %v805_v24 = vld [vmem:[%s5669_s9 + $0xdb0] sm:$0xff]  ;;  %v756_v25 = vld [vmem:[%s5669_s9 + $0xc28] sm:$0xff] }
 0x12b   : > { %4468 = vmatprep.subr.mxu1 %v739_v26  ;;  %4436 = vmatpush3.msra.mxu0 %v690_v27  ;;  %v789_v26 = vld [vmem:[%s5669_s9 + $0xd30] sm:$0xff]  ;;  %v771_v27 = vld [vmem:[%s5669_s9 + $0xca0] sm:$0xff] }
 0x12c   : > { %4469 = vmatpush3.msra.mxu1 %v723_v28  ;;  %4437 = vmatprep.subr.mxu0 %v705_v30  ;;  %v804_v28 = vld [vmem:[%s5669_s9 + $0xda8] sm:$0xff]  ;;  %v755_v30 = vld [vmem:[%s5669_s9 + $0xc20] sm:$0xff] }
 0x12d   : > { %4470 = vmatprep.subr.mxu1 %v738_v31  ;;  %4438 = vmatpush3.msra.mxu0 %v689_v33  ;;  %v788_v31 = vld [vmem:[%s5669_s9 + $0xd28] sm:$0xff]  ;;  %v803_v33 = vld [vmem:[%s5669_s9 + $0xda0] sm:$0xff] }
 0x12e   : > { %4471 = vmatpush3.msra.mxu1 %v722_v34  ;;  %4439 = vmatprep.subr.mxu0 %v704_v35  ;;  %v754_v34 = vld [vmem:[%s5669_s9 + $0xc18] sm:$0xff]  ;;  %v787_v35 = vld [vmem:[%s5669_s9 + $0xd20] sm:$0xff] }
 0x12f   : > { %4472 = vmatprep.subr.mxu1 %v737_v36  ;;  %4440 = vmatpush3.msra.mxu0 %v688_v37  ;;  %v1428_v36 = vcombine.high %v358_v29, %v358_v29  ;;  %v769_v37 = vld [vmem:[%s5669_s9 + $0xc90] sm:$0xff] }
 0x130   : > { %4473 = vmatpush3.msra.mxu1 %v721_v38  ;;  %4441 = vmatprep.subr.mxu0 %v703_v40  ;;  %v802_v38 = vld [vmem:[%s5669_s9 + $0xd98] sm:$0xff]  ;;  %v753_v40 = vld [vmem:[%s5669_s9 + $0xc10] sm:$0xff] }
 0x131   : > { %4474 = vmatprep.subr.mxu1 %v736_v41  ;;  %4442 = vmatpush3.msra.mxu0 %v687_v43  ;;  %v786_v41 = vld [vmem:[%s5669_s9 + $0xd18] sm:$0xff]  ;;  %v801_v43 = vld [vmem:[%s5669_s9 + $0xd90] sm:$0xff] }
 0x132   : > { %2403 = vmatprep.mubr.f32.mxu0 %v1426_v42  ;;  %4475 = vmatpush3.msra.mxu1 %v720_v44  ;;  %v768_v42 = vld [vmem:[%s5669_s9 + $0xc88] sm:$0xff] }
 0x133   : > { %2404 = vmatmul.mubr.f32.vlgmr.msra.gmra.mxu0 %v1418_v32  ;;  %4476 = vmatprep.subr.mxu1 %v735_v45  ;;  %v770_v32 = vld [vmem:[%s5669_s9 + $0xc98] sm:$0xff]  ;;  %v752_v44 = vld [vmem:[%s5669_s9 + $0xc08] sm:$0xff]  ;;  %v785_v45 = vld [vmem:[%s5669_s9 + $0xd10] sm:$0xff] }
 0x134   : > { %4481 = vmatprep.subr.mxu0 %v782_v46  ;;  %4477 = vmatpush3.msra.mxu1 %v719_v48  ;;  %v1442_v46 = vrot.slane %v1428_v36, %v5737_v52  ;;  %v800_v48 = vld [vmem:[%s5669_s9 + $0xd88] sm:$0xff]  ;;  %v359_v36 = vld [vmem:[%s5687_s22 + $0x38] sm:$0xff] }
 0x135   : > { %2473 = vmatprep.mubr.f32.mxu1 %v1427_v47  ;;  %4482 = vmatpush3.msra.mxu0 %v766_v49  ;;  %v767_v47 = vld [vmem:[%s5669_s9 + $0xc80] sm:$0xff] }
 0x136   : > { %2474 = vmatmul.mubr.f32.vlgmr.msra.gmra.mxu1 %v1425_v39  ;;  %4483 = vmatprep.subr.mxu0 %v781_v50  ;;  %v1435_v39 = vrot.slane %v358_v29, %v5737_v52  ;;  %v751_v50 = vld [vmem:[%s5669_s9 + $0xc00] sm:$0xff]  ;;  %v854_v29 = vld [vmem:[%s5669_s9 + $0xf38] sm:$0xff] }
 0x137   : > { %4516 = vmatprep.subr.mxu1 %v814_v51  ;;  %4484 = vmatpush3.msra.mxu0 %v765_v53  ;;  %v784_v51 = vld [vmem:[%s5669_s9 + $0xd08] sm:$0xff]  ;;  %v799_v53 = vld [vmem:[%s5669_s9 + $0xd80] sm:$0xff] }
 0x138   : > { %4517 = vmatpush3.msra.mxu1 %v798_v54  ;;  %4485 = vmatprep.subr.mxu0 %v780_v55  ;;  %v1443_v49 = vcombine.high %v1435_v39, %v1435_v39  ;;  %v846_v54 = vld [vmem:[%s5669_s9 + $0xef8] sm:$0xff]  ;;  %v1444_v55 = vcombine.high %v1442_v46, %v1442_v46 }
 0x139   : > { %4518 = vmatprep.subr.mxu1 %v813_v56  ;;  %4486 = vmatpush3.msra.mxu0 %v764_v57  ;;  %v783_v56 = vld [vmem:[%s5669_s9 + $0xd00] sm:$0xff]  ;;  %v830_v57 = vld [vmem:[%s5669_s9 + $0xe78] sm:$0xff] }
 0x13a   : > { %4519 = vmatpush3.msra.mxu1 %v797_v58  ;;  %4487 = vmatprep.subr.mxu0 %v779_v59  ;;  %v845_v58 = vld [vmem:[%s5669_s9 + $0xef0] sm:$0xff]  ;;  %v878_v59 = vld [vmem:[%s5669_s9 + $0xff8] sm:$0xff] }
 0x13b   : > { %4520 = vmatprep.subr.mxu1 %v812_v60  ;;  %4488 = vmatpush3.msra.mxu0 %v763_v61  ;;  %v829_v60 = vld [vmem:[%s5669_s9 + $0xe70] sm:$0xff]  ;;  %v862_v61 = vld [vmem:[%s5669_s9 + $0xf78] sm:$0xff] }
 0x13c   : > { %4521 = vmatpush3.msra.mxu1 %v796_v62  ;;  %4489 = vmatprep.subr.mxu0 %v778_v63  ;;  %v844_v62 = vld [vmem:[%s5669_s9 + $0xee8] sm:$0xff]  ;;  %v877_v63 = vld [vmem:[%s5669_s9 + $0xff0] sm:$0xff] }
 0x13d   : > { %4522 = vmatprep.subr.mxu1 %v811_v0  ;;  %4490 = vmatpush3.msra.mxu0 %v762_v1  ;;  %v828_v0 = vld [vmem:[%s5669_s9 + $0xe68] sm:$0xff]  ;;  %v861_v1 = vld [vmem:[%s5669_s9 + $0xf70] sm:$0xff] }
 0x13e   : > { %4523 = vmatpush3.msra.mxu1 %v795_v2  ;;  %4491 = vmatprep.subr.mxu0 %v777_v3  ;;  %v843_v2 = vld [vmem:[%s5669_s9 + $0xee0] sm:$0xff]  ;;  %v876_v3 = vld [vmem:[%s5669_s9 + $0xfe8] sm:$0xff] }
 0x13f   : > { %4524 = vmatprep.subr.mxu1 %v810_v4  ;;  %4492 = vmatpush3.msra.mxu0 %v761_v5  ;;  %v827_v4 = vld [vmem:[%s5669_s9 + $0xe60] sm:$0xff]  ;;  %v860_v5 = vld [vmem:[%s5669_s9 + $0xf68] sm:$0xff] }
 0x140   : > { %4525 = vmatpush3.msra.mxu1 %v794_v6  ;;  %4493 = vmatprep.subr.mxu0 %v776_v7  ;;  %v842_v6 = vld [vmem:[%s5669_s9 + $0xed8] sm:$0xff]  ;;  %v875_v7 = vld [vmem:[%s5669_s9 + $0xfe0] sm:$0xff] }
 0x141   : > { %4526 = vmatprep.subr.mxu1 %v809_v8  ;;  %4494 = vmatpush3.msra.mxu0 %v760_v9  ;;  %v826_v8 = vld [vmem:[%s5669_s9 + $0xe58] sm:$0xff]  ;;  %v859_v9 = vld [vmem:[%s5669_s9 + $0xf60] sm:$0xff] }
 0x142   : > { %4527 = vmatpush3.msra.mxu1 %v793_v10  ;;  %4495 = vmatprep.subr.mxu0 %v775_v11  ;;  %v841_v10 = vld [vmem:[%s5669_s9 + $0xed0] sm:$0xff]  ;;  %v874_v11 = vld [vmem:[%s5669_s9 + $0xfd8] sm:$0xff] }
 0x143   : > { %4528 = vmatprep.subr.mxu1 %v808_v12  ;;  %4496 = vmatpush3.msra.mxu0 %v759_v13  ;;  %v825_v12 = vld [vmem:[%s5669_s9 + $0xe50] sm:$0xff]  ;;  %v858_v13 = vld [vmem:[%s5669_s9 + $0xf58] sm:$0xff] }
 0x144   : > { %4529 = vmatpush3.msra.mxu1 %v792_v14  ;;  %4497 = vmatprep.subr.mxu0 %v774_v15  ;;  %v840_v14 = vld [vmem:[%s5669_s9 + $0xec8] sm:$0xff]  ;;  %v873_v15 = vld [vmem:[%s5669_s9 + $0xfd0] sm:$0xff] }
 0x145   : > { %4530 = vmatprep.subr.mxu1 %v807_v16  ;;  %4498 = vmatpush3.msra.mxu0 %v758_v17  ;;  %v824_v16 = vld [vmem:[%s5669_s9 + $0xe48] sm:$0xff]  ;;  %v857_v17 = vld [vmem:[%s5669_s9 + $0xf50] sm:$0xff] }
 0x146   : > { %4531 = vmatpush3.msra.mxu1 %v791_v18  ;;  %4499 = vmatprep.subr.mxu0 %v773_v19  ;;  %v839_v18 = vld [vmem:[%s5669_s9 + $0xec0] sm:$0xff]  ;;  %v872_v19 = vld [vmem:[%s5669_s9 + $0xfc8] sm:$0xff] }
 0x147   : > { %4532 = vmatprep.subr.mxu1 %v806_v20  ;;  %4500 = vmatpush3.msra.mxu0 %v757_v21  ;;  %v823_v20 = vld [vmem:[%s5669_s9 + $0xe40] sm:$0xff]  ;;  %v856_v21 = vld [vmem:[%s5669_s9 + $0xf48] sm:$0xff] }
 0x148   : > { %4533 = vmatpush3.msra.mxu1 %v790_v22  ;;  %4501 = vmatprep.subr.mxu0 %v772_v23  ;;  %v838_v22 = vld [vmem:[%s5669_s9 + $0xeb8] sm:$0xff]  ;;  %v871_v23 = vld [vmem:[%s5669_s9 + $0xfc0] sm:$0xff] }
 0x149   : > { %4534 = vmatprep.subr.mxu1 %v805_v24  ;;  %4502 = vmatpush3.msra.mxu0 %v756_v25  ;;  %v822_v24 = vld [vmem:[%s5669_s9 + $0xe38] sm:$0xff]  ;;  %v855_v25 = vld [vmem:[%s5669_s9 + $0xf40] sm:$0xff] }
 0x14a   : > { %4535 = vmatpush3.msra.mxu1 %v789_v26  ;;  %4503 = vmatprep.subr.mxu0 %v771_v27  ;;  %v837_v26 = vld [vmem:[%s5669_s9 + $0xeb0] sm:$0xff]  ;;  %v870_v27 = vld [vmem:[%s5669_s9 + $0xfb8] sm:$0xff] }
 0x14b   : > { %4536 = vmatprep.subr.mxu1 %v804_v28  ;;  %4504 = vmatpush3.msra.mxu0 %v755_v30  ;;  %v821_v28 = vld [vmem:[%s5669_s9 + $0xe30] sm:$0xff]  ;;  %v836_v30 = vld [vmem:[%s5669_s9 + $0xea8] sm:$0xff] }
 0x14c   : > { %4537 = vmatpush3.msra.mxu1 %v788_v31  ;;  %4505 = vmatprep.subr.mxu0 %v770_v32  ;;  %v869_v31 = vld [vmem:[%s5669_s9 + $0xfb0] sm:$0xff]  ;;  %v820_v32 = vld [vmem:[%s5669_s9 + $0xe28] sm:$0xff] }
 0x14d   : > { %4538 = vmatprep.subr.mxu1 %v803_v33  ;;  %4506 = vmatpush3.msra.mxu0 %v754_v34  ;;  %v853_v33 = vld [vmem:[%s5669_s9 + $0xf30] sm:$0xff]  ;;  %v835_v34 = vld [vmem:[%s5669_s9 + $0xea0] sm:$0xff] }
 0x14e   : > { %4539 = vmatpush3.msra.mxu1 %v787_v35  ;;  %4507 = vmatprep.subr.mxu0 %v769_v37  ;;  %v868_v35 = vld [vmem:[%s5669_s9 + $0xfa8] sm:$0xff]  ;;  %v819_v37 = vld [vmem:[%s5669_s9 + $0xe20] sm:$0xff] }
 0x14f   : > { %4540 = vmatprep.subr.mxu1 %v802_v38  ;;  %4508 = vmatpush3.msra.mxu0 %v753_v40  ;;  %v852_v38 = vld [vmem:[%s5669_s9 + $0xf28] sm:$0xff]  ;;  %v867_v40 = vld [vmem:[%s5669_s9 + $0xfa0] sm:$0xff] }
 0x150   : > { %4541 = vmatpush3.msra.mxu1 %v786_v41  ;;  %4509 = vmatprep.subr.mxu0 %v768_v42  ;;  %v818_v41 = vld [vmem:[%s5669_s9 + $0xe18] sm:$0xff]  ;;  %v851_v42 = vld [vmem:[%s5669_s9 + $0xf20] sm:$0xff] }
 0x151   : > { %4542 = vmatprep.subr.mxu1 %v801_v43  ;;  %4510 = vmatpush3.msra.mxu0 %v752_v44  ;;  %v1445_v43 = vcombine.high %v359_v36, %v359_v36  ;;  %v833_v44 = vld [vmem:[%s5669_s9 + $0xe90] sm:$0xff] }
 0x152   : > { %4543 = vmatpush3.msra.mxu1 %v785_v45  ;;  %4511 = vmatprep.subr.mxu0 %v767_v47  ;;  %v866_v45 = vld [vmem:[%s5669_s9 + $0xf98] sm:$0xff]  ;;  %v817_v47 = vld [vmem:[%s5669_s9 + $0xe10] sm:$0xff] }
 0x153   : > { %4544 = vmatprep.subr.mxu1 %v800_v48  ;;  %4512 = vmatpush3.msra.mxu0 %v751_v50  ;;  %v850_v48 = vld [vmem:[%s5669_s9 + $0xf18] sm:$0xff]  ;;  %v865_v50 = vld [vmem:[%s5669_s9 + $0xf90] sm:$0xff] }
 0x154   : > { %2543 = vmatprep.mubr.f32.mxu0 %v1443_v49  ;;  %4545 = vmatpush3.msra.mxu1 %v784_v51  ;;  %v832_v49 = vld [vmem:[%s5669_s9 + $0xe88] sm:$0xff] }
 0x155   : > { %2544 = vmatmul.mubr.f32.vlgmr.msra.gmra.mxu0 %v1435_v39  ;;  %4546 = vmatprep.subr.mxu1 %v799_v53  ;;  %v834_v39 = vld [vmem:[%s5669_s9 + $0xe98] sm:$0xff]  ;;  %v816_v51 = vld [vmem:[%s5669_s9 + $0xe08] sm:$0xff]  ;;  %v849_v53 = vld [vmem:[%s5669_s9 + $0xf10] sm:$0xff] }
 0x156   : > { %4551 = vmatprep.subr.mxu0 %v846_v54  ;;  %4547 = vmatpush3.msra.mxu1 %v783_v56  ;;  %v1459_v54 = vrot.slane %v1445_v43, %v5737_v52  ;;  %v864_v56 = vld [vmem:[%s5669_s9 + $0xf88] sm:$0xff]  ;;  %v360_v43 = vld [vmem:[%s5687_s22 + $0x40] sm:$0xff] }
 0x157   : > { %2613 = vmatprep.mubr.f32.mxu1 %v1444_v55  ;;  %4552 = vmatpush3.msra.mxu0 %v830_v57  ;;  %v831_v55 = vld [vmem:[%s5669_s9 + $0xe80] sm:$0xff] }
 0x158   : > { %2614 = vmatmul.mubr.f32.vlgmr.msra.gmra.mxu1 %v1442_v46  ;;  %4553 = vmatprep.subr.mxu0 %v845_v58  ;;  %v1452_v46 = vrot.slane %v359_v36, %v5737_v52  ;;  %v815_v58 = vld [vmem:[%s5669_s9 + $0xe00] sm:$0xff]  ;;  %v918_v36 = vld [vmem:[%s5669_s9 + $0x1138] sm:$0xff] }
 0x159   : > { %4586 = vmatprep.subr.mxu1 %v878_v59  ;;  %4554 = vmatpush3.msra.mxu0 %v829_v60  ;;  %v848_v59 = vld [vmem:[%s5669_s9 + $0xf08] sm:$0xff]  ;;  %v863_v60 = vld [vmem:[%s5669_s9 + $0xf80] sm:$0xff] }
 0x15a   : > { %4587 = vmatpush3.msra.mxu1 %v862_v61  ;;  %4555 = vmatprep.subr.mxu0 %v844_v62  ;;  %v1460_v57 = vcombine.high %v1452_v46, %v1452_v46  ;;  %v910_v61 = vld [vmem:[%s5669_s9 + $0x10f8] sm:$0xff]  ;;  %v1461_v62 = vcombine.high %v1459_v54, %v1459_v54 }
 0x15b   : > { %4588 = vmatprep.subr.mxu1 %v877_v63  ;;  %4556 = vmatpush3.msra.mxu0 %v828_v0  ;;  %v847_v63 = vld [vmem:[%s5669_s9 + $0xf00] sm:$0xff]  ;;  %v894_v0 = vld [vmem:[%s5669_s9 + $0x1078] sm:$0xff] }
 0x15c   : > { %4589 = vmatpush3.msra.mxu1 %v861_v1  ;;  %4557 = vmatprep.subr.mxu0 %v843_v2  ;;  %v909_v1 = vld [vmem:[%s5669_s9 + $0x10f0] sm:$0xff]  ;;  %v942_v2 = vld [vmem:[%s5669_s9 + $0x11f8] sm:$0xff] }
 0x15d   : > { %4590 = vmatprep.subr.mxu1 %v876_v3  ;;  %4558 = vmatpush3.msra.mxu0 %v827_v4  ;;  %v893_v3 = vld [vmem:[%s5669_s9 + $0x1070] sm:$0xff]  ;;  %v926_v4 = vld [vmem:[%s5669_s9 + $0x1178] sm:$0xff] }
 0x15e   : > { %4591 = vmatpush3.msra.mxu1 %v860_v5  ;;  %4559 = vmatprep.subr.mxu0 %v842_v6  ;;  %v908_v5 = vld [vmem:[%s5669_s9 + $0x10e8] sm:$0xff]  ;;  %v941_v6 = vld [vmem:[%s5669_s9 + $0x11f0] sm:$0xff] }
 0x15f   : > { %4592 = vmatprep.subr.mxu1 %v875_v7  ;;  %4560 = vmatpush3.msra.mxu0 %v826_v8  ;;  %v892_v7 = vld [vmem:[%s5669_s9 + $0x1068] sm:$0xff]  ;;  %v925_v8 = vld [vmem:[%s5669_s9 + $0x1170] sm:$0xff] }
 0x160   : > { %4593 = vmatpush3.msra.mxu1 %v859_v9  ;;  %4561 = vmatprep.subr.mxu0 %v841_v10  ;;  %v907_v9 = vld [vmem:[%s5669_s9 + $0x10e0] sm:$0xff]  ;;  %v940_v10 = vld [vmem:[%s5669_s9 + $0x11e8] sm:$0xff] }
 0x161   : > { %4594 = vmatprep.subr.mxu1 %v874_v11  ;;  %4562 = vmatpush3.msra.mxu0 %v825_v12  ;;  %v891_v11 = vld [vmem:[%s5669_s9 + $0x1060] sm:$0xff]  ;;  %v924_v12 = vld [vmem:[%s5669_s9 + $0x1168] sm:$0xff] }
 0x162   : > { %4595 = vmatpush3.msra.mxu1 %v858_v13  ;;  %4563 = vmatprep.subr.mxu0 %v840_v14  ;;  %v906_v13 = vld [vmem:[%s5669_s9 + $0x10d8] sm:$0xff]  ;;  %v939_v14 = vld [vmem:[%s5669_s9 + $0x11e0] sm:$0xff] }
 0x163   : > { %4596 = vmatprep.subr.mxu1 %v873_v15  ;;  %4564 = vmatpush3.msra.mxu0 %v824_v16  ;;  %v890_v15 = vld [vmem:[%s5669_s9 + $0x1058] sm:$0xff]  ;;  %v923_v16 = vld [vmem:[%s5669_s9 + $0x1160] sm:$0xff] }
 0x164   : > { %4597 = vmatpush3.msra.mxu1 %v857_v17  ;;  %4565 = vmatprep.subr.mxu0 %v839_v18  ;;  %v905_v17 = vld [vmem:[%s5669_s9 + $0x10d0] sm:$0xff]  ;;  %v938_v18 = vld [vmem:[%s5669_s9 + $0x11d8] sm:$0xff] }
 0x165   : > { %4598 = vmatprep.subr.mxu1 %v872_v19  ;;  %4566 = vmatpush3.msra.mxu0 %v823_v20  ;;  %v889_v19 = vld [vmem:[%s5669_s9 + $0x1050] sm:$0xff]  ;;  %v922_v20 = vld [vmem:[%s5669_s9 + $0x1158] sm:$0xff] }
 0x166   : > { %4599 = vmatpush3.msra.mxu1 %v856_v21  ;;  %4567 = vmatprep.subr.mxu0 %v838_v22  ;;  %v904_v21 = vld [vmem:[%s5669_s9 + $0x10c8] sm:$0xff]  ;;  %v937_v22 = vld [vmem:[%s5669_s9 + $0x11d0] sm:$0xff] }
 0x167   : > { %4600 = vmatprep.subr.mxu1 %v871_v23  ;;  %4568 = vmatpush3.msra.mxu0 %v822_v24  ;;  %v888_v23 = vld [vmem:[%s5669_s9 + $0x1048] sm:$0xff]  ;;  %v921_v24 = vld [vmem:[%s5669_s9 + $0x1150] sm:$0xff] }
 0x168   : > { %4601 = vmatpush3.msra.mxu1 %v855_v25  ;;  %4569 = vmatprep.subr.mxu0 %v837_v26  ;;  %v903_v25 = vld [vmem:[%s5669_s9 + $0x10c0] sm:$0xff]  ;;  %v936_v26 = vld [vmem:[%s5669_s9 + $0x11c8] sm:$0xff] }
 0x169   : > { %4602 = vmatprep.subr.mxu1 %v870_v27  ;;  %4570 = vmatpush3.msra.mxu0 %v821_v28  ;;  %v887_v27 = vld [vmem:[%s5669_s9 + $0x1040] sm:$0xff]  ;;  %v920_v28 = vld [vmem:[%s5669_s9 + $0x1148] sm:$0xff] }
 0x16a   : > { %4603 = vmatpush3.msra.mxu1 %v854_v29  ;;  %4571 = vmatprep.subr.mxu0 %v836_v30  ;;  %v902_v29 = vld [vmem:[%s5669_s9 + $0x10b8] sm:$0xff]  ;;  %v935_v30 = vld [vmem:[%s5669_s9 + $0x11c0] sm:$0xff] }
 0x16b   : > { %4604 = vmatprep.subr.mxu1 %v869_v31  ;;  %4572 = vmatpush3.msra.mxu0 %v820_v32  ;;  %v886_v31 = vld [vmem:[%s5669_s9 + $0x1038] sm:$0xff]  ;;  %v919_v32 = vld [vmem:[%s5669_s9 + $0x1140] sm:$0xff] }
 0x16c   : > { %4605 = vmatpush3.msra.mxu1 %v853_v33  ;;  %4573 = vmatprep.subr.mxu0 %v835_v34  ;;  %v901_v33 = vld [vmem:[%s5669_s9 + $0x10b0] sm:$0xff]  ;;  %v934_v34 = vld [vmem:[%s5669_s9 + $0x11b8] sm:$0xff] }
 0x16d   : > { %4606 = vmatprep.subr.mxu1 %v868_v35  ;;  %4574 = vmatpush3.msra.mxu0 %v819_v37  ;;  %v885_v35 = vld [vmem:[%s5669_s9 + $0x1030] sm:$0xff]  ;;  %v900_v37 = vld [vmem:[%s5669_s9 + $0x10a8] sm:$0xff] }
 0x16e   : > { %4607 = vmatpush3.msra.mxu1 %v852_v38  ;;  %4575 = vmatprep.subr.mxu0 %v834_v39  ;;  %v933_v38 = vld [vmem:[%s5669_s9 + $0x11b0] sm:$0xff]  ;;  %v884_v39 = vld [vmem:[%s5669_s9 + $0x1028] sm:$0xff] }
 0x16f   : > { %4608 = vmatprep.subr.mxu1 %v867_v40  ;;  %4576 = vmatpush3.msra.mxu0 %v818_v41  ;;  %v917_v40 = vld [vmem:[%s5669_s9 + $0x1130] sm:$0xff]  ;;  %v899_v41 = vld [vmem:[%s5669_s9 + $0x10a0] sm:$0xff] }
 0x170   : > { %4609 = vmatpush3.msra.mxu1 %v851_v42  ;;  %4577 = vmatprep.subr.mxu0 %v833_v44  ;;  %v932_v42 = vld [vmem:[%s5669_s9 + $0x11a8] sm:$0xff]  ;;  %v883_v44 = vld [vmem:[%s5669_s9 + $0x1020] sm:$0xff] }
 0x171   : > { %4610 = vmatprep.subr.mxu1 %v866_v45  ;;  %4578 = vmatpush3.msra.mxu0 %v817_v47  ;;  %v916_v45 = vld [vmem:[%s5669_s9 + $0x1128] sm:$0xff]  ;;  %v931_v47 = vld [vmem:[%s5669_s9 + $0x11a0] sm:$0xff] }
 0x172   : > { %4611 = vmatpush3.msra.mxu1 %v850_v48  ;;  %4579 = vmatprep.subr.mxu0 %v832_v49  ;;  %v882_v48 = vld [vmem:[%s5669_s9 + $0x1018] sm:$0xff]  ;;  %v915_v49 = vld [vmem:[%s5669_s9 + $0x1120] sm:$0xff] }
 0x173   : > { %4612 = vmatprep.subr.mxu1 %v865_v50  ;;  %4580 = vmatpush3.msra.mxu0 %v816_v51  ;;  %v1462_v50 = vcombine.high %v360_v43, %v360_v43  ;;  %v897_v51 = vld [vmem:[%s5669_s9 + $0x1090] sm:$0xff] }
 0x174   : > { %4613 = vmatpush3.msra.mxu1 %v849_v53  ;;  %4581 = vmatprep.subr.mxu0 %v831_v55  ;;  %v930_v53 = vld [vmem:[%s5669_s9 + $0x1198] sm:$0xff]  ;;  %v881_v55 = vld [vmem:[%s5669_s9 + $0x1010] sm:$0xff] }
 0x175   : > { %4614 = vmatprep.subr.mxu1 %v864_v56  ;;  %4582 = vmatpush3.msra.mxu0 %v815_v58  ;;  %v914_v56 = vld [vmem:[%s5669_s9 + $0x1118] sm:$0xff]  ;;  %v929_v58 = vld [vmem:[%s5669_s9 + $0x1190] sm:$0xff] }
 0x176   : > { %2683 = vmatprep.mubr.f32.mxu0 %v1460_v57  ;;  %4615 = vmatpush3.msra.mxu1 %v848_v59  ;;  %v896_v57 = vld [vmem:[%s5669_s9 + $0x1088] sm:$0xff] }
 0x177   : > { %2684 = vmatmul.mubr.f32.vlgmr.msra.gmra.mxu0 %v1452_v46  ;;  %4616 = vmatprep.subr.mxu1 %v863_v60  ;;  %v898_v46 = vld [vmem:[%s5669_s9 + $0x1098] sm:$0xff]  ;;  %v880_v59 = vld [vmem:[%s5669_s9 + $0x1008] sm:$0xff]  ;;  %v913_v60 = vld [vmem:[%s5669_s9 + $0x1110] sm:$0xff] }
 0x178   : > { %4621 = vmatprep.subr.mxu0 %v910_v61  ;;  %4617 = vmatpush3.msra.mxu1 %v847_v63  ;;  %v1476_v61 = vrot.slane %v1462_v50, %v5737_v52  ;;  %v928_v63 = vld [vmem:[%s5669_s9 + $0x1188] sm:$0xff] }
 0x179   : > { %2753 = vmatprep.mubr.f32.mxu1 %v1461_v62  ;;  %4622 = vmatpush3.msra.mxu0 %v894_v0  ;;  %v895_v62 = vld [vmem:[%s5669_s9 + $0x1080] sm:$0xff] }
 0x17a   : > { %2754 = vmatmul.mubr.f32.vlgmr.msra.gmra.mxu1 %v1459_v54  ;;  %4623 = vmatprep.subr.mxu0 %v909_v1  ;;  %v1469_v54 = vrot.slane %v360_v43, %v5737_v52  ;;  %v879_v1 = vld [vmem:[%s5669_s9 + $0x1000] sm:$0xff]  ;;  %v982_v43 = vld [vmem:[%s5669_s9 + $0x1338] sm:$0xff] }
 0x17b   : > { %4656 = vmatprep.subr.mxu1 %v942_v2  ;;  %4624 = vmatpush3.msra.mxu0 %v893_v3  ;;  %v912_v2 = vld [vmem:[%s5669_s9 + $0x1108] sm:$0xff]  ;;  %v927_v3 = vld [vmem:[%s5669_s9 + $0x1180] sm:$0xff] }
 0x17c   : > { %4657 = vmatpush3.msra.mxu1 %v926_v4  ;;  %4625 = vmatprep.subr.mxu0 %v908_v5  ;;  %v1477_v0 = vcombine.high %v1469_v54, %v1469_v54  ;;  %v974_v4 = vld [vmem:[%s5669_s9 + $0x12f8] sm:$0xff]  ;;  %v1478_v5 = vcombine.high %v1476_v61, %v1476_v61  ;;  %v361_v50 = vld [vmem:[%s5687_s22 + $0x48] sm:$0xff] }
 0x17d   : > { %4658 = vmatprep.subr.mxu1 %v941_v6  ;;  %4626 = vmatpush3.msra.mxu0 %v892_v7  ;;  %v911_v6 = vld [vmem:[%s5669_s9 + $0x1100] sm:$0xff]  ;;  %v958_v7 = vld [vmem:[%s5669_s9 + $0x1278] sm:$0xff] }
 0x17e   : > { %4659 = vmatpush3.msra.mxu1 %v925_v8  ;;  %4627 = vmatprep.subr.mxu0 %v907_v9  ;;  %v973_v8 = vld [vmem:[%s5669_s9 + $0x12f0] sm:$0xff]  ;;  %v1006_v9 = vld [vmem:[%s5669_s9 + $0x13f8] sm:$0xff] }
 0x17f   : > { %4660 = vmatprep.subr.mxu1 %v940_v10  ;;  %4628 = vmatpush3.msra.mxu0 %v891_v11  ;;  %v957_v10 = vld [vmem:[%s5669_s9 + $0x1270] sm:$0xff]  ;;  %v990_v11 = vld [vmem:[%s5669_s9 + $0x1378] sm:$0xff] }
 0x180   : > { %4661 = vmatpush3.msra.mxu1 %v924_v12  ;;  %4629 = vmatprep.subr.mxu0 %v906_v13  ;;  %v972_v12 = vld [vmem:[%s5669_s9 + $0x12e8] sm:$0xff]  ;;  %v1005_v13 = vld [vmem:[%s5669_s9 + $0x13f0] sm:$0xff] }
 0x181   : > { %4662 = vmatprep.subr.mxu1 %v939_v14  ;;  %4630 = vmatpush3.msra.mxu0 %v890_v15  ;;  %v956_v14 = vld [vmem:[%s5669_s9 + $0x1268] sm:$0xff]  ;;  %v989_v15 = vld [vmem:[%s5669_s9 + $0x1370] sm:$0xff] }
 0x182   : > { %4663 = vmatpush3.msra.mxu1 %v923_v16  ;;  %4631 = vmatprep.subr.mxu0 %v905_v17  ;;  %v971_v16 = vld [vmem:[%s5669_s9 + $0x12e0] sm:$0xff]  ;;  %v1004_v17 = vld [vmem:[%s5669_s9 + $0x13e8] sm:$0xff] }
 0x183   : > { %4664 = vmatprep.subr.mxu1 %v938_v18  ;;  %4632 = vmatpush3.msra.mxu0 %v889_v19  ;;  %v955_v18 = vld [vmem:[%s5669_s9 + $0x1260] sm:$0xff]  ;;  %v988_v19 = vld [vmem:[%s5669_s9 + $0x1368] sm:$0xff] }
 0x184   : > { %4665 = vmatpush3.msra.mxu1 %v922_v20  ;;  %4633 = vmatprep.subr.mxu0 %v904_v21  ;;  %v970_v20 = vld [vmem:[%s5669_s9 + $0x12d8] sm:$0xff]  ;;  %v1003_v21 = vld [vmem:[%s5669_s9 + $0x13e0] sm:$0xff] }
 0x185   : > { %4666 = vmatprep.subr.mxu1 %v937_v22  ;;  %4634 = vmatpush3.msra.mxu0 %v888_v23  ;;  %v954_v22 = vld [vmem:[%s5669_s9 + $0x1258] sm:$0xff]  ;;  %v987_v23 = vld [vmem:[%s5669_s9 + $0x1360] sm:$0xff] }
 0x186   : > { %4667 = vmatpush3.msra.mxu1 %v921_v24  ;;  %4635 = vmatprep.subr.mxu0 %v903_v25  ;;  %v969_v24 = vld [vmem:[%s5669_s9 + $0x12d0] sm:$0xff]  ;;  %v1002_v25 = vld [vmem:[%s5669_s9 + $0x13d8] sm:$0xff] }
 0x187   : > { %4668 = vmatprep.subr.mxu1 %v936_v26  ;;  %4636 = vmatpush3.msra.mxu0 %v887_v27  ;;  %v953_v26 = vld [vmem:[%s5669_s9 + $0x1250] sm:$0xff]  ;;  %v986_v27 = vld [vmem:[%s5669_s9 + $0x1358] sm:$0xff] }
 0x188   : > { %4669 = vmatpush3.msra.mxu1 %v920_v28  ;;  %4637 = vmatprep.subr.mxu0 %v902_v29  ;;  %v968_v28 = vld [vmem:[%s5669_s9 + $0x12c8] sm:$0xff]  ;;  %v1001_v29 = vld [vmem:[%s5669_s9 + $0x13d0] sm:$0xff] }
 0x189   : > { %4670 = vmatprep.subr.mxu1 %v935_v30  ;;  %4638 = vmatpush3.msra.mxu0 %v886_v31  ;;  %v952_v30 = vld [vmem:[%s5669_s9 + $0x1248] sm:$0xff]  ;;  %v985_v31 = vld [vmem:[%s5669_s9 + $0x1350] sm:$0xff] }
 0x18a   : > { %4671 = vmatpush3.msra.mxu1 %v919_v32  ;;  %4639 = vmatprep.subr.mxu0 %v901_v33  ;;  %v967_v32 = vld [vmem:[%s5669_s9 + $0x12c0] sm:$0xff]  ;;  %v1000_v33 = vld [vmem:[%s5669_s9 + $0x13c8] sm:$0xff] }
 0x18b   : > { %4672 = vmatprep.subr.mxu1 %v934_v34  ;;  %4640 = vmatpush3.msra.mxu0 %v885_v35  ;;  %v951_v34 = vld [vmem:[%s5669_s9 + $0x1240] sm:$0xff]  ;;  %v984_v35 = vld [vmem:[%s5669_s9 + $0x1348] sm:$0xff] }
 0x18c   : > { %4673 = vmatpush3.msra.mxu1 %v918_v36  ;;  %4641 = vmatprep.subr.mxu0 %v900_v37  ;;  %v966_v36 = vld [vmem:[%s5669_s9 + $0x12b8] sm:$0xff]  ;;  %v999_v37 = vld [vmem:[%s5669_s9 + $0x13c0] sm:$0xff] }
 0x18d   : > { %4674 = vmatprep.subr.mxu1 %v933_v38  ;;  %4642 = vmatpush3.msra.mxu0 %v884_v39  ;;  %v950_v38 = vld [vmem:[%s5669_s9 + $0x1238] sm:$0xff]  ;;  %v983_v39 = vld [vmem:[%s5669_s9 + $0x1340] sm:$0xff] }
 0x18e   : > { %4675 = vmatpush3.msra.mxu1 %v917_v40  ;;  %4643 = vmatprep.subr.mxu0 %v899_v41  ;;  %v965_v40 = vld [vmem:[%s5669_s9 + $0x12b0] sm:$0xff]  ;;  %v998_v41 = vld [vmem:[%s5669_s9 + $0x13b8] sm:$0xff] }
 0x18f   : > { %4676 = vmatprep.subr.mxu1 %v932_v42  ;;  %4644 = vmatpush3.msra.mxu0 %v883_v44  ;;  %v949_v42 = vld [vmem:[%s5669_s9 + $0x1230] sm:$0xff]  ;;  %v964_v44 = vld [vmem:[%s5669_s9 + $0x12a8] sm:$0xff] }
 0x190   : > { %4677 = vmatpush3.msra.mxu1 %v916_v45  ;;  %4645 = vmatprep.subr.mxu0 %v898_v46  ;;  %v997_v45 = vld [vmem:[%s5669_s9 + $0x13b0] sm:$0xff]  ;;  %v948_v46 = vld [vmem:[%s5669_s9 + $0x1228] sm:$0xff] }
 0x191   : > { %4678 = vmatprep.subr.mxu1 %v931_v47  ;;  %4646 = vmatpush3.msra.mxu0 %v882_v48  ;;  %v981_v47 = vld [vmem:[%s5669_s9 + $0x1330] sm:$0xff]  ;;  %v963_v48 = vld [vmem:[%s5669_s9 + $0x12a0] sm:$0xff] }
 0x192   : > { %4679 = vmatpush3.msra.mxu1 %v915_v49  ;;  %4647 = vmatprep.subr.mxu0 %v897_v51  ;;  %v996_v49 = vld [vmem:[%s5669_s9 + $0x13a8] sm:$0xff]  ;;  %v947_v51 = vld [vmem:[%s5669_s9 + $0x1220] sm:$0xff] }
 0x193   : > { %4680 = vmatprep.subr.mxu1 %v930_v53  ;;  %4648 = vmatpush3.msra.mxu0 %v881_v55  ;;  %v980_v53 = vld [vmem:[%s5669_s9 + $0x1328] sm:$0xff]  ;;  %v995_v55 = vld [vmem:[%s5669_s9 + $0x13a0] sm:$0xff] }
 0x194   : > { %4681 = vmatpush3.msra.mxu1 %v914_v56  ;;  %4649 = vmatprep.subr.mxu0 %v896_v57  ;;  %v946_v56 = vld [vmem:[%s5669_s9 + $0x1218] sm:$0xff]  ;;  %v979_v57 = vld [vmem:[%s5669_s9 + $0x1320] sm:$0xff] }
 0x195   : > { %4682 = vmatprep.subr.mxu1 %v929_v58  ;;  %4650 = vmatpush3.msra.mxu0 %v880_v59  ;;  %v1479_v58 = vcombine.high %v361_v50, %v361_v50  ;;  %v961_v59 = vld [vmem:[%s5669_s9 + $0x1290] sm:$0xff] }
 0x196   : > { %4683 = vmatpush3.msra.mxu1 %v913_v60  ;;  %4651 = vmatprep.subr.mxu0 %v895_v62  ;;  %v994_v60 = vld [vmem:[%s5669_s9 + $0x1398] sm:$0xff]  ;;  %v945_v62 = vld [vmem:[%s5669_s9 + $0x1210] sm:$0xff] }
 0x197   : > { %4684 = vmatprep.subr.mxu1 %v928_v63  ;;  %4652 = vmatpush3.msra.mxu0 %v879_v1  ;;  %v978_v63 = vld [vmem:[%s5669_s9 + $0x1318] sm:$0xff]  ;;  %v993_v1 = vld [vmem:[%s5669_s9 + $0x1390] sm:$0xff] }
 0x198   : > { %2823 = vmatprep.mubr.f32.mxu0 %v1477_v0  ;;  %4685 = vmatpush3.msra.mxu1 %v912_v2  ;;  %v960_v0 = vld [vmem:[%s5669_s9 + $0x1288] sm:$0xff] }
 0x199   : > { %2824 = vmatmul.mubr.f32.vlgmr.msra.gmra.mxu0 %v1469_v54  ;;  %4686 = vmatprep.subr.mxu1 %v927_v3  ;;  %v962_v54 = vld [vmem:[%s5669_s9 + $0x1298] sm:$0xff]  ;;  %v944_v2 = vld [vmem:[%s5669_s9 + $0x1208] sm:$0xff]  ;;  %v977_v3 = vld [vmem:[%s5669_s9 + $0x1310] sm:$0xff] }
 0x19a   : > { %4691 = vmatprep.subr.mxu0 %v974_v4  ;;  %4687 = vmatpush3.msra.mxu1 %v911_v6  ;;  %v1493_v4 = vrot.slane %v1479_v58, %v5737_v52  ;;  %v992_v6 = vld [vmem:[%s5669_s9 + $0x1388] sm:$0xff] }
 0x19b   : > { %2893 = vmatprep.mubr.f32.mxu1 %v1478_v5  ;;  %4692 = vmatpush3.msra.mxu0 %v958_v7  ;;  %v959_v5 = vld [vmem:[%s5669_s9 + $0x1280] sm:$0xff]  ;;  %v362_v58 = vld [vmem:[%s5687_s22 + $0x50] sm:$0xff] }
 0x19c   : > { %2894 = vmatmul.mubr.f32.vlgmr.msra.gmra.mxu1 %v1476_v61  ;;  %4693 = vmatprep.subr.mxu0 %v973_v8  ;;  %v1486_v61 = vrot.slane %v361_v50, %v5737_v52  ;;  %v943_v8 = vld [vmem:[%s5669_s9 + $0x1200] sm:$0xff]  ;;  %v1046_v50 = vld [vmem:[%s5669_s9 + $0x1538] sm:$0xff] }
 0x19d   : > { %4726 = vmatprep.subr.mxu1 %v1006_v9  ;;  %4694 = vmatpush3.msra.mxu0 %v957_v10  ;;  %v976_v9 = vld [vmem:[%s5669_s9 + $0x1308] sm:$0xff]  ;;  %v991_v10 = vld [vmem:[%s5669_s9 + $0x1380] sm:$0xff] }
 0x19e   : > { %4727 = vmatpush3.msra.mxu1 %v990_v11  ;;  %4695 = vmatprep.subr.mxu0 %v972_v12  ;;  %v1494_v7 = vcombine.high %v1486_v61, %v1486_v61  ;;  %v1038_v11 = vld [vmem:[%s5669_s9 + $0x14f8] sm:$0xff]  ;;  %v1495_v12 = vcombine.high %v1493_v4, %v1493_v4 }
 0x19f   : > { %4728 = vmatprep.subr.mxu1 %v1005_v13  ;;  %4696 = vmatpush3.msra.mxu0 %v956_v14  ;;  %v975_v13 = vld [vmem:[%s5669_s9 + $0x1300] sm:$0xff]  ;;  %v1022_v14 = vld [vmem:[%s5669_s9 + $0x1478] sm:$0xff] }
 0x1a0   : > { %4729 = vmatpush3.msra.mxu1 %v989_v15  ;;  %4697 = vmatprep.subr.mxu0 %v971_v16  ;;  %v1037_v15 = vld [vmem:[%s5669_s9 + $0x14f0] sm:$0xff]  ;;  %v1070_v16 = vld [vmem:[%s5669_s9 + $0x15f8] sm:$0xff] }
 0x1a1   : > { %4730 = vmatprep.subr.mxu1 %v1004_v17  ;;  %4698 = vmatpush3.msra.mxu0 %v955_v18  ;;  %v1021_v17 = vld [vmem:[%s5669_s9 + $0x1470] sm:$0xff]  ;;  %v1054_v18 = vld [vmem:[%s5669_s9 + $0x1578] sm:$0xff] }
 0x1a2   : > { %4731 = vmatpush3.msra.mxu1 %v988_v19  ;;  %4699 = vmatprep.subr.mxu0 %v970_v20  ;;  %v1036_v19 = vld [vmem:[%s5669_s9 + $0x14e8] sm:$0xff]  ;;  %v1069_v20 = vld [vmem:[%s5669_s9 + $0x15f0] sm:$0xff] }
 0x1a3   : > { %4732 = vmatprep.subr.mxu1 %v1003_v21  ;;  %4700 = vmatpush3.msra.mxu0 %v954_v22  ;;  %v1020_v21 = vld [vmem:[%s5669_s9 + $0x1468] sm:$0xff]  ;;  %v1053_v22 = vld [vmem:[%s5669_s9 + $0x1570] sm:$0xff] }
 0x1a4   : > { %4733 = vmatpush3.msra.mxu1 %v987_v23  ;;  %4701 = vmatprep.subr.mxu0 %v969_v24  ;;  %v1035_v23 = vld [vmem:[%s5669_s9 + $0x14e0] sm:$0xff]  ;;  %v1068_v24 = vld [vmem:[%s5669_s9 + $0x15e8] sm:$0xff] }
 0x1a5   : > { %4734 = vmatprep.subr.mxu1 %v1002_v25  ;;  %4702 = vmatpush3.msra.mxu0 %v953_v26  ;;  %v1019_v25 = vld [vmem:[%s5669_s9 + $0x1460] sm:$0xff]  ;;  %v1052_v26 = vld [vmem:[%s5669_s9 + $0x1568] sm:$0xff] }
 0x1a6   : > { %4735 = vmatpush3.msra.mxu1 %v986_v27  ;;  %4703 = vmatprep.subr.mxu0 %v968_v28  ;;  %v1034_v27 = vld [vmem:[%s5669_s9 + $0x14d8] sm:$0xff]  ;;  %v1067_v28 = vld [vmem:[%s5669_s9 + $0x15e0] sm:$0xff] }
 0x1a7   : > { %4736 = vmatprep.subr.mxu1 %v1001_v29  ;;  %4704 = vmatpush3.msra.mxu0 %v952_v30  ;;  %v1018_v29 = vld [vmem:[%s5669_s9 + $0x1458] sm:$0xff]  ;;  %v1051_v30 = vld [vmem:[%s5669_s9 + $0x1560] sm:$0xff] }
 0x1a8   : > { %4737 = vmatpush3.msra.mxu1 %v985_v31  ;;  %4705 = vmatprep.subr.mxu0 %v967_v32  ;;  %v1033_v31 = vld [vmem:[%s5669_s9 + $0x14d0] sm:$0xff]  ;;  %v1066_v32 = vld [vmem:[%s5669_s9 + $0x15d8] sm:$0xff] }
 0x1a9   : > { %4738 = vmatprep.subr.mxu1 %v1000_v33  ;;  %4706 = vmatpush3.msra.mxu0 %v951_v34  ;;  %v1017_v33 = vld [vmem:[%s5669_s9 + $0x1450] sm:$0xff]  ;;  %v1050_v34 = vld [vmem:[%s5669_s9 + $0x1558] sm:$0xff] }
 0x1aa   : > { %4739 = vmatpush3.msra.mxu1 %v984_v35  ;;  %4707 = vmatprep.subr.mxu0 %v966_v36  ;;  %v1032_v35 = vld [vmem:[%s5669_s9 + $0x14c8] sm:$0xff]  ;;  %v1065_v36 = vld [vmem:[%s5669_s9 + $0x15d0] sm:$0xff] }
 0x1ab   : > { %4740 = vmatprep.subr.mxu1 %v999_v37  ;;  %4708 = vmatpush3.msra.mxu0 %v950_v38  ;;  %v1016_v37 = vld [vmem:[%s5669_s9 + $0x1448] sm:$0xff]  ;;  %v1049_v38 = vld [vmem:[%s5669_s9 + $0x1550] sm:$0xff] }
 0x1ac   : > { %4741 = vmatpush3.msra.mxu1 %v983_v39  ;;  %4709 = vmatprep.subr.mxu0 %v965_v40  ;;  %v1031_v39 = vld [vmem:[%s5669_s9 + $0x14c0] sm:$0xff]  ;;  %v1064_v40 = vld [vmem:[%s5669_s9 + $0x15c8] sm:$0xff] }
 0x1ad   : > { %4742 = vmatprep.subr.mxu1 %v998_v41  ;;  %4710 = vmatpush3.msra.mxu0 %v949_v42  ;;  %v1015_v41 = vld [vmem:[%s5669_s9 + $0x1440] sm:$0xff]  ;;  %v1048_v42 = vld [vmem:[%s5669_s9 + $0x1548] sm:$0xff] }
 0x1ae   : > { %4743 = vmatpush3.msra.mxu1 %v982_v43  ;;  %4711 = vmatprep.subr.mxu0 %v964_v44  ;;  %v1030_v43 = vld [vmem:[%s5669_s9 + $0x14b8] sm:$0xff]  ;;  %v1063_v44 = vld [vmem:[%s5669_s9 + $0x15c0] sm:$0xff] }
 0x1af   : > { %4744 = vmatprep.subr.mxu1 %v997_v45  ;;  %4712 = vmatpush3.msra.mxu0 %v948_v46  ;;  %v1014_v45 = vld [vmem:[%s5669_s9 + $0x1438] sm:$0xff]  ;;  %v1047_v46 = vld [vmem:[%s5669_s9 + $0x1540] sm:$0xff] }
 0x1b0   : > { %4745 = vmatpush3.msra.mxu1 %v981_v47  ;;  %4713 = vmatprep.subr.mxu0 %v963_v48  ;;  %v1029_v47 = vld [vmem:[%s5669_s9 + $0x14b0] sm:$0xff]  ;;  %v1062_v48 = vld [vmem:[%s5669_s9 + $0x15b8] sm:$0xff] }
 0x1b1   : > { %4746 = vmatprep.subr.mxu1 %v996_v49  ;;  %4714 = vmatpush3.msra.mxu0 %v947_v51  ;;  %v1013_v49 = vld [vmem:[%s5669_s9 + $0x1430] sm:$0xff]  ;;  %v1028_v51 = vld [vmem:[%s5669_s9 + $0x14a8] sm:$0xff] }
 0x1b2   : > { %4747 = vmatpush3.msra.mxu1 %v980_v53  ;;  %4715 = vmatprep.subr.mxu0 %v962_v54  ;;  %v1061_v53 = vld [vmem:[%s5669_s9 + $0x15b0] sm:$0xff]  ;;  %v1012_v54 = vld [vmem:[%s5669_s9 + $0x1428] sm:$0xff] }
 0x1b3   : > { %4748 = vmatprep.subr.mxu1 %v995_v55  ;;  %4716 = vmatpush3.msra.mxu0 %v946_v56  ;;  %v1045_v55 = vld [vmem:[%s5669_s9 + $0x1530] sm:$0xff]  ;;  %v1027_v56 = vld [vmem:[%s5669_s9 + $0x14a0] sm:$0xff] }
 0x1b4   : > { %4749 = vmatpush3.msra.mxu1 %v979_v57  ;;  %4717 = vmatprep.subr.mxu0 %v961_v59  ;;  %v1060_v57 = vld [vmem:[%s5669_s9 + $0x15a8] sm:$0xff]  ;;  %v1011_v59 = vld [vmem:[%s5669_s9 + $0x1420] sm:$0xff] }
 0x1b5   : > { %4750 = vmatprep.subr.mxu1 %v994_v60  ;;  %4718 = vmatpush3.msra.mxu0 %v945_v62  ;;  %v1044_v60 = vld [vmem:[%s5669_s9 + $0x1528] sm:$0xff]  ;;  %v1059_v62 = vld [vmem:[%s5669_s9 + $0x15a0] sm:$0xff] }
 0x1b6   : > { %4751 = vmatpush3.msra.mxu1 %v978_v63  ;;  %4719 = vmatprep.subr.mxu0 %v960_v0  ;;  %v1010_v63 = vld [vmem:[%s5669_s9 + $0x1418] sm:$0xff]  ;;  %v1043_v0 = vld [vmem:[%s5669_s9 + $0x1520] sm:$0xff] }
 0x1b7   : > { %4752 = vmatprep.subr.mxu1 %v993_v1  ;;  %4720 = vmatpush3.msra.mxu0 %v944_v2  ;;  %v1496_v1 = vcombine.high %v362_v58, %v362_v58  ;;  %v1025_v2 = vld [vmem:[%s5669_s9 + $0x1490] sm:$0xff] }
 0x1b8   : > { %4753 = vmatpush3.msra.mxu1 %v977_v3  ;;  %4721 = vmatprep.subr.mxu0 %v959_v5  ;;  %v1058_v3 = vld [vmem:[%s5669_s9 + $0x1598] sm:$0xff]  ;;  %v1009_v5 = vld [vmem:[%s5669_s9 + $0x1410] sm:$0xff] }
 0x1b9   : > { %4754 = vmatprep.subr.mxu1 %v992_v6  ;;  %4722 = vmatpush3.msra.mxu0 %v943_v8  ;;  %v1042_v6 = vld [vmem:[%s5669_s9 + $0x1518] sm:$0xff]  ;;  %v1057_v8 = vld [vmem:[%s5669_s9 + $0x1590] sm:$0xff] }
 0x1ba   : > { %2963 = vmatprep.mubr.f32.mxu0 %v1494_v7  ;;  %4755 = vmatpush3.msra.mxu1 %v976_v9  ;;  %v1024_v7 = vld [vmem:[%s5669_s9 + $0x1488] sm:$0xff] }
 0x1bb   : > { %2964 = vmatmul.mubr.f32.vlgmr.msra.gmra.mxu0 %v1486_v61  ;;  %4756 = vmatprep.subr.mxu1 %v991_v10  ;;  %v1026_v61 = vld [vmem:[%s5669_s9 + $0x1498] sm:$0xff]  ;;  %v1008_v9 = vld [vmem:[%s5669_s9 + $0x1408] sm:$0xff]  ;;  %v1041_v10 = vld [vmem:[%s5669_s9 + $0x1510] sm:$0xff] }
 0x1bc   : > { %4761 = vmatprep.subr.mxu0 %v1038_v11  ;;  %4757 = vmatpush3.msra.mxu1 %v975_v13  ;;  %v1510_v11 = vrot.slane %v1496_v1, %v5737_v52  ;;  %v1056_v13 = vld [vmem:[%s5669_s9 + $0x1588] sm:$0xff]  ;;  %v363_v1 = vld [vmem:[%s5687_s22 + $0x58] sm:$0xff] }
 0x1bd   : > { %3033 = vmatprep.mubr.f32.mxu1 %v1495_v12  ;;  %4762 = vmatpush3.msra.mxu0 %v1022_v14  ;;  %v1023_v12 = vld [vmem:[%s5669_s9 + $0x1480] sm:$0xff] }
 0x1be   : > { %3034 = vmatmul.mubr.f32.vlgmr.msra.gmra.mxu1 %v1493_v4  ;;  %4763 = vmatprep.subr.mxu0 %v1037_v15  ;;  %v1503_v4 = vrot.slane %v362_v58, %v5737_v52  ;;  %v1007_v15 = vld [vmem:[%s5669_s9 + $0x1400] sm:$0xff]  ;;  %v1110_v58 = vld [vmem:[%s5669_s9 + $0x1738] sm:$0xff] }
 0x1bf   : > { %4796 = vmatprep.subr.mxu1 %v1070_v16  ;;  %4764 = vmatpush3.msra.mxu0 %v1021_v17  ;;  %v1040_v16 = vld [vmem:[%s5669_s9 + $0x1508] sm:$0xff]  ;;  %v1055_v17 = vld [vmem:[%s5669_s9 + $0x1580] sm:$0xff] }
 0x1c0   : > { %4797 = vmatpush3.msra.mxu1 %v1054_v18  ;;  %4765 = vmatprep.subr.mxu0 %v1036_v19  ;;  %v1511_v14 = vcombine.high %v1503_v4, %v1503_v4  ;;  %v1102_v18 = vld [vmem:[%s5669_s9 + $0x16f8] sm:$0xff]  ;;  %v1512_v19 = vcombine.high %v1510_v11, %v1510_v11 }
 0x1c1   : > { %4798 = vmatprep.subr.mxu1 %v1069_v20  ;;  %4766 = vmatpush3.msra.mxu0 %v1020_v21  ;;  %v1039_v20 = vld [vmem:[%s5669_s9 + $0x1500] sm:$0xff]  ;;  %v1086_v21 = vld [vmem:[%s5669_s9 + $0x1678] sm:$0xff] }
 0x1c2   : > { %4799 = vmatpush3.msra.mxu1 %v1053_v22  ;;  %4767 = vmatprep.subr.mxu0 %v1035_v23  ;;  %v1101_v22 = vld [vmem:[%s5669_s9 + $0x16f0] sm:$0xff]  ;;  %v1134_v23 = vld [vmem:[%s5669_s9 + $0x17f8] sm:$0xff] }
 0x1c3   : > { %4800 = vmatprep.subr.mxu1 %v1068_v24  ;;  %4768 = vmatpush3.msra.mxu0 %v1019_v25  ;;  %v1085_v24 = vld [vmem:[%s5669_s9 + $0x1670] sm:$0xff]  ;;  %v1118_v25 = vld [vmem:[%s5669_s9 + $0x1778] sm:$0xff] }
 0x1c4   : > { %4801 = vmatpush3.msra.mxu1 %v1052_v26  ;;  %4769 = vmatprep.subr.mxu0 %v1034_v27  ;;  %v1100_v26 = vld [vmem:[%s5669_s9 + $0x16e8] sm:$0xff]  ;;  %v1133_v27 = vld [vmem:[%s5669_s9 + $0x17f0] sm:$0xff] }
 0x1c5   : > { %4802 = vmatprep.subr.mxu1 %v1067_v28  ;;  %4770 = vmatpush3.msra.mxu0 %v1018_v29  ;;  %v1084_v28 = vld [vmem:[%s5669_s9 + $0x1668] sm:$0xff]  ;;  %v1117_v29 = vld [vmem:[%s5669_s9 + $0x1770] sm:$0xff] }
 0x1c6   : > { %4803 = vmatpush3.msra.mxu1 %v1051_v30  ;;  %4771 = vmatprep.subr.mxu0 %v1033_v31  ;;  %v1099_v30 = vld [vmem:[%s5669_s9 + $0x16e0] sm:$0xff]  ;;  %v1132_v31 = vld [vmem:[%s5669_s9 + $0x17e8] sm:$0xff] }
 0x1c7   : > { %4804 = vmatprep.subr.mxu1 %v1066_v32  ;;  %4772 = vmatpush3.msra.mxu0 %v1017_v33  ;;  %v1083_v32 = vld [vmem:[%s5669_s9 + $0x1660] sm:$0xff]  ;;  %v1116_v33 = vld [vmem:[%s5669_s9 + $0x1768] sm:$0xff] }
 0x1c8   : > { %4805 = vmatpush3.msra.mxu1 %v1050_v34  ;;  %4773 = vmatprep.subr.mxu0 %v1032_v35  ;;  %v1098_v34 = vld [vmem:[%s5669_s9 + $0x16d8] sm:$0xff]  ;;  %v1131_v35 = vld [vmem:[%s5669_s9 + $0x17e0] sm:$0xff] }
 0x1c9   : > { %4806 = vmatprep.subr.mxu1 %v1065_v36  ;;  %4774 = vmatpush3.msra.mxu0 %v1016_v37  ;;  %v1082_v36 = vld [vmem:[%s5669_s9 + $0x1658] sm:$0xff]  ;;  %v1115_v37 = vld [vmem:[%s5669_s9 + $0x1760] sm:$0xff] }
 0x1ca   : > { %4807 = vmatpush3.msra.mxu1 %v1049_v38  ;;  %4775 = vmatprep.subr.mxu0 %v1031_v39  ;;  %v1097_v38 = vld [vmem:[%s5669_s9 + $0x16d0] sm:$0xff]  ;;  %v1130_v39 = vld [vmem:[%s5669_s9 + $0x17d8] sm:$0xff] }
 0x1cb   : > { %4808 = vmatprep.subr.mxu1 %v1064_v40  ;;  %4776 = vmatpush3.msra.mxu0 %v1015_v41  ;;  %v1081_v40 = vld [vmem:[%s5669_s9 + $0x1650] sm:$0xff]  ;;  %v1114_v41 = vld [vmem:[%s5669_s9 + $0x1758] sm:$0xff] }
 0x1cc   : > { %4809 = vmatpush3.msra.mxu1 %v1048_v42  ;;  %4777 = vmatprep.subr.mxu0 %v1030_v43  ;;  %v1096_v42 = vld [vmem:[%s5669_s9 + $0x16c8] sm:$0xff]  ;;  %v1129_v43 = vld [vmem:[%s5669_s9 + $0x17d0] sm:$0xff] }
 0x1cd   : > { %4810 = vmatprep.subr.mxu1 %v1063_v44  ;;  %4778 = vmatpush3.msra.mxu0 %v1014_v45  ;;  %v1080_v44 = vld [vmem:[%s5669_s9 + $0x1648] sm:$0xff]  ;;  %v1113_v45 = vld [vmem:[%s5669_s9 + $0x1750] sm:$0xff] }
 0x1ce   : > { %4811 = vmatpush3.msra.mxu1 %v1047_v46  ;;  %4779 = vmatprep.subr.mxu0 %v1029_v47  ;;  %v1095_v46 = vld [vmem:[%s5669_s9 + $0x16c0] sm:$0xff]  ;;  %v1128_v47 = vld [vmem:[%s5669_s9 + $0x17c8] sm:$0xff] }
 0x1cf   : > { %4812 = vmatprep.subr.mxu1 %v1062_v48  ;;  %4780 = vmatpush3.msra.mxu0 %v1013_v49  ;;  %v1079_v48 = vld [vmem:[%s5669_s9 + $0x1640] sm:$0xff]  ;;  %v1112_v49 = vld [vmem:[%s5669_s9 + $0x1748] sm:$0xff] }
 0x1d0   : > { %4813 = vmatpush3.msra.mxu1 %v1046_v50  ;;  %4781 = vmatprep.subr.mxu0 %v1028_v51  ;;  %v1094_v50 = vld [vmem:[%s5669_s9 + $0x16b8] sm:$0xff]  ;;  %v1127_v51 = vld [vmem:[%s5669_s9 + $0x17c0] sm:$0xff] }
 0x1d1   : > { %4814 = vmatprep.subr.mxu1 %v1061_v53  ;;  %4782 = vmatpush3.msra.mxu0 %v1012_v54  ;;  %v1078_v53 = vld [vmem:[%s5669_s9 + $0x1638] sm:$0xff]  ;;  %v1111_v54 = vld [vmem:[%s5669_s9 + $0x1740] sm:$0xff] }
 0x1d2   : > { %4815 = vmatpush3.msra.mxu1 %v1045_v55  ;;  %4783 = vmatprep.subr.mxu0 %v1027_v56  ;;  %v1093_v55 = vld [vmem:[%s5669_s9 + $0x16b0] sm:$0xff]  ;;  %v1126_v56 = vld [vmem:[%s5669_s9 + $0x17b8] sm:$0xff] }
 0x1d3   : > { %4816 = vmatprep.subr.mxu1 %v1060_v57  ;;  %4784 = vmatpush3.msra.mxu0 %v1011_v59  ;;  %v1077_v57 = vld [vmem:[%s5669_s9 + $0x1630] sm:$0xff]  ;;  %v1092_v59 = vld [vmem:[%s5669_s9 + $0x16a8] sm:$0xff] }
 0x1d4   : > { %4817 = vmatpush3.msra.mxu1 %v1044_v60  ;;  %4785 = vmatprep.subr.mxu0 %v1026_v61  ;;  %v1125_v60 = vld [vmem:[%s5669_s9 + $0x17b0] sm:$0xff]  ;;  %v1076_v61 = vld [vmem:[%s5669_s9 + $0x1628] sm:$0xff] }
 0x1d5   : > { %4818 = vmatprep.subr.mxu1 %v1059_v62  ;;  %4786 = vmatpush3.msra.mxu0 %v1010_v63  ;;  %v1109_v62 = vld [vmem:[%s5669_s9 + $0x1730] sm:$0xff]  ;;  %v1091_v63 = vld [vmem:[%s5669_s9 + $0x16a0] sm:$0xff] }
 0x1d6   : > { %4819 = vmatpush3.msra.mxu1 %v1043_v0  ;;  %4787 = vmatprep.subr.mxu0 %v1025_v2  ;;  %v1124_v0 = vld [vmem:[%s5669_s9 + $0x17a8] sm:$0xff]  ;;  %v1075_v2 = vld [vmem:[%s5669_s9 + $0x1620] sm:$0xff] }
 0x1d7   : > { %4820 = vmatprep.subr.mxu1 %v1058_v3  ;;  %4788 = vmatpush3.msra.mxu0 %v1009_v5  ;;  %v1108_v3 = vld [vmem:[%s5669_s9 + $0x1728] sm:$0xff]  ;;  %v1123_v5 = vld [vmem:[%s5669_s9 + $0x17a0] sm:$0xff] }
 0x1d8   : > { %4821 = vmatpush3.msra.mxu1 %v1042_v6  ;;  %4789 = vmatprep.subr.mxu0 %v1024_v7  ;;  %v1074_v6 = vld [vmem:[%s5669_s9 + $0x1618] sm:$0xff]  ;;  %v1107_v7 = vld [vmem:[%s5669_s9 + $0x1720] sm:$0xff] }
 0x1d9   : > { %4822 = vmatprep.subr.mxu1 %v1057_v8  ;;  %4790 = vmatpush3.msra.mxu0 %v1008_v9  ;;  %v1513_v8 = vcombine.high %v363_v1, %v363_v1  ;;  %v1089_v9 = vld [vmem:[%s5669_s9 + $0x1690] sm:$0xff] }
 0x1da   : > { %4823 = vmatpush3.msra.mxu1 %v1041_v10  ;;  %4791 = vmatprep.subr.mxu0 %v1023_v12  ;;  %v1122_v10 = vld [vmem:[%s5669_s9 + $0x1798] sm:$0xff]  ;;  %v1073_v12 = vld [vmem:[%s5669_s9 + $0x1610] sm:$0xff] }
 0x1db   : > { %4824 = vmatprep.subr.mxu1 %v1056_v13  ;;  %4792 = vmatpush3.msra.mxu0 %v1007_v15  ;;  %v1106_v13 = vld [vmem:[%s5669_s9 + $0x1718] sm:$0xff]  ;;  %v1121_v15 = vld [vmem:[%s5669_s9 + $0x1790] sm:$0xff] }
 0x1dc   : > { %3103 = vmatprep.mubr.f32.mxu0 %v1511_v14  ;;  %4825 = vmatpush3.msra.mxu1 %v1040_v16  ;;  %v1088_v14 = vld [vmem:[%s5669_s9 + $0x1688] sm:$0xff] }
 0x1dd   : > { %3104 = vmatmul.mubr.f32.vlgmr.msra.gmra.mxu0 %v1503_v4  ;;  %4826 = vmatprep.subr.mxu1 %v1055_v17  ;;  %v1090_v4 = vld [vmem:[%s5669_s9 + $0x1698] sm:$0xff]  ;;  %v1072_v16 = vld [vmem:[%s5669_s9 + $0x1608] sm:$0xff]  ;;  %v1105_v17 = vld [vmem:[%s5669_s9 + $0x1710] sm:$0xff] }
 0x1de   : > { %4831 = vmatprep.subr.mxu0 %v1102_v18  ;;  %4827 = vmatpush3.msra.mxu1 %v1039_v20  ;;  %v1527_v18 = vrot.slane %v1513_v8, %v5737_v52  ;;  %v1120_v20 = vld [vmem:[%s5669_s9 + $0x1788] sm:$0xff]  ;;  %v364_v8 = vld [vmem:[%s5687_s22 + $0x60] sm:$0xff] }
 0x1df   : > { %3173 = vmatprep.mubr.f32.mxu1 %v1512_v19  ;;  %4832 = vmatpush3.msra.mxu0 %v1086_v21  ;;  %v1087_v19 = vld [vmem:[%s5669_s9 + $0x1680] sm:$0xff] }
 0x1e0   : > { %3174 = vmatmul.mubr.f32.vlgmr.msra.gmra.mxu1 %v1510_v11  ;;  %4833 = vmatprep.subr.mxu0 %v1101_v22  ;;  %v1520_v11 = vrot.slane %v363_v1, %v5737_v52  ;;  %v1071_v22 = vld [vmem:[%s5669_s9 + $0x1600] sm:$0xff]  ;;  %v1174_v1 = vld [vmem:[%s5669_s9 + $0x1938] sm:$0xff] }
 0x1e1   : > { %4866 = vmatprep.subr.mxu1 %v1134_v23  ;;  %4834 = vmatpush3.msra.mxu0 %v1085_v24  ;;  %v1104_v23 = vld [vmem:[%s5669_s9 + $0x1708] sm:$0xff]  ;;  %v1119_v24 = vld [vmem:[%s5669_s9 + $0x1780] sm:$0xff] }
 0x1e2   : > { %4867 = vmatpush3.msra.mxu1 %v1118_v25  ;;  %4835 = vmatprep.subr.mxu0 %v1100_v26  ;;  %v1528_v21 = vcombine.high %v1520_v11, %v1520_v11  ;;  %v1166_v25 = vld [vmem:[%s5669_s9 + $0x18f8] sm:$0xff]  ;;  %v1529_v26 = vcombine.high %v1527_v18, %v1527_v18 }
 0x1e3   : > { %4868 = vmatprep.subr.mxu1 %v1133_v27  ;;  %4836 = vmatpush3.msra.mxu0 %v1084_v28  ;;  %v1103_v27 = vld [vmem:[%s5669_s9 + $0x1700] sm:$0xff]  ;;  %v1150_v28 = vld [vmem:[%s5669_s9 + $0x1878] sm:$0xff] }
 0x1e4   : > { %4869 = vmatpush3.msra.mxu1 %v1117_v29  ;;  %4837 = vmatprep.subr.mxu0 %v1099_v30  ;;  %v1165_v29 = vld [vmem:[%s5669_s9 + $0x18f0] sm:$0xff]  ;;  %v1198_v30 = vld [vmem:[%s5669_s9 + $0x19f8] sm:$0xff] }
 0x1e5   : > { %4870 = vmatprep.subr.mxu1 %v1132_v31  ;;  %4838 = vmatpush3.msra.mxu0 %v1083_v32  ;;  %v1149_v31 = vld [vmem:[%s5669_s9 + $0x1870] sm:$0xff]  ;;  %v1182_v32 = vld [vmem:[%s5669_s9 + $0x1978] sm:$0xff] }
 0x1e6   : > { %4871 = vmatpush3.msra.mxu1 %v1116_v33  ;;  %4839 = vmatprep.subr.mxu0 %v1098_v34  ;;  %v1164_v33 = vld [vmem:[%s5669_s9 + $0x18e8] sm:$0xff]  ;;  %v1197_v34 = vld [vmem:[%s5669_s9 + $0x19f0] sm:$0xff] }
 0x1e7   : > { %4872 = vmatprep.subr.mxu1 %v1131_v35  ;;  %4840 = vmatpush3.msra.mxu0 %v1082_v36  ;;  %v1148_v35 = vld [vmem:[%s5669_s9 + $0x1868] sm:$0xff]  ;;  %v1181_v36 = vld [vmem:[%s5669_s9 + $0x1970] sm:$0xff] }
 0x1e8   : > { %4873 = vmatpush3.msra.mxu1 %v1115_v37  ;;  %4841 = vmatprep.subr.mxu0 %v1097_v38  ;;  %v1163_v37 = vld [vmem:[%s5669_s9 + $0x18e0] sm:$0xff]  ;;  %v1196_v38 = vld [vmem:[%s5669_s9 + $0x19e8] sm:$0xff] }
 0x1e9   : > { %4874 = vmatprep.subr.mxu1 %v1130_v39  ;;  %4842 = vmatpush3.msra.mxu0 %v1081_v40  ;;  %v1147_v39 = vld [vmem:[%s5669_s9 + $0x1860] sm:$0xff]  ;;  %v1180_v40 = vld [vmem:[%s5669_s9 + $0x1968] sm:$0xff] }
 0x1ea   : > { %4875 = vmatpush3.msra.mxu1 %v1114_v41  ;;  %4843 = vmatprep.subr.mxu0 %v1096_v42  ;;  %v1162_v41 = vld [vmem:[%s5669_s9 + $0x18d8] sm:$0xff]  ;;  %v1195_v42 = vld [vmem:[%s5669_s9 + $0x19e0] sm:$0xff] }
 0x1eb   : > { %4876 = vmatprep.subr.mxu1 %v1129_v43  ;;  %4844 = vmatpush3.msra.mxu0 %v1080_v44  ;;  %v1146_v43 = vld [vmem:[%s5669_s9 + $0x1858] sm:$0xff]  ;;  %v1179_v44 = vld [vmem:[%s5669_s9 + $0x1960] sm:$0xff] }
 0x1ec   : > { %4877 = vmatpush3.msra.mxu1 %v1113_v45  ;;  %4845 = vmatprep.subr.mxu0 %v1095_v46  ;;  %v1161_v45 = vld [vmem:[%s5669_s9 + $0x18d0] sm:$0xff]  ;;  %v1194_v46 = vld [vmem:[%s5669_s9 + $0x19d8] sm:$0xff] }
 0x1ed   : > { %4878 = vmatprep.subr.mxu1 %v1128_v47  ;;  %4846 = vmatpush3.msra.mxu0 %v1079_v48  ;;  %v1145_v47 = vld [vmem:[%s5669_s9 + $0x1850] sm:$0xff]  ;;  %v1178_v48 = vld [vmem:[%s5669_s9 + $0x1958] sm:$0xff] }
 0x1ee   : > { %4879 = vmatpush3.msra.mxu1 %v1112_v49  ;;  %4847 = vmatprep.subr.mxu0 %v1094_v50  ;;  %v1160_v49 = vld [vmem:[%s5669_s9 + $0x18c8] sm:$0xff]  ;;  %v1193_v50 = vld [vmem:[%s5669_s9 + $0x19d0] sm:$0xff] }
 0x1ef   : > { %4880 = vmatprep.subr.mxu1 %v1127_v51  ;;  %4848 = vmatpush3.msra.mxu0 %v1078_v53  ;;  %v1144_v51 = vld [vmem:[%s5669_s9 + $0x1848] sm:$0xff]  ;;  %v1177_v53 = vld [vmem:[%s5669_s9 + $0x1950] sm:$0xff] }
 0x1f0   : > { %4881 = vmatpush3.msra.mxu1 %v1111_v54  ;;  %4849 = vmatprep.subr.mxu0 %v1093_v55  ;;  %v1159_v54 = vld [vmem:[%s5669_s9 + $0x18c0] sm:$0xff]  ;;  %v1192_v55 = vld [vmem:[%s5669_s9 + $0x19c8] sm:$0xff] }
 0x1f1   : > { %4882 = vmatprep.subr.mxu1 %v1126_v56  ;;  %4850 = vmatpush3.msra.mxu0 %v1077_v57  ;;  %v1143_v56 = vld [vmem:[%s5669_s9 + $0x1840] sm:$0xff]  ;;  %v1176_v57 = vld [vmem:[%s5669_s9 + $0x1948] sm:$0xff] }
 0x1f2   : > { %4883 = vmatpush3.msra.mxu1 %v1110_v58  ;;  %4851 = vmatprep.subr.mxu0 %v1092_v59  ;;  %v1158_v58 = vld [vmem:[%s5669_s9 + $0x18b8] sm:$0xff]  ;;  %v1191_v59 = vld [vmem:[%s5669_s9 + $0x19c0] sm:$0xff] }
 0x1f3   : > { %4884 = vmatprep.subr.mxu1 %v1125_v60  ;;  %4852 = vmatpush3.msra.mxu0 %v1076_v61  ;;  %v1142_v60 = vld [vmem:[%s5669_s9 + $0x1838] sm:$0xff]  ;;  %v1175_v61 = vld [vmem:[%s5669_s9 + $0x1940] sm:$0xff] }
 0x1f4   : > { %4885 = vmatpush3.msra.mxu1 %v1109_v62  ;;  %4853 = vmatprep.subr.mxu0 %v1091_v63  ;;  %v1157_v62 = vld [vmem:[%s5669_s9 + $0x18b0] sm:$0xff]  ;;  %v1190_v63 = vld [vmem:[%s5669_s9 + $0x19b8] sm:$0xff] }
 0x1f5   : > { %4886 = vmatprep.subr.mxu1 %v1124_v0  ;;  %4854 = vmatpush3.msra.mxu0 %v1075_v2  ;;  %v1141_v0 = vld [vmem:[%s5669_s9 + $0x1830] sm:$0xff]  ;;  %v1156_v2 = vld [vmem:[%s5669_s9 + $0x18a8] sm:$0xff] }
 0x1f6   : > { %4887 = vmatpush3.msra.mxu1 %v1108_v3  ;;  %4855 = vmatprep.subr.mxu0 %v1090_v4  ;;  %v1189_v3 = vld [vmem:[%s5669_s9 + $0x19b0] sm:$0xff]  ;;  %v1140_v4 = vld [vmem:[%s5669_s9 + $0x1828] sm:$0xff] }
 0x1f7   : > { %4888 = vmatprep.subr.mxu1 %v1123_v5  ;;  %4856 = vmatpush3.msra.mxu0 %v1074_v6  ;;  %v1173_v5 = vld [vmem:[%s5669_s9 + $0x1930] sm:$0xff]  ;;  %v1155_v6 = vld [vmem:[%s5669_s9 + $0x18a0] sm:$0xff] }
 0x1f8   : > { %4889 = vmatpush3.msra.mxu1 %v1107_v7  ;;  %4857 = vmatprep.subr.mxu0 %v1089_v9  ;;  %v1188_v7 = vld [vmem:[%s5669_s9 + $0x19a8] sm:$0xff]  ;;  %v1139_v9 = vld [vmem:[%s5669_s9 + $0x1820] sm:$0xff] }
 0x1f9   : > { %4890 = vmatprep.subr.mxu1 %v1122_v10  ;;  %4858 = vmatpush3.msra.mxu0 %v1073_v12  ;;  %v1172_v10 = vld [vmem:[%s5669_s9 + $0x1928] sm:$0xff]  ;;  %v1187_v12 = vld [vmem:[%s5669_s9 + $0x19a0] sm:$0xff] }
 0x1fa   : > { %4891 = vmatpush3.msra.mxu1 %v1106_v13  ;;  %4859 = vmatprep.subr.mxu0 %v1088_v14  ;;  %v1138_v13 = vld [vmem:[%s5669_s9 + $0x1818] sm:$0xff]  ;;  %v1171_v14 = vld [vmem:[%s5669_s9 + $0x1920] sm:$0xff] }
 0x1fb   : > { %4892 = vmatprep.subr.mxu1 %v1121_v15  ;;  %4860 = vmatpush3.msra.mxu0 %v1072_v16  ;;  %v1530_v15 = vcombine.high %v364_v8, %v364_v8  ;;  %v1153_v16 = vld [vmem:[%s5669_s9 + $0x1890] sm:$0xff] }
 0x1fc   : > { %4893 = vmatpush3.msra.mxu1 %v1105_v17  ;;  %4861 = vmatprep.subr.mxu0 %v1087_v19  ;;  %v1186_v17 = vld [vmem:[%s5669_s9 + $0x1998] sm:$0xff]  ;;  %v1137_v19 = vld [vmem:[%s5669_s9 + $0x1810] sm:$0xff] }
 0x1fd   : > { %4894 = vmatprep.subr.mxu1 %v1120_v20  ;;  %4862 = vmatpush3.msra.mxu0 %v1071_v22  ;;  %v1170_v20 = vld [vmem:[%s5669_s9 + $0x1918] sm:$0xff]  ;;  %v1185_v22 = vld [vmem:[%s5669_s9 + $0x1990] sm:$0xff] }
 0x1fe   : > { %3243 = vmatprep.mubr.f32.mxu0 %v1528_v21  ;;  %4895 = vmatpush3.msra.mxu1 %v1104_v23  ;;  %v1152_v21 = vld [vmem:[%s5669_s9 + $0x1888] sm:$0xff] }
 0x1ff   : > { %3244 = vmatmul.mubr.f32.vlgmr.msra.gmra.mxu0 %v1520_v11  ;;  %4896 = vmatprep.subr.mxu1 %v1119_v24  ;;  %v1154_v11 = vld [vmem:[%s5669_s9 + $0x1898] sm:$0xff]  ;;  %v1136_v23 = vld [vmem:[%s5669_s9 + $0x1808] sm:$0xff]  ;;  %v1169_v24 = vld [vmem:[%s5669_s9 + $0x1910] sm:$0xff] }
 0x200   : > { %4901 = vmatprep.subr.mxu0 %v1166_v25  ;;  %4897 = vmatpush3.msra.mxu1 %v1103_v27  ;;  %v1544_v25 = vrot.slane %v1530_v15, %v5737_v52  ;;  %v1184_v27 = vld [vmem:[%s5669_s9 + $0x1988] sm:$0xff] }
 0x201   : > { %3313 = vmatprep.mubr.f32.mxu1 %v1529_v26  ;;  %4902 = vmatpush3.msra.mxu0 %v1150_v28  ;;  %v1151_v26 = vld [vmem:[%s5669_s9 + $0x1880] sm:$0xff] }
 0x202   : > { %3314 = vmatmul.mubr.f32.vlgmr.msra.gmra.mxu1 %v1527_v18  ;;  %4903 = vmatprep.subr.mxu0 %v1165_v29  ;;  %v1537_v18 = vrot.slane %v364_v8, %v5737_v52  ;;  %v1135_v29 = vld [vmem:[%s5669_s9 + $0x1800] sm:$0xff]  ;;  %v1238_v8 = vld [vmem:[%s5669_s9 + $0x1b38] sm:$0xff] }
 0x203   : > { %4936 = vmatprep.subr.mxu1 %v1198_v30  ;;  %4904 = vmatpush3.msra.mxu0 %v1149_v31  ;;  %v1168_v30 = vld [vmem:[%s5669_s9 + $0x1908] sm:$0xff]  ;;  %v1183_v31 = vld [vmem:[%s5669_s9 + $0x1980] sm:$0xff] }
 0x204   : > { %4937 = vmatpush3.msra.mxu1 %v1182_v32  ;;  %4905 = vmatprep.subr.mxu0 %v1164_v33  ;;  %v1545_v28 = vcombine.high %v1537_v18, %v1537_v18  ;;  %v1230_v32 = vld [vmem:[%s5669_s9 + $0x1af8] sm:$0xff]  ;;  %v1546_v33 = vcombine.high %v1544_v25, %v1544_v25  ;;  %v365_v15 = vld [vmem:[%s5687_s22 + $0x68] sm:$0xff] }
 0x205   : > { %4938 = vmatprep.subr.mxu1 %v1197_v34  ;;  %4906 = vmatpush3.msra.mxu0 %v1148_v35  ;;  %v1167_v34 = vld [vmem:[%s5669_s9 + $0x1900] sm:$0xff]  ;;  %v1214_v35 = vld [vmem:[%s5669_s9 + $0x1a78] sm:$0xff] }
 0x206   : > { %4939 = vmatpush3.msra.mxu1 %v1181_v36  ;;  %4907 = vmatprep.subr.mxu0 %v1163_v37  ;;  %v1229_v36 = vld [vmem:[%s5669_s9 + $0x1af0] sm:$0xff]  ;;  %v1262_v37 = vld [vmem:[%s5669_s9 + $0x1bf8] sm:$0xff] }
 0x207   : > { %4940 = vmatprep.subr.mxu1 %v1196_v38  ;;  %4908 = vmatpush3.msra.mxu0 %v1147_v39  ;;  %v1213_v38 = vld [vmem:[%s5669_s9 + $0x1a70] sm:$0xff]  ;;  %v1246_v39 = vld [vmem:[%s5669_s9 + $0x1b78] sm:$0xff] }
 0x208   : > { %4941 = vmatpush3.msra.mxu1 %v1180_v40  ;;  %4909 = vmatprep.subr.mxu0 %v1162_v41  ;;  %v1228_v40 = vld [vmem:[%s5669_s9 + $0x1ae8] sm:$0xff]  ;;  %v1261_v41 = vld [vmem:[%s5669_s9 + $0x1bf0] sm:$0xff] }
 0x209   : > { %4942 = vmatprep.subr.mxu1 %v1195_v42  ;;  %4910 = vmatpush3.msra.mxu0 %v1146_v43  ;;  %v1212_v42 = vld [vmem:[%s5669_s9 + $0x1a68] sm:$0xff]  ;;  %v1245_v43 = vld [vmem:[%s5669_s9 + $0x1b70] sm:$0xff] }
 0x20a   : > { %4943 = vmatpush3.msra.mxu1 %v1179_v44  ;;  %4911 = vmatprep.subr.mxu0 %v1161_v45  ;;  %v1227_v44 = vld [vmem:[%s5669_s9 + $0x1ae0] sm:$0xff]  ;;  %v1260_v45 = vld [vmem:[%s5669_s9 + $0x1be8] sm:$0xff] }
 0x20b   : > { %4944 = vmatprep.subr.mxu1 %v1194_v46  ;;  %4912 = vmatpush3.msra.mxu0 %v1145_v47  ;;  %v1211_v46 = vld [vmem:[%s5669_s9 + $0x1a60] sm:$0xff]  ;;  %v1244_v47 = vld [vmem:[%s5669_s9 + $0x1b68] sm:$0xff] }
 0x20c   : > { %4945 = vmatpush3.msra.mxu1 %v1178_v48  ;;  %4913 = vmatprep.subr.mxu0 %v1160_v49  ;;  %v1226_v48 = vld [vmem:[%s5669_s9 + $0x1ad8] sm:$0xff]  ;;  %v1259_v49 = vld [vmem:[%s5669_s9 + $0x1be0] sm:$0xff] }
 0x20d   : > { %4946 = vmatprep.subr.mxu1 %v1193_v50  ;;  %4914 = vmatpush3.msra.mxu0 %v1144_v51  ;;  %v1210_v50 = vld [vmem:[%s5669_s9 + $0x1a58] sm:$0xff]  ;;  %v1243_v51 = vld [vmem:[%s5669_s9 + $0x1b60] sm:$0xff] }
 0x20e   : > { %4947 = vmatpush3.msra.mxu1 %v1177_v53  ;;  %4915 = vmatprep.subr.mxu0 %v1159_v54  ;;  %v1225_v53 = vld [vmem:[%s5669_s9 + $0x1ad0] sm:$0xff]  ;;  %v1258_v54 = vld [vmem:[%s5669_s9 + $0x1bd8] sm:$0xff] }
 0x20f   : > { %4948 = vmatprep.subr.mxu1 %v1192_v55  ;;  %4916 = vmatpush3.msra.mxu0 %v1143_v56  ;;  %v1209_v55 = vld [vmem:[%s5669_s9 + $0x1a50] sm:$0xff]  ;;  %v1242_v56 = vld [vmem:[%s5669_s9 + $0x1b58] sm:$0xff] }
 0x210   : > { %4949 = vmatpush3.msra.mxu1 %v1176_v57  ;;  %4917 = vmatprep.subr.mxu0 %v1158_v58  ;;  %v1224_v57 = vld [vmem:[%s5669_s9 + $0x1ac8] sm:$0xff]  ;;  %v1257_v58 = vld [vmem:[%s5669_s9 + $0x1bd0] sm:$0xff] }
 0x211   : > { %4950 = vmatprep.subr.mxu1 %v1191_v59  ;;  %4918 = vmatpush3.msra.mxu0 %v1142_v60  ;;  %v1208_v59 = vld [vmem:[%s5669_s9 + $0x1a48] sm:$0xff]  ;;  %v1241_v60 = vld [vmem:[%s5669_s9 + $0x1b50] sm:$0xff] }
 0x212   : > { %4951 = vmatpush3.msra.mxu1 %v1175_v61  ;;  %4919 = vmatprep.subr.mxu0 %v1157_v62  ;;  %v1223_v61 = vld [vmem:[%s5669_s9 + $0x1ac0] sm:$0xff]  ;;  %v1256_v62 = vld [vmem:[%s5669_s9 + $0x1bc8] sm:$0xff] }
 0x213   : > { %4952 = vmatprep.subr.mxu1 %v1190_v63  ;;  %4920 = vmatpush3.msra.mxu0 %v1141_v0  ;;  %v1207_v63 = vld [vmem:[%s5669_s9 + $0x1a40] sm:$0xff]  ;;  %v1240_v0 = vld [vmem:[%s5669_s9 + $0x1b48] sm:$0xff] }
 0x214   : > { %4953 = vmatpush3.msra.mxu1 %v1174_v1  ;;  %4921 = vmatprep.subr.mxu0 %v1156_v2  ;;  %v1222_v1 = vld [vmem:[%s5669_s9 + $0x1ab8] sm:$0xff]  ;;  %v1255_v2 = vld [vmem:[%s5669_s9 + $0x1bc0] sm:$0xff] }
 0x215   : > { %4954 = vmatprep.subr.mxu1 %v1189_v3  ;;  %4922 = vmatpush3.msra.mxu0 %v1140_v4  ;;  %v1206_v3 = vld [vmem:[%s5669_s9 + $0x1a38] sm:$0xff]  ;;  %v1239_v4 = vld [vmem:[%s5669_s9 + $0x1b40] sm:$0xff] }
 0x216   : > { %4955 = vmatpush3.msra.mxu1 %v1173_v5  ;;  %4923 = vmatprep.subr.mxu0 %v1155_v6  ;;  %v1221_v5 = vld [vmem:[%s5669_s9 + $0x1ab0] sm:$0xff]  ;;  %v1254_v6 = vld [vmem:[%s5669_s9 + $0x1bb8] sm:$0xff] }
 0x217   : > { %4956 = vmatprep.subr.mxu1 %v1188_v7  ;;  %4924 = vmatpush3.msra.mxu0 %v1139_v9  ;;  %v1205_v7 = vld [vmem:[%s5669_s9 + $0x1a30] sm:$0xff]  ;;  %v1220_v9 = vld [vmem:[%s5669_s9 + $0x1aa8] sm:$0xff] }
 0x218   : > { %4957 = vmatpush3.msra.mxu1 %v1172_v10  ;;  %4925 = vmatprep.subr.mxu0 %v1154_v11  ;;  %v1253_v10 = vld [vmem:[%s5669_s9 + $0x1bb0] sm:$0xff]  ;;  %v1204_v11 = vld [vmem:[%s5669_s9 + $0x1a28] sm:$0xff] }
 0x219   : > { %4958 = vmatprep.subr.mxu1 %v1187_v12  ;;  %4926 = vmatpush3.msra.mxu0 %v1138_v13  ;;  %v1237_v12 = vld [vmem:[%s5669_s9 + $0x1b30] sm:$0xff]  ;;  %v1219_v13 = vld [vmem:[%s5669_s9 + $0x1aa0] sm:$0xff] }
 0x21a   : > { %4959 = vmatpush3.msra.mxu1 %v1171_v14  ;;  %4927 = vmatprep.subr.mxu0 %v1153_v16  ;;  %v1252_v14 = vld [vmem:[%s5669_s9 + $0x1ba8] sm:$0xff]  ;;  %v1203_v16 = vld [vmem:[%s5669_s9 + $0x1a20] sm:$0xff] }
 0x21b   : > { %4960 = vmatprep.subr.mxu1 %v1186_v17  ;;  %4928 = vmatpush3.msra.mxu0 %v1137_v19  ;;  %v1236_v17 = vld [vmem:[%s5669_s9 + $0x1b28] sm:$0xff]  ;;  %v1251_v19 = vld [vmem:[%s5669_s9 + $0x1ba0] sm:$0xff] }
 0x21c   : > { %4961 = vmatpush3.msra.mxu1 %v1170_v20  ;;  %4929 = vmatprep.subr.mxu0 %v1152_v21  ;;  %v1202_v20 = vld [vmem:[%s5669_s9 + $0x1a18] sm:$0xff]  ;;  %v1235_v21 = vld [vmem:[%s5669_s9 + $0x1b20] sm:$0xff] }
 0x21d   : > { %4962 = vmatprep.subr.mxu1 %v1185_v22  ;;  %4930 = vmatpush3.msra.mxu0 %v1136_v23  ;;  %v1547_v22 = vcombine.high %v365_v15, %v365_v15  ;;  %v1217_v23 = vld [vmem:[%s5669_s9 + $0x1a90] sm:$0xff] }
 0x21e   : > { %4963 = vmatpush3.msra.mxu1 %v1169_v24  ;;  %4931 = vmatprep.subr.mxu0 %v1151_v26  ;;  %v1250_v24 = vld [vmem:[%s5669_s9 + $0x1b98] sm:$0xff]  ;;  %v1201_v26 = vld [vmem:[%s5669_s9 + $0x1a10] sm:$0xff] }
 0x21f   : > { %4964 = vmatprep.subr.mxu1 %v1184_v27  ;;  %4932 = vmatpush3.msra.mxu0 %v1135_v29  ;;  %v1234_v27 = vld [vmem:[%s5669_s9 + $0x1b18] sm:$0xff]  ;;  %v1249_v29 = vld [vmem:[%s5669_s9 + $0x1b90] sm:$0xff] }
 0x220   : > { %3383 = vmatprep.mubr.f32.mxu0 %v1545_v28  ;;  %4965 = vmatpush3.msra.mxu1 %v1168_v30  ;;  %v1216_v28 = vld [vmem:[%s5669_s9 + $0x1a88] sm:$0xff] }
 0x221   : > { %3384 = vmatmul.mubr.f32.vlgmr.msra.gmra.mxu0 %v1537_v18  ;;  %4966 = vmatprep.subr.mxu1 %v1183_v31  ;;  %v1218_v18 = vld [vmem:[%s5669_s9 + $0x1a98] sm:$0xff]  ;;  %v1200_v30 = vld [vmem:[%s5669_s9 + $0x1a08] sm:$0xff]  ;;  %v1233_v31 = vld [vmem:[%s5669_s9 + $0x1b10] sm:$0xff] }
 0x222   : > { %4971 = vmatprep.subr.mxu0 %v1230_v32  ;;  %4967 = vmatpush3.msra.mxu1 %v1167_v34  ;;  %v1561_v32 = vrot.slane %v1547_v22, %v5737_v52  ;;  %v1248_v34 = vld [vmem:[%s5669_s9 + $0x1b88] sm:$0xff] }
 0x223   : > { %3453 = vmatprep.mubr.f32.mxu1 %v1546_v33  ;;  %4972 = vmatpush3.msra.mxu0 %v1214_v35  ;;  %v1215_v33 = vld [vmem:[%s5669_s9 + $0x1a80] sm:$0xff]  ;;  %v1280_v22 = vld [vmem:[%s5669_s9 + $0x1c88] sm:$0xff] }
 0x224   : > { %3454 = vmatmul.mubr.f32.vlgmr.msra.gmra.mxu1 %v1544_v25  ;;  %4973 = vmatprep.subr.mxu0 %v1229_v36  ;;  %v1554_v25 = vrot.slane %v365_v15, %v5737_v52  ;;  %v1199_v36 = vld [vmem:[%s5669_s9 + $0x1a00] sm:$0xff]  ;;  %v1282_v15 = vld [vmem:[%s5669_s9 + $0x1c98] sm:$0xff] }
 0x225   : > { %5006 = vmatprep.subr.mxu1 %v1262_v37  ;;  %4974 = vmatpush3.msra.mxu0 %v1213_v38  ;;  %v1232_v37 = vld [vmem:[%s5669_s9 + $0x1b08] sm:$0xff]  ;;  %v1247_v38 = vld [vmem:[%s5669_s9 + $0x1b80] sm:$0xff] }
 0x226   : > { %5007 = vmatpush3.msra.mxu1 %v1246_v39  ;;  %4975 = vmatprep.subr.mxu0 %v1228_v40  ;;  %v1562_v35 = vcombine.high %v1554_v25, %v1554_v25  ;;  %v1294_v39 = vld [vmem:[%s5669_s9 + $0x1cf8] sm:$0xff]  ;;  %v1563_v40 = vcombine.high %v1561_v32, %v1561_v32 }
 0x227   : > { %5008 = vmatprep.subr.mxu1 %v1261_v41  ;;  %4976 = vmatpush3.msra.mxu0 %v1212_v42  ;;  %v1231_v41 = vld [vmem:[%s5669_s9 + $0x1b00] sm:$0xff]  ;;  %v1278_v42 = vld [vmem:[%s5669_s9 + $0x1c78] sm:$0xff] }
 0x228   : > { %5009 = vmatpush3.msra.mxu1 %v1245_v43  ;;  %4977 = vmatprep.subr.mxu0 %v1227_v44  ;;  %v1293_v43 = vld [vmem:[%s5669_s9 + $0x1cf0] sm:$0xff] }
 0x229   : > { %5010 = vmatprep.subr.mxu1 %v1260_v45  ;;  %4978 = vmatpush3.msra.mxu0 %v1211_v46  ;;  %v1277_v44 = vld [vmem:[%s5669_s9 + $0x1c70] sm:$0xff]  ;;  %v1310_v45 = vld [vmem:[%s5669_s9 + $0x1d78] sm:$0xff]  ;;  %v1292_v46 = vld [vmem:[%s5669_s9 + $0x1ce8] sm:$0xff] }
 0x22a   : > { %5011 = vmatpush3.msra.mxu1 %v1244_v47  ;;  %4979 = vmatprep.subr.mxu0 %v1226_v48  ;;  %v5496_v47 = vmov 0.0   ;;  %v1276_v48 = vld [vmem:[%s5669_s9 + $0x1c68] sm:$0xff] }
 0x22b   : > { %5012 = vmatprep.subr.mxu1 %v1259_v49  ;;  %4980 = vmatpush3.msra.mxu0 %v1210_v50  ;;  %v1309_v49 = vld [vmem:[%s5669_s9 + $0x1d70] sm:$0xff]  ;;  %v1291_v50 = vld [vmem:[%s5669_s9 + $0x1ce0] sm:$0xff] }
 0x22c   : > { %5013 = vmatpush3.msra.mxu1 %v1243_v51  ;;  %4981 = vmatprep.subr.mxu0 %v1225_v53  ;;  %v1275_v51 = vld [vmem:[%s5669_s9 + $0x1c60] sm:$0xff]  ;;  %v1308_v53 = vld [vmem:[%s5669_s9 + $0x1d68] sm:$0xff] }
 0x22d   : > { %5014 = vmatprep.subr.mxu1 %v1258_v54  ;;  %4982 = vmatpush3.msra.mxu0 %v1209_v55  ;;  %v1290_v54 = vld [vmem:[%s5669_s9 + $0x1cd8] sm:$0xff] }
 0x22e   : > { %5015 = vmatpush3.msra.mxu1 %v1242_v56  ;;  %4983 = vmatprep.subr.mxu0 %v1224_v57  ;;  %v1274_v55 = vld [vmem:[%s5669_s9 + $0x1c58] sm:$0xff]  ;;  %v1307_v56 = vld [vmem:[%s5669_s9 + $0x1d60] sm:$0xff]  ;;  %v1289_v57 = vld [vmem:[%s5669_s9 + $0x1cd0] sm:$0xff] }
 0x22f   : > { %5016 = vmatprep.subr.mxu1 %v1257_v58  ;;  %4984 = vmatpush3.msra.mxu0 %v1208_v59  ;;  %v1273_v58 = vld [vmem:[%s5669_s9 + $0x1c50] sm:$0xff]  ;;  %v1306_v59 = vld [vmem:[%s5669_s9 + $0x1d58] sm:$0xff] }
 0x230   : > { %5017 = vmatpush3.msra.mxu1 %v1241_v60  ;;  %4985 = vmatprep.subr.mxu0 %v1223_v61  ;;  %v1288_v60 = vld [vmem:[%s5669_s9 + $0x1cc8] sm:$0xff] }
 0x231   : > { %5018 = vmatprep.subr.mxu1 %v1256_v62  ;;  %4986 = vmatpush3.msra.mxu0 %v1207_v63  ;;  %v1272_v61 = vld [vmem:[%s5669_s9 + $0x1c48] sm:$0xff]  ;;  %v1305_v62 = vld [vmem:[%s5669_s9 + $0x1d50] sm:$0xff]  ;;  %v1287_v63 = vld [vmem:[%s5669_s9 + $0x1cc0] sm:$0xff] }
 0x232   : > { %5019 = vmatpush3.msra.mxu1 %v1240_v0  ;;  %4987 = vmatprep.subr.mxu0 %v1222_v1  ;;  %v1271_v0 = vld [vmem:[%s5669_s9 + $0x1c40] sm:$0xff]  ;;  %v1304_v1 = vld [vmem:[%s5669_s9 + $0x1d48] sm:$0xff] }
 0x233   : > { %5020 = vmatprep.subr.mxu1 %v1255_v2  ;;  %4988 = vmatpush3.msra.mxu0 %v1206_v3  ;;  %v1286_v2 = vld [vmem:[%s5669_s9 + $0x1cb8] sm:$0xff] }
 0x234   : > { %5021 = vmatpush3.msra.mxu1 %v1239_v4  ;;  %4989 = vmatprep.subr.mxu0 %v1221_v5  ;;  %v1270_v3 = vld [vmem:[%s5669_s9 + $0x1c38] sm:$0xff]  ;;  %v1303_v4 = vld [vmem:[%s5669_s9 + $0x1d40] sm:$0xff]  ;;  %v1285_v5 = vld [vmem:[%s5669_s9 + $0x1cb0] sm:$0xff] }
 0x235   : > { %5022 = vmatprep.subr.mxu1 %v1254_v6  ;;  %4990 = vmatpush3.msra.mxu0 %v1205_v7  ;;  %v1269_v6 = vld [vmem:[%s5669_s9 + $0x1c30] sm:$0xff]  ;;  %v1302_v7 = vld [vmem:[%s5669_s9 + $0x1d38] sm:$0xff] }
 0x236   : > { %5023 = vmatpush3.msra.mxu1 %v1238_v8  ;;  %4991 = vmatprep.subr.mxu0 %v1220_v9  ;;  %v1284_v8 = vld [vmem:[%s5669_s9 + $0x1ca8] sm:$0xff] }
 0x237   : > { %5024 = vmatprep.subr.mxu1 %v1253_v10  ;;  %4992 = vmatpush3.msra.mxu0 %v1204_v11  ;;  %v1268_v9 = vld [vmem:[%s5669_s9 + $0x1c28] sm:$0xff]  ;;  %v1301_v10 = vld [vmem:[%s5669_s9 + $0x1d30] sm:$0xff] }
 0x238   : > { %5025 = vmatpush3.msra.mxu1 %v1237_v12  ;;  %4993 = vmatprep.subr.mxu0 %v1219_v13  ;;  %v366_v11 = vld [vmem:[%s5687_s22 + $0x70] sm:$0x3f]  ;;  %v1283_v12 = vld [vmem:[%s5669_s9 + $0x1ca0] sm:$0xff] }
 0x239   : > { %5026 = vmatprep.subr.mxu1 %v1252_v14  ;;  %4994 = vmatpush3.msra.mxu0 %v1203_v16  ;;  %v1267_v13 = vld [vmem:[%s5669_s9 + $0x1c20] sm:$0xff]  ;;  %v1300_v14 = vld [vmem:[%s5669_s9 + $0x1d28] sm:$0xff]  ;;  %v1571_v16 = vrot.slane %v366_v11, %v5737_v52 }
 0x23a   : > { %5027 = vmatpush3.msra.mxu1 %v1236_v17  ;;  %4995 = vmatprep.subr.mxu0 %v1218_v18  ;;  %v1266_v17 = vld [vmem:[%s5669_s9 + $0x1c18] sm:$0xff]  ;;  %v1299_v18 = vld [vmem:[%s5669_s9 + $0x1d20] sm:$0xff] }
 0x23b   : > { %5028 = vmatprep.subr.mxu1 %v1251_v19  ;;  %4996 = vmatpush3.msra.mxu0 %v1202_v20  ;;  %v1281_v19 = vld [vmem:[%s5669_s9 + $0x1c90] sm:$0xff] }
 0x23c   : > { %5029 = vmatpush3.msra.mxu1 %v1235_v21  ;;  %4997 = vmatprep.subr.mxu0 %v1217_v23  ;;  %v1265_v20 = vld [vmem:[%s5669_s9 + $0x1c10] sm:$0xff]  ;;  %v1298_v21 = vld [vmem:[%s5669_s9 + $0x1d18] sm:$0xff]  ;;  %v1579_v23 = vcombine.high %v1571_v16, %v1571_v16 }
 0x23d   : > { %5030 = vmatprep.subr.mxu1 %v1250_v24  ;;  %4998 = vmatpush3.msra.mxu0 %v1201_v26  ;;  %v1264_v24 = vld [vmem:[%s5669_s9 + $0x1c08] sm:$0xff]  ;;  %v1564_v26 = vcombine.high %v366_v11, %v366_v11 }
 0x23e   : > { %5031 = vmatpush3.msra.mxu1 %v1234_v27  ;;  %4999 = vmatprep.subr.mxu0 %v1216_v28  ;;  %v1297_v27 = vld [vmem:[%s5669_s9 + $0x1d10] sm:$0xff]  ;;  %v1263_v28 = vld [vmem:[%s5669_s9 + $0x1c00] sm:$0xff] }
 0x23f   : > { %5032 = vmatprep.subr.mxu1 %v1249_v29  ;;  %5000 = vmatpush3.msra.mxu0 %v1200_v30  ;;  %v1296_v29 = vld [vmem:[%s5669_s9 + $0x1d08] sm:$0xff]  ;;  %v1295_v30 = vld [vmem:[%s5669_s9 + $0x1d00] sm:$0xff] }
 0x240   : > { %5033 = vmatpush3.msra.mxu1 %v1233_v31  ;;  %5001 = vmatprep.subr.mxu0 %v1215_v33  ;;  %v1578_v31 = vrot.slane %v1564_v26, %v5737_v52  ;;  %v4128_v33 = vpop.f32.mrf.mxu1 }
 0x241   : > { %5034 = vmatprep.subr.mxu1 %v1248_v34  ;;  %5002 = vmatpush3.msra.mxu0 %v1199_v36 }
 0x242   : > { %3523 = vmatprep.mubr.f32.mxu0 %v1562_v35  ;;  %5035 = vmatpush3.msra.mxu1 %v1232_v37  ;;  %v4129_v36 = vpop.f32.mrf.mxu1 }
 0x243   : > { %3524 = vmatmul.mubr.f32.vlgmr.msra.gmra.mxu0 %v1554_v25  ;;  %5036 = vmatprep.subr.mxu1 %v1247_v38  ;;  %v1279_v25 = vld [vmem:[%s5669_s9 + $0x1c80] sm:$0xff] }
 0x244   : > { %5041 = vmatprep.subr.mxu0 %v1294_v39  ;;  %5037 = vmatpush3.msra.mxu1 %v1231_v41  ;;  %v4198_v38 = vpop.f32.mrf.mxu1 }
 0x245   : > { %3593 = vmatprep.mubr.f32.mxu1 %v1563_v40  ;;  %5042 = vmatpush3.msra.mxu0 %v1278_v42  ;;  %v4130_v40 = vadd.f32 %v4129_v36, %v4128_v33 }
 0x246   : > { %3594 = vmatmul.mubr.f32.vlgmr.msra.gmra.mxu1 %v1561_v32  ;;  %5043 = vmatprep.subr.mxu0 %v1293_v43  ;;  %v4093_v32 = vpop.f32.mrf.mxu0  ;;  %v4199_v42 = vpop.f32.mrf.mxu1 }
 0x247   : > { %5119 = vmatprep.subr.mxu1 %v5496_v47  ;;  %5044 = vmatpush3.msra.mxu0 %v1277_v44 }
 0x248   : > { %5120 = vmatpush3.msra.mxu1 %v1310_v45  ;;  %5045 = vmatprep.subr.mxu0 %v1292_v46  ;;  %v4094_v34 = vpop.f32.mrf.mxu0  ;;  %v4268_v45 = vpop.f32.mrf.mxu1 }
 0x249   : > { %5121 = vmatprep.subr.mxu1 %v5496_v47  ;;  %5046 = vmatpush3.msra.mxu0 %v1276_v48  ;;  %v4095_v39 = vadd.f32 %v4094_v34, %v4093_v32  ;;  %v4200_v48 = vadd.f32 %v4199_v42, %v4198_v38 }
 0x24a   : > { %5122 = vmatpush3.msra.mxu1 %v1309_v49  ;;  %5047 = vmatprep.subr.mxu0 %v1291_v50  ;;  %v4163_v35 = vpop.f32.mrf.mxu0  ;;  %v4269_v50 = vpop.f32.mrf.mxu1 }
 0x24b   : > { %5123 = vmatprep.subr.mxu1 %v5496_v47  ;;  %5048 = vmatpush3.msra.mxu0 %v1275_v51  ;;  %v1776_v43 = vadd.f32 %v4130_v40, %v4095_v39 }
 0x24c   : > { %5124 = vmatpush3.msra.mxu1 %v1308_v53  ;;  %5049 = vmatprep.subr.mxu0 %v1290_v54  ;;  %v4164_v37 = vpop.f32.mrf.mxu0  ;;  %v4338_v54 = vpop.f32.mrf.mxu1 }
 0x24d   : > { %5125 = vmatprep.subr.mxu1 %v5496_v47  ;;  %5050 = vmatpush3.msra.mxu0 %v1274_v55  ;;  %v4165_v52 = vadd.f32 %v4164_v37, %v4163_v35 }
 0x24e   : > { %5126 = vmatpush3.msra.mxu1 %v1307_v56  ;;  %5051 = vmatprep.subr.mxu0 %v1289_v57  ;;  %v4233_v41 = vpop.f32.mrf.mxu0  ;;  %v4270_v56 = vadd.f32 %v4269_v50, %v4268_v45 }
 0x24f   : > { %5127 = vmatprep.subr.mxu1 %v5496_v47  ;;  %5052 = vmatpush3.msra.mxu0 %v1273_v58  ;;  %v1846_v46 = vadd.f32 %v4165_v52, %v1776_v43 }
 0x250   : > { %5128 = vmatpush3.msra.mxu1 %v1306_v59  ;;  %5053 = vmatprep.subr.mxu0 %v1288_v60  ;;  %v4234_v44 = vpop.f32.mrf.mxu0  ;;  %v4339_v59 = vpop.f32.mrf.mxu1 }
 0x251   : > { %5129 = vmatprep.subr.mxu1 %v5496_v47  ;;  %5054 = vmatpush3.msra.mxu0 %v1272_v61  ;;  %v4235_v49 = vadd.f32 %v4234_v44, %v4233_v41  ;;  %v1916_v51 = vadd.f32 %v4200_v48, %v1846_v46 }
 0x252   : > { %5130 = vmatpush3.msra.mxu1 %v1305_v62  ;;  %5055 = vmatprep.subr.mxu0 %v1287_v63  ;;  %v4408_v62 = vpop.f32.mrf.mxu1 }
 0x253   : > { %5131 = vmatprep.subr.mxu1 %v5496_v47  ;;  %5056 = vmatpush3.msra.mxu0 %v1271_v0  ;;  %v1986_v55 = vadd.f32 %v4235_v49, %v1916_v51  ;;  %v4340_v0 = vadd.f32 %v4339_v59, %v4338_v54 }
 0x254   : > { %5132 = vmatpush3.msra.mxu1 %v1304_v1  ;;  %5057 = vmatprep.subr.mxu0 %v1286_v2 }
 0x255   : > { %5133 = vmatprep.subr.mxu1 %v5496_v47  ;;  %5058 = vmatpush3.msra.mxu0 %v1270_v3  ;;  %v2056_v60 = vadd.f32 %v4270_v56, %v1986_v55  ;;  %v4409_v3 = vpop.f32.mrf.mxu1 }
 0x256   : > { %5134 = vmatpush3.msra.mxu1 %v1303_v4  ;;  %5059 = vmatprep.subr.mxu0 %v1285_v5 }
 0x257   : > { %5135 = vmatprep.subr.mxu1 %v5496_v47  ;;  %5060 = vmatpush3.msra.mxu0 %v1269_v6  ;;  %v4478_v6 = vpop.f32.mrf.mxu1 }
 0x258   : > { %5136 = vmatpush3.msra.mxu1 %v1302_v7  ;;  %5061 = vmatprep.subr.mxu0 %v1284_v8  ;;  %v4410_v8 = vadd.f32 %v4409_v3, %v4408_v62 }
 0x259   : > { %5137 = vmatprep.subr.mxu1 %v5496_v47  ;;  %5062 = vmatpush3.msra.mxu0 %v1268_v9  ;;  %v4479_v11 = vpop.f32.mrf.mxu1 }
 0x25a   : > { %5138 = vmatpush3.msra.mxu1 %v1301_v10  ;;  %5063 = vmatprep.subr.mxu0 %v1283_v12 }
 0x25b   : > { %5139 = vmatprep.subr.mxu1 %v5496_v47  ;;  %5064 = vmatpush3.msra.mxu0 %v1267_v13 }
 0x25c   : > { %5140 = vmatpush3.msra.mxu1 %v1300_v14  ;;  %5065 = vmatprep.subr.mxu0 %v1282_v15  ;;  %v4548_v14 = vpop.f32.mrf.mxu1 }
 0x25d   : > { %5141 = vmatprep.subr.mxu1 %v5496_v47  ;;  %5066 = vmatpush3.msra.mxu0 %v1266_v17 }
 0x25e   : > { %5142 = vmatpush3.msra.mxu1 %v1299_v18  ;;  %5067 = vmatprep.subr.mxu0 %v1281_v19  ;;  %v4549_v19 = vpop.f32.mrf.mxu1 }
 0x25f   : > { %5143 = vmatprep.subr.mxu1 %v5496_v47  ;;  %5068 = vmatpush3.msra.mxu0 %v1265_v20 }
 0x260   : > { %5144 = vmatpush3.msra.mxu1 %v1298_v21  ;;  %5069 = vmatprep.subr.mxu0 %v1280_v22  ;;  %v4618_v22 = vpop.f32.mrf.mxu1 }
 0x261   : > { %5145 = vmatprep.subr.mxu1 %v5496_v47  ;;  %5070 = vmatpush3.msra.mxu0 %v1264_v24  ;;  %v4550_v24 = vadd.f32 %v4549_v19, %v4548_v14 }
 0x262   : > { %3663 = vmatprep.mubr.f32.mxu0 %v1579_v23  ;;  %5071 = vmatprep.subr.mxu0 %v1279_v25 }
 0x263   : > { %5146 = vmatpush3.msra.mxu1 %v1297_v27  ;;  %5072 = vmatpush3.msra.mxu0 %v1263_v28  ;;  %v4619_v27 = vpop.f32.mrf.mxu1 }
 0x264   : > { %5147 = vmatprep.subr.mxu1 %v5496_v47  ;;  %3664 = vmatmul.mubr.f32.vlgmr.msra.gmra.mxu0 %v1571_v16  ;;  %v4480_v16 = vadd.f32 %v4479_v11, %v4478_v6  ;;  %v4620_v32 = vadd.f32 %v4619_v27, %v4618_v22 }
 0x265   : > { %5148 = vmatpush3.msra.mxu1 %v1296_v29  ;;  %5151 = vmatprep.mubr.msk.f32.mxu1 %vm5497_vm0, %v5496_v47 }
 0x266   : > { %5149 = vmatprep.subr.mxu1 %v5496_v47  ;;  %v4303_v47 = vpop.f32.mrf.mxu0 }
 0x267   : > { %5150 = vmatpush3.msra.mxu1 %v1295_v30  ;;  %v4688_v30 = vpop.f32.mrf.mxu1 }
 0x268   : > { %5152 = vmatmul.mubr.f32.vlgmr.msra.gmra.mxu1 %v1578_v31  ;;  %v4304_v53 = vpop.f32.mrf.mxu0 }
 0x269   : > { %v4305_v58 = vadd.f32 %v4304_v53, %v4303_v47  ;;  %v4689_v35 = vpop.f32.mrf.mxu1 }
 0x26a   : > { %v4373_v57 = vpop.f32.mrf.mxu0  ;;  %v4690_v40 = vadd.f32 %v4689_v35, %v4688_v30 }
 0x26b   : > { %v2126_v63 = vadd.f32 %v4305_v58, %v2056_v60 }
 0x26c   : > { %v4374_v61 = vpop.f32.mrf.mxu0 }
 0x26d   : > { %v4375_v2 = vadd.f32 %v4374_v61, %v4373_v57  ;;  %v2196_v4 = vadd.f32 %v4340_v0, %v2126_v63 }
 0x26e   : > { %v4443_v1 = vpop.f32.mrf.mxu0 }
 0x26f   : > { %v2266_v7 = vadd.f32 %v4375_v2, %v2196_v4 }
 0x270   : > { %v4444_v5 = vpop.f32.mrf.mxu0 }
 0x271   : > { %v4445_v10 = vadd.f32 %v4444_v5, %v4443_v1  ;;  %v2336_v12 = vadd.f32 %v4410_v8, %v2266_v7 }
 0x272   : > { %v4513_v9 = vpop.f32.mrf.mxu0 }
 0x273   : > { %v2406_v15 = vadd.f32 %v4445_v10, %v2336_v12 }
 0x274   : > { %v4514_v13 = vpop.f32.mrf.mxu0 }
 0x275   : > { %v4515_v18 = vadd.f32 %v4514_v13, %v4513_v9  ;;  %v2476_v20 = vadd.f32 %v4480_v16, %v2406_v15 }
 0x276   : > { %v4583_v17 = vpop.f32.mrf.mxu0 }
 0x277   : > { %v2546_v23 = vadd.f32 %v4515_v18, %v2476_v20 }
 0x278   : > { %v4584_v21 = vpop.f32.mrf.mxu0 }
 0x279   : > { %v4585_v26 = vadd.f32 %v4584_v21, %v4583_v17  ;;  %v2616_v28 = vadd.f32 %v4550_v24, %v2546_v23  ;;  %v351_v21 = vld [vmem:[#allocation2] sm:$0x3] }
 0x27a   : > { %v4653_v25 = vpop.f32.mrf.mxu0 }
 0x27b   : > { %v2686_v31 = vadd.f32 %v4585_v26, %v2616_v28 }
 0x27c   : > { %v4654_v29 = vpop.f32.mrf.mxu0 }
 0x27d   : > { %v4655_v34 = vadd.f32 %v4654_v29, %v4653_v25  ;;  %v2756_v36 = vadd.f32 %v4620_v32, %v2686_v31 }
 0x27e   : > { %v4723_v33 = vpop.f32.mrf.mxu0  ;;  %v4758_v38 = vpop.f32.mrf.mxu1 }
 0x27f   : > { %v2826_v39 = vadd.f32 %v4655_v34, %v2756_v36 }
 0x280   : > { %v4724_v37 = vpop.f32.mrf.mxu0  ;;  %v4759_v42 = vpop.f32.mrf.mxu1 }
 0x281   : > { %v4725_v52 = vadd.f32 %v4724_v37, %v4723_v33  ;;  %v2896_v43 = vadd.f32 %v4690_v40, %v2826_v39  ;;  %v4760_v48 = vadd.f32 %v4759_v42, %v4758_v38 }
 0x283   : > { %v2966_v46 = vadd.f32 %v4725_v52, %v2896_v43 }
 0x285   : > { %v3036_v51 = vadd.f32 %v4760_v48, %v2966_v46 }
 0x29d   : > { %v4793_v41 = vpop.f32.mrf.mxu0 }
 0x29f   : > { %v4794_v44 = vpop.f32.mrf.mxu0 }
 0x2a0   : > { %v4828_v45 = vpop.f32.mrf.mxu1  ;;  %v4795_v49 = vadd.f32 %v4794_v44, %v4793_v41 }
 0x2a2   : > { %v4829_v50 = vpop.f32.mrf.mxu1  ;;  %v3106_v55 = vadd.f32 %v4795_v49, %v3036_v51 }
 0x2a3   : > { %v4830_v56 = vadd.f32 %v4829_v50, %v4828_v45 }
 0x2a5   : > { %v3176_v60 = vadd.f32 %v4830_v56, %v3106_v55 }
 0x2bf   : > { %v4863_v47 = vpop.f32.mrf.mxu0 }
 0x2c1   : > { %v4864_v53 = vpop.f32.mrf.mxu0 }
 0x2c2   : > { %v4898_v54 = vpop.f32.mrf.mxu1  ;;  %v4865_v58 = vadd.f32 %v4864_v53, %v4863_v47 }
 0x2c4   : > { %v4899_v59 = vpop.f32.mrf.mxu1  ;;  %v3246_v63 = vadd.f32 %v4865_v58, %v3176_v60 }
 0x2c5   : > { %v4900_v0 = vadd.f32 %v4899_v59, %v4898_v54 }
 0x2c7   : > { %v3316_v4 = vadd.f32 %v4900_v0, %v3246_v63 }
 0x2e1   : > { %v4933_v57 = vpop.f32.mrf.mxu0 }
 0x2e3   : > { %v4934_v61 = vpop.f32.mrf.mxu0 }
 0x2e4   : > { %v4968_v62 = vpop.f32.mrf.mxu1  ;;  %v4935_v2 = vadd.f32 %v4934_v61, %v4933_v57 }
 0x2e6   : > { %v4969_v3 = vpop.f32.mrf.mxu1  ;;  %v3386_v7 = vadd.f32 %v4935_v2, %v3316_v4 }
 0x2e7   : > { %v4970_v8 = vadd.f32 %v4969_v3, %v4968_v62 }
 0x2e9   : > { %v3456_v11 = vadd.f32 %v4970_v8, %v3386_v7 }
 0x303   : > { %v5003_v1 = vpop.f32.mrf.mxu0 }
 0x305   : > { %v5004_v5 = vpop.f32.mrf.mxu0 }
 0x306   : > { %v5038_v6 = vpop.f32.mrf.mxu1  ;;  %v5005_v9 = vadd.f32 %v5004_v5, %v5003_v1 }
 0x308   : > { %v5039_v10 = vpop.f32.mrf.mxu1  ;;  %v3526_v12 = vadd.f32 %v5005_v9, %v3456_v11 }
 0x309   : > { %v5040_v13 = vadd.f32 %v5039_v10, %v5038_v6 }
 0x30b   : > { %v3596_v16 = vadd.f32 %v5040_v13, %v3526_v12 }
 0x324   : > { %v5073_v14 = vpop.f32.mrf.mxu0 }
 0x326   : > { %v5074_v15 = vpop.f32.mrf.mxu0 }
 0x327   : > { %v5075_v17 = vadd.f32 %v5074_v15, %v5073_v14 }
 0x328   : > { %v3735_v18 = vpop.f32.mrf.mxu1 }
 0x329   : > { %v3666_v19 = vadd.f32 %v5075_v17, %v3596_v16 }
 0x32a   : > { %v5153_v20 = vpop.f32.mrf.mxu1 }
 0x32b   : > { %v3736_v22 = vadd.f32 %v3735_v18, %v3666_v19  ;;  %3744 = sbr.rel (%p4051_p7) target bundleno = 1242 (0x4da), region = 72 }
 0x32d   : > { %v3739_v23 = vadd.f32 %v3736_v22, %v351_v21 }
 0x32f   : > { %3740 = vst [vmem:[#allocation2] sm:$0x3] %v3739_v23 }
 0x330   : > { %v3770_v24 = vld [vmem:[%s6826_s3 + $0x78] sm:$0xff]  ;;  %v5498_v25 = vmov 0.0   ;;  %v3769_v26 = vld [vmem:[%s6826_s3 + $0x70] sm:$0xff]  ;;  %vm5499_vm1 = vmmov 0   ;;  %v3768_v27 = vld [vmem:[%s6826_s3 + $0x68] sm:$0xff]  ;;  %vm3864_vm2 = vcmask 523264  }
 0x331   : > { %5154 = vmatprep.subr.mxu0 %v5498_v25  ;;  %5186 = vmatprep.mubr.msk.f32.mxu0 %vm5499_vm1, %v5498_v25  ;;  %v3767_v28 = vld [vmem:[%s6826_s3 + $0x60] sm:$0xff]  ;;  %v3856_v29 = vld [vmem:[%s6828_s5 + $0x38] sm:$0xff]  ;;  %v3855_v30 = vld [vmem:[%s6828_s5 + $0x30] sm:$0xff]  ;;  %vm3938_vm3 = vcmask 74752  }
 0x332   : > { %5155 = vmatpush3.msra.mxu0 %v3770_v24  ;;  %5189 = vmatprep.subr.mxu1 %v5498_v25  ;;  %v3766_v31 = vld [vmem:[%s6826_s3 + $0x58] sm:$0xff]  ;;  %v3854_v32 = vld [vmem:[%s6828_s5 + $0x28] sm:$0xff]  ;;  %v3765_v33 = vld [vmem:[%s6826_s3 + $0x50] sm:$0xff] }
 0x333   : > { %5156 = vmatprep.subr.mxu0 %v5498_v25  ;;  %5205 = vmatprep.mubr.msk.f32.mxu1 %vm5499_vm1, %v5498_v25  ;;  %v3853_v34 = vld [vmem:[%s6828_s5 + $0x20] sm:$0xff]  ;;  %v3764_v35 = vld [vmem:[%s6826_s3 + $0x48] sm:$0xff]  ;;  %v3852_v36 = vld [vmem:[%s6828_s5 + $0x18] sm:$0xff] }
 0x334   : > { %5157 = vmatpush3.msra.mxu0 %v3769_v26  ;;  %5190 = vmatpush3.msra.mxu1 %v3856_v29  ;;  %v3763_v37 = vld [vmem:[%s6826_s3 + $0x40] sm:$0xff]  ;;  %v3762_v38 = vld [vmem:[%s6826_s3 + $0x38] sm:$0xff]  ;;  %v3761_v39 = vld [vmem:[%s6826_s3 + $0x30] sm:$0xff] }
 0x335   : > { %5158 = vmatprep.subr.mxu0 %v5498_v25  ;;  %5191 = vmatprep.subr.mxu1 %v5498_v25  ;;  %v3760_v40 = vld [vmem:[%s6826_s3 + $0x28] sm:$0xff]  ;;  %v3759_v41 = vld [vmem:[%s6826_s3 + $0x20] sm:$0xff]  ;;  %v3758_v43 = vld [vmem:[%s6826_s3 + $0x18] sm:$0xff] }
 0x336   : > { %5159 = vmatpush3.msra.mxu0 %v3768_v27  ;;  %5192 = vmatpush3.msra.mxu1 %v3855_v30  ;;  %v3745_v52 = vld [vmem:[#allocation2] sm:$0x3]  ;;  %v4052_v42 = vld [vmem:[#allocation6] ss:$0 sm:$0xff]  ;;  %v3757_v44 = vld [vmem:[%s6826_s3 + $0x10] sm:$0xff] }
 0x337   : > { %5160 = vmatprep.subr.mxu0 %v5498_v25  ;;  %5193 = vmatprep.subr.mxu1 %v5498_v25  ;;  %v3753_v45 = vadd.f32 %v4052_v42, %v3745_v52  ;;  %v3756_v46 = vld [vmem:[%s6826_s3 + $0x8] sm:$0xff]  ;;  %v3755_v48 = vld [vmem:[%s6826_s3] sm:$0xff]  ;;  %v3851_v49 = vld [vmem:[%s6828_s5 + $0x10] sm:$0xff] }
 0x338   : > { %5161 = vmatpush3.msra.mxu0 %v3767_v28  ;;  %5194 = vmatpush3.msra.mxu1 %v3854_v32  ;;  %v3850_v50 = vld [vmem:[%s6828_s5 + $0x8] sm:$0xff]  ;;  %v3849_v51 = vld [vmem:[%s6828_s5] sm:$0xff] }
 0x339   : > { %5162 = vmatprep.subr.mxu0 %v5498_v25  ;;  %5195 = vmatprep.subr.mxu1 %v5498_v25  ;;  %v3754_v47 = vmax.f32 %v3753_v45, 0.0  ;;  %v4053_v53 = vld [vmem:[#allocation8] ss:$0 sm:$0xff]  ;;  %v4054_v58 = vld [vmem:[#allocation9] ss:$0 sm:$0xff] }
 0x33a   : > { %5163 = vmatpush3.msra.mxu0 %v3766_v31  ;;  %5196 = vmatpush3.msra.mxu1 %v3853_v34 }
 0x33b   : > { %5164 = vmatprep.subr.mxu0 %v5498_v25  ;;  %5197 = vmatprep.subr.mxu1 %v5498_v25 }
 0x33c   : > { %5165 = vmatpush3.msra.mxu0 %v3765_v33  ;;  %5198 = vmatpush3.msra.mxu1 %v3852_v36 }
 0x33d   : > { %5166 = vmatprep.subr.mxu0 %v5498_v25  ;;  %5199 = vmatprep.subr.mxu1 %v5498_v25 }
 0x33e   : > { %5167 = vmatpush3.msra.mxu0 %v3764_v35  ;;  %5200 = vmatpush3.msra.mxu1 %v3851_v49 }
 0x33f   : > { %5168 = vmatprep.subr.mxu0 %v5498_v25  ;;  %5201 = vmatprep.subr.mxu1 %v5498_v25 }
 0x340   : > { %5169 = vmatpush3.msra.mxu0 %v3763_v37  ;;  %5202 = vmatpush3.msra.mxu1 %v3850_v50 }
 0x341   : > { %5170 = vmatprep.subr.mxu0 %v5498_v25  ;;  %5203 = vmatprep.subr.mxu1 %v5498_v25 }
 0x342   : > { %5171 = vmatpush3.msra.mxu0 %v3762_v38  ;;  %5204 = vmatpush3.msra.mxu1 %v3849_v51 }
 0x343   : > { %5172 = vmatprep.subr.mxu0 %v5498_v25 }
 0x344   : > { %5173 = vmatpush3.msra.mxu0 %v3761_v39 }
 0x345   : > { %5174 = vmatprep.subr.mxu0 %v5498_v25 }
 0x346   : > { %5175 = vmatpush3.msra.mxu0 %v3760_v40 }
 0x347   : > { %5176 = vmatprep.subr.mxu0 %v5498_v25 }
 0x348   : > { %5177 = vmatpush3.msra.mxu0 %v3759_v41 }
 0x349   : > { %5178 = vmatprep.subr.mxu0 %v5498_v25 }
 0x34a   : > { %5179 = vmatpush3.msra.mxu0 %v3758_v43 }
 0x34b   : > { %5180 = vmatprep.subr.mxu0 %v5498_v25 }
 0x34c   : > { %5181 = vmatpush3.msra.mxu0 %v3757_v44 }
 0x34d   : > { %5182 = vmatprep.subr.mxu0 %v5498_v25 }
 0x34e   : > { %5183 = vmatpush3.msra.mxu0 %v3756_v46 }
 0x34f   : > { %5184 = vmatprep.subr.mxu0 %v5498_v25 }
 0x350   : > { %5185 = vmatpush3.msra.mxu0 %v3755_v48 }
 0x351   : > { %5187 = vmatmul.mubr.f32.vlgmr.msra.gmra.mxu0 %v3754_v47 }
 0x411   : > { %v3844_v54 = vpop.f32.mrf.mxu0 }
 0x412   : > { %v3845_v55 = vadd.f32 %v4053_v53, %v3844_v54 }
 0x413   : > { %v5188_v56 = vpop.f32.mrf.mxu0 }
 0x414   : > { %v3848_v57 = vmax.f32 %v3845_v55, 0.0 }
 0x416   : > { %5206 = vmatmul.mubr.msk.f32.vlgmr.msra.gmra.mxu1 %vm3864_vm2, %v3848_v57 }
 0x4d6   : > { %v3934_v59 = vpop.f32.mrf.mxu1 }
 0x4d7   : > { %v3935_v60 = vadd.f32 %v4054_v58, %v3934_v59 }
 0x4d8   : > { %v5207_v61 = vpop.f32.mrf.mxu1 }
 0x4d9   : > { %3939 = vst.msk [vmem:[#allocation11] sm:$0x3] %vm3938_vm3, %v3935_v60 }
 0x4da PF: > { %p5249_p10 = scmp.eq.s32.totalorder %s5560_s28, 3  ;;  %s5500_s9 = smov [#allocation11]  }
 0x4db   : > { %s3947_s30 = sshll.u32 %s5500_s9, 4  ;;  %s3948_s30 = int_to_ptr.vmem [resolvable:$true] %s3947_s30 }
 0x4dc   : > { %s5416_s18 = scalar_lea.vmem %s3948_s30, 32  ;;  %p5423_p0 = scmp.lt.s32.totalorder %s3948_s30, %s3948_s30 }
 0x4dd   : > { %p5417_p11 = scmp.ne.s32.totalorder %s3948_s30, %s5416_s18  ;;  %p5424_p4 = scmp.lt.s32.totalorder %s5416_s18, %s5416_s18 }
 0x4df   : > { %p5418_p13 = pnand %p5417_p11, %p5249_p10  ;;  %p5425_p1 = por %p5424_p4, %p5423_p0 }
 0x4e1   : > { %p5419_p8 = pneg %p5418_p13 }
 0x4e3   : > { %p5426_p6 = pnand %p5425_p1, %p5419_p8 }
 0x4e5   : > { %5429 = shalt.err (!%p5426_p6)
}
 0x4e6   : > { %5225 = dma.vmem_to_hbm [thread:$0]  (%p5249_p10), %s3948_s30, 32, %s6830_s7, [#allocation5]  }
 0x4e7   : > { %5469 = dma.done.wait (%p5249_p10), [#allocation5], 32  }
 0x4e8   : > { %5471 = vsyncadd (%p5249_p10), [#allocation5], 4294967264 }
 0x4e9 PF: > { %p20_p12 = scmp.ge.s32.totalorder %s5620_s10, 6   ;;  %s6845_s24 = smov %s5478_s25 }
 0x4ea   : > { %s6846_s25 = smov %s5482_s26  ;;  %s6847_s26 = smov %s5630_s13 }
 0x4eb   : > { %s6848_s27 = smov %s5620_s10  ;;  %22 = sbr.rel (!%p20_p12) target bundleno = 6 (0x6), region = 108 }
 0x4f0   :  { %3960 = vsyncpa [#allocation4], 1 }
 0x4f1   :  { %3962 = vsyncpa [#allocation4 + $0x1], 1 }
 0x4f2   :  { %3963 = vsyncpa [#allocation7], 1 }
 0x4f3   :  { %3964 = vsyncpa [#allocation10], 1 }
 0x4f4   :  { %3965 = vsyncpa [#allocation5], 1 }
 0x4f5   :  { %3967 = vsyncpa [#allocation5 + $0x1], 1 }

</bundles_post_ra>
